<compile_context>
chip_gen: v7x
topology: tpu7x:2x2x1
jax: 0.10.0
libtpu: 0.0.40
codegen_flags: <defaults>
</compile_context>

<pallas_src>
import jax
import jax.numpy as jnp
from jax.experimental import pallas as pl
from jax.experimental.pallas import tpu as pltpu

NUM_CLASSES = 48
BN_EPS = 1e-5


# ----------------------------------------------------------------------------
# Kernel A: conv1 -> pool1 -> conv2 -> pool2 (per sample, fully VMEM-resident)
#
# Row layout of the conv1 patch matrix (built by cheap XLA glue, per sample):
#   row = P*320 + qp*160 + u*16 + vv      (1280 rows, K padded 9 -> 128 lanes)
#     P  = pool1 phase  (s, t) in {0,1}^2           -> pool1 = max of 4 blocks
#     qp = column parity of the pooled output column
#     u  = pooled row (0..9), vv = pooled column // 2 (0..8, padded to 16)
#   i.e. the row corresponds to conv1 output position (2u+s, 4vv+2qp+t).
#
# After pool1 (max over the 4 P-blocks), z1 row = qp*160 + u*16 + vv, so every
# conv2 tap window z1[u in kh..kh+7, col = 2b + (q+kw)] is the aligned slice
# z1[(c%2)*160 + kh*16 : +128] reshaped to (8,16,128) and column-sliced.
# conv2 output rows are ordered q*64 + oh*8 + b (ow = 2b+q), so pool2 is the max
# of the two 64-row halves followed by a max over adjacent 8-row groups.
# ----------------------------------------------------------------------------
def _conv_stage_kernel(p_ref, w1_ref, s1_ref, t1_ref, w2_ref, s2_ref, t2_ref,
                       o_ref):
    # ---- conv1 (prebuilt im2col patches) + folded BN + ReLU (f32 epilogue) ----
    y1 = jnp.dot(p_ref[0], w1_ref[...], preferred_element_type=jnp.float32)
    y1 = jnp.maximum(y1 * s1_ref[...] + t1_ref[...], 0.0)          # (1280, 128)

    # ---- maxpool1: max over the 4 pool-phase blocks (8-aligned row slices) ----
    z1 = jnp.maximum(jnp.maximum(y1[0:320], y1[320:640]),
                     jnp.maximum(y1[640:960], y1[960:1280]))        # (320, 128)

    # ---- conv2: 9-tap in-kernel im2col, bf16 MXU matmuls, f32 accumulation ----
    halves = []
    for q in range(2):                       # q = output-column parity (ow = 2b+q)
        acc = jnp.zeros((64, 128), jnp.float32)
        for kh in range(3):
            for kw in range(3):
                c = q + kw
                base = (c % 2) * 160 + kh * 16           # 8-aligned row offset
                tap = z1[base:base + 128].reshape(8, 16, 128)
                tap = tap[:, c // 2:c // 2 + 8, :].reshape(64, 128)
                acc = acc + jnp.dot(tap.astype(jnp.bfloat16),
                                    w2_ref[kh * 3 + kw],
                                    preferred_element_type=jnp.float32)
        halves.append(acc)
    y2 = jnp.concatenate(halves, axis=0)                            # (128, 128)
    y2 = jnp.maximum(y2 * s2_ref[...] + t2_ref[...], 0.0)

    # ---- maxpool2: width = max of the two parity halves; height = row pairs ----
    yw = jnp.maximum(y2[0:64], y2[64:128])          # (64,128), row = oh*8 + b
    yw = yw.reshape(4, 2, 8, 128)                   # (a, oh%2, b, C)
    z2 = jnp.maximum(yw[:, 0], yw[:, 1]).reshape(32, 128)   # row = a*8 + b
    o_ref[0] = z2.astype(o_ref.dtype)


def conv_stage(patches, pk):
    n = patches.shape[0]
    return pl.pallas_call(
        _conv_stage_kernel,
        grid=(n,),
        in_specs=[
            pl.BlockSpec((1, 1280, 128), lambda i: (i, 0, 0)),   # per-sample patches
            pl.BlockSpec((128, 128), lambda i: (0, 0)),          # conv1 weight (resident)
            pl.BlockSpec((1, 128), lambda i: (0, 0)),            # bn1 scale
            pl.BlockSpec((1, 128), lambda i: (0, 0)),            # bn1 shift
            pl.BlockSpec((9, 128, 128), lambda i: (0, 0, 0)),    # conv2 weights (resident)
            pl.BlockSpec((1, 128), lambda i: (0, 0)),            # bn2 scale
            pl.BlockSpec((1, 128), lambda i: (0, 0)),            # bn2 shift
        ],
        out_specs=pl.BlockSpec((1, 32, 128), lambda i: (i, 0, 0)),
        out_shape=jax.ShapeDtypeStruct((n, 32, 128), jnp.bfloat16),
        compiler_params=pltpu.CompilerParams(dimension_semantics=("parallel",)),
    )(patches, pk["w1m"], pk["s1"], pk["t1"], pk["w2m"], pk["s2"], pk["t2"])


# ----------------------------------------------------------------------------
# Kernel B: fc (4096 -> 128) + fc2 (128 -> 48, padded to 128 lanes), batched.
# ----------------------------------------------------------------------------
def _fc_stage_kernel(x_ref, wa_ref, ba_ref, wb_ref, bb_ref, o_ref):
    h = jnp.dot(x_ref[...], wa_ref[...],
                preferred_element_type=jnp.float32) + ba_ref[...]
    out = jnp.dot(h.astype(jnp.bfloat16), wb_ref[...],
                  preferred_element_type=jnp.float32) + bb_ref[...]
    o_ref[...] = out


def fc_stage(flat, pk):
    n = flat.shape[0]
    return pl.pallas_call(
        _fc_stage_kernel,
        out_shape=jax.ShapeDtypeStruct((n, 128), jnp.float32),
    )(flat, pk["wfc"], pk["bfc"], pk["wfc2"], pk["bfc2"])


# ----------------------------------------------------------------------------
# One-time weight prepacking (outside jit): BN folding, conv->matmul layout,
# fc weight permuted to match PyTorch's NCHW flatten, fc2 padded to 128 classes.
# ----------------------------------------------------------------------------
def prepack(params):
    f32 = jnp.float32
    s1 = params["bn1_gamma"] / jnp.sqrt(params["bn1_var"] + BN_EPS)
    t1 = (params["conv1_b"] - params["bn1_mean"]) * s1 + params["bn1_beta"]
    s2 = params["bn2_gamma"] / jnp.sqrt(params["bn2_var"] + BN_EPS)
    t2 = (params["conv2_b"] - params["bn2_mean"]) * s2 + params["bn2_beta"]

    # conv1 (128,1,3,3) -> (K=9 padded to 128, Cout=128), k = kh*3+kw
    w1 = params["conv1_w"].reshape(128, 9).T
    w1m = jnp.zeros((128, 128), f32).at[:9].set(w1).astype(jnp.bfloat16)

    # conv2 (Cout,Cin,3,3) -> (tap, Cin, Cout)
    w2m = jnp.transpose(params["conv2_w"], (2, 3, 1, 0)).reshape(9, 128, 128)
    w2m = w2m.astype(jnp.bfloat16)

    # fc (128, 4096): PyTorch flat index = c*32 + s; our flat index = s*128 + c.
    wfc = params["fc_w"].reshape(128, 128, 32)            # (o, c, s)
    wfc = jnp.transpose(wfc, (2, 1, 0)).reshape(4096, 128).astype(jnp.bfloat16)

    # fc2 (48, 128) -> (128, 128) with class dim padded to full lane width.
    wfc2 = jnp.zeros((128, 128), f32).at[:, :NUM_CLASSES].set(
        params["fc2_w"].T).astype(jnp.bfloat16)
    bfc2 = jnp.zeros((128,), f32).at[:NUM_CLASSES].set(params["fc2_b"])

    return dict(
        w1m=w1m, s1=s1.reshape(1, 128).astype(f32), t1=t1.reshape(1, 128).astype(f32),
        w2m=w2m, s2=s2.reshape(1, 128).astype(f32), t2=t2.reshape(1, 128).astype(f32),
        wfc=wfc, bfc=params["fc_b"].reshape(1, 128).astype(f32),
        wfc2=wfc2, bfc2=bfc2.reshape(1, 128),
    )


def init_params(key):
    ks = jax.random.split(key, 16)
    p = {}
    p["conv1_w"] = 0.1 * jax.random.normal(ks[0], (128, 1, 3, 3), jnp.float32)
    p["conv1_b"] = 0.1 * jax.random.normal(ks[1], (128,), jnp.float32)
    p["bn1_gamma"] = 1.0 + 0.1 * jax.random.normal(ks[2], (128,), jnp.float32)
    p["bn1_beta"] = 0.1 * jax.random.normal(ks[3], (128,), jnp.float32)
    p["bn1_mean"] = 0.1 * jax.random.normal(ks[4], (128,), jnp.float32)
    p["bn1_var"] = jax.random.uniform(ks[5], (128,), jnp.float32, 0.5, 1.5)
    p["conv2_w"] = 0.05 * jax.random.normal(ks[6], (128, 128, 3, 3), jnp.float32)
    p["conv2_b"] = 0.1 * jax.random.normal(ks[7], (128,), jnp.float32)
    p["bn2_gamma"] = 1.0 + 0.1 * jax.random.normal(ks[8], (128,), jnp.float32)
    p["bn2_beta"] = 0.1 * jax.random.normal(ks[9], (128,), jnp.float32)
    p["bn2_mean"] = 0.1 * jax.random.normal(ks[10], (128,), jnp.float32)
    p["bn2_var"] = jax.random.uniform(ks[11], (128,), jnp.float32, 0.5, 1.5)
    p["fc_w"] = 0.02 * jax.random.normal(ks[12], (128, 4 * 8 * 128), jnp.float32)
    p["fc_b"] = 0.1 * jax.random.normal(ks[13], (128,), jnp.float32)
    p["fc2_w"] = 0.05 * jax.random.normal(ks[14], (NUM_CLASSES, 128), jnp.float32)
    p["fc2_b"] = 0.1 * jax.random.normal(ks[15], (NUM_CLASSES,), jnp.float32)
    return p


# ----------------------------------------------------------------------------
# Forward pass (eval mode: BN folded into scale/shift, dropout = identity)
# ----------------------------------------------------------------------------
def convnet_forward(pk, x_nchw):
    n, cin, hh, ww = x_nchw.shape
    assert (cin, hh, ww) == (1, 22, 38)
    x2d = x_nchw.reshape(n, 22, 38).astype(jnp.float32)

    # conv1 im2col on the tiny input, rows ordered (pool-phase | col-parity | u | vv),
    # vv padded 9->16 and tap axis padded 9->128 so every kernel operand is aligned.
    taps = [x2d[:, kh:kh + 20, kw:kw + 36] for kh in range(3) for kw in range(3)]
    p = jnp.stack(taps, axis=-1)                        # (n, 20, 36, 9): [oh, ow, k]
    p = p.reshape(n, 10, 2, 9, 2, 2, 9)                 # (n, u, s, vv, qp, t, k)
    p = p.transpose(0, 2, 5, 4, 1, 3, 6)                # (n, s, t, qp, u, vv, k)
    p = jnp.pad(p, ((0, 0),) * 5 + ((0, 7), (0, 0)))    # vv: 9 -> 16
    p = p.reshape(n, 1280, 9).astype(jnp.bfloat16)
    patches = jnp.pad(p, ((0, 0), (0, 0), (0, 119)))    # K: 9 -> 128

    z2 = conv_stage(patches, pk)                        # (n, 32, 128), row = h*8+w
    flat = z2.reshape(n, 32 * 128)                      # (s, c)-major; fc weight pre-permuted
    logits = fc_stage(flat, pk)                         # (n, 128) f32, classes padded
    return logits[:, :NUM_CLASSES]


# ----------------------------------------------------------------------------
# Pure-JAX (XLA) reference of the original PyTorch module, for verification.
# ----------------------------------------------------------------------------
def reference_forward(params, x_nchw):
    x = x_nchw.astype(jnp.float32)

    def block(x, w, b, gamma, beta, mean, var):
        y = jax.lax.conv_general_dilated(
            x, w, window_strides=(1, 1), padding="VALID",
            dimension_numbers=("NCHW", "OIHW", "NCHW"))
        y = y + b.reshape(1, -1, 1, 1)
        y = (y - mean.reshape(1, -1, 1, 1)) / jnp.sqrt(
            var.reshape(1, -1, 1, 1) + BN_EPS)
        y = y * gamma.reshape(1, -1, 1, 1) + beta.reshape(1, -1, 1, 1)
        y = jnp.maximum(y, 0.0)
        nn, cc, hh, ww = y.shape
        return y.reshape(nn, cc, hh // 2, 2, ww // 2, 2).max(axis=(3, 5))

    z = block(x, params["conv1_w"], params["conv1_b"], params["bn1_gamma"],
              params["bn1_beta"], params["bn1_mean"], params["bn1_var"])
    z = block(z, params["conv2_w"], params["conv2_b"], params["bn2_gamma"],
              params["bn2_beta"], params["bn2_mean"], params["bn2_var"])
    flat = z.reshape(z.shape[0], -1)
    h = flat @ params["fc_w"].T + params["fc_b"]
    return h @ params["fc2_w"].T + params["fc2_b"]


if __name__ == "__main__":
    key = jax.random.PRNGKey(0)
    k_params, k_x = jax.random.split(key)
    params = init_params(k_params)
    packed = prepack(params)                 # one-time, outside the jitted forward

    # Input consistent with fc = Linear(4*8*128, .): (N, 1, 22, 38) NCHW.
    x = jax.random.normal(k_x, (2, 1, 22, 38), jnp.float32)

    logits = jax.jit(convnet_forward)(packed, x)
    jax.block_until_ready(logits)
    assert logits.shape == (2, NUM_CLASSES)
    assert bool(jnp.all(jnp.isfinite(logits)))

    # Verify against the plain-XLA reference (bf16 weights/activations => loose tol).
    ref = jax.jit(reference_forward)(params, x)
    max_err = float(jnp.max(jnp.abs(logits - ref)))
    assert max_err < 1e-1, f"mismatch vs reference: {max_err}"

    print("KERNEL_OK")
</pallas_src>

<mosaic_0001>
module attributes {stable_mosaic.version = 11 : i64} {
  func.func @_conv_stage_kernel(%arg0: i32, %arg1: memref<1x1280x128xbf16, #tpu.memory_space<vmem>>, %arg2: memref<128x128xbf16, #tpu.memory_space<vmem>>, %arg3: memref<1x128xf32, #tpu.memory_space<vmem>>, %arg4: memref<1x128xf32, #tpu.memory_space<vmem>>, %arg5: memref<9x128x128xbf16, #tpu.memory_space<vmem>>, %arg6: memref<1x128xf32, #tpu.memory_space<vmem>>, %arg7: memref<1x128xf32, #tpu.memory_space<vmem>>, %arg8: memref<1x32x128xbf16, #tpu.memory_space<vmem>>) attributes {dimension_semantics = [#tpu.dimension_semantics<parallel>], iteration_bounds = array<i64: 2>, scalar_prefetch = 0 : i64, scratch_operands = 0 : i64, tpu.core_type = #tpu.core_type<tc>, window_params = [{transform_indices = @transform_0, window_bounds = array<i64: 1, 1280, 128>}, {pipeline_mode = #tpu.pipeline_mode<synchronous>, transform_indices = @transform_1, window_bounds = array<i64: 128, 128>}, {pipeline_mode = #tpu.pipeline_mode<synchronous>, transform_indices = @transform_2, window_bounds = array<i64: 1, 128>}, {pipeline_mode = #tpu.pipeline_mode<synchronous>, transform_indices = @transform_3, window_bounds = array<i64: 1, 128>}, {pipeline_mode = #tpu.pipeline_mode<synchronous>, transform_indices = @transform_4, window_bounds = array<i64: 9, 128, 128>}, {pipeline_mode = #tpu.pipeline_mode<synchronous>, transform_indices = @transform_5, window_bounds = array<i64: 1, 128>}, {pipeline_mode = #tpu.pipeline_mode<synchronous>, transform_indices = @transform_6, window_bounds = array<i64: 1, 128>}, {transform_indices = @transform_7, window_bounds = array<i64: 1, 32, 128>}]} {
    %c0 = arith.constant 0 : index
    %c0_0 = arith.constant 0 : index
    %c0_1 = arith.constant 0 : index
    %0 = vector.load %arg1[%c0, %c0_0, %c0_1] : memref<1x1280x128xbf16, #tpu.memory_space<vmem>>, vector<1x1280x128xbf16>
    %1 = vector.shape_cast %0 : vector<1x1280x128xbf16> to vector<1280x128xbf16>
    %c0_2 = arith.constant 0 : index
    %c0_3 = arith.constant 0 : index
    %2 = vector.load %arg2[%c0_2, %c0_3] : memref<128x128xbf16, #tpu.memory_space<vmem>>, vector<128x128xbf16>
    %cst = arith.constant dense<0.000000e+00> : vector<1280x128xf32>
    %3 = tpu.matmul %1, %2, %cst {dimension_numbers = #tpu.dot_dimension_numbers<[1], [0], [0], [1], [0, 0, 1, 1], [], []>} : vector<1280x128xbf16>, vector<128x128xbf16>, vector<1280x128xf32> -> vector<1280x128xf32>
    %c0_4 = arith.constant 0 : index
    %c0_5 = arith.constant 0 : index
    %4 = vector.load %arg3[%c0_4, %c0_5] : memref<1x128xf32, #tpu.memory_space<vmem>>, vector<1x128xf32>
    %5 = vector.broadcast %4 : vector<1x128xf32> to vector<1280x128xf32>
    %6 = arith.mulf %3, %5 : vector<1280x128xf32>
    %c0_6 = arith.constant 0 : index
    %c0_7 = arith.constant 0 : index
    %7 = vector.load %arg4[%c0_6, %c0_7] : memref<1x128xf32, #tpu.memory_space<vmem>>, vector<1x128xf32>
    %8 = vector.broadcast %7 : vector<1x128xf32> to vector<1280x128xf32>
    %9 = arith.addf %6, %8 : vector<1280x128xf32>
    %cst_8 = arith.constant 0.000000e+00 : f32
    %10 = vector.broadcast %cst_8 : f32 to vector<1280x128xf32>
    %11 = arith.maximumf %9, %10 : vector<1280x128xf32>
    %12 = vector.extract_strided_slice %11 {offsets = [0, 0], sizes = [320, 128], strides = [1, 1]} : vector<1280x128xf32> to vector<320x128xf32>
    %13 = vector.extract_strided_slice %11 {offsets = [320, 0], sizes = [320, 128], strides = [1, 1]} : vector<1280x128xf32> to vector<320x128xf32>
    %14 = arith.maximumf %12, %13 : vector<320x128xf32>
    %15 = vector.extract_strided_slice %11 {offsets = [640, 0], sizes = [320, 128], strides = [1, 1]} : vector<1280x128xf32> to vector<320x128xf32>
    %16 = vector.extract_strided_slice %11 {offsets = [960, 0], sizes = [320, 128], strides = [1, 1]} : vector<1280x128xf32> to vector<320x128xf32>
    %17 = arith.maximumf %15, %16 : vector<320x128xf32>
    %18 = arith.maximumf %14, %17 : vector<320x128xf32>
    %cst_9 = arith.constant 0.000000e+00 : f32
    %19 = vector.broadcast %cst_9 : f32 to vector<64x128xf32>
    %20 = vector.extract_strided_slice %18 {offsets = [0, 0], sizes = [128, 128], strides = [1, 1]} : vector<320x128xf32> to vector<128x128xf32>
    %21 = vector.shape_cast %20 : vector<128x128xf32> to vector<8x16x128xf32>
    %22 = vector.extract_strided_slice %21 {offsets = [0, 0, 0], sizes = [8, 8, 128], strides = [1, 1, 1]} : vector<8x16x128xf32> to vector<8x8x128xf32>
    %23 = vector.shape_cast %22 : vector<8x8x128xf32> to vector<64x128xf32>
    %24 = arith.truncf %23 : vector<64x128xf32> to vector<64x128xbf16>
    %c0_10 = arith.constant 0 : index
    %c0_11 = arith.constant 0 : index
    %c0_12 = arith.constant 0 : index
    %25 = vector.load %arg5[%c0_10, %c0_11, %c0_12] : memref<9x128x128xbf16, #tpu.memory_space<vmem>>, vector<1x128x128xbf16>
    %26 = vector.shape_cast %25 : vector<1x128x128xbf16> to vector<128x128xbf16>
    %cst_13 = arith.constant dense<0.000000e+00> : vector<64x128xf32>
    %27 = tpu.matmul %24, %26, %cst_13 {dimension_numbers = #tpu.dot_dimension_numbers<[1], [0], [0], [1], [0, 0, 1, 1], [], []>} : vector<64x128xbf16>, vector<128x128xbf16>, vector<64x128xf32> -> vector<64x128xf32>
    %28 = arith.addf %19, %27 : vector<64x128xf32>
    %29 = vector.extract_strided_slice %18 {offsets = [160, 0], sizes = [128, 128], strides = [1, 1]} : vector<320x128xf32> to vector<128x128xf32>
    %30 = vector.shape_cast %29 : vector<128x128xf32> to vector<8x16x128xf32>
    %31 = vector.extract_strided_slice %30 {offsets = [0, 0, 0], sizes = [8, 8, 128], strides = [1, 1, 1]} : vector<8x16x128xf32> to vector<8x8x128xf32>
    %32 = vector.shape_cast %31 : vector<8x8x128xf32> to vector<64x128xf32>
    %33 = arith.truncf %32 : vector<64x128xf32> to vector<64x128xbf16>
    %c1 = arith.constant 1 : index
    %c0_14 = arith.constant 0 : index
    %c0_15 = arith.constant 0 : index
    %34 = vector.load %arg5[%c1, %c0_14, %c0_15] : memref<9x128x128xbf16, #tpu.memory_space<vmem>>, vector<1x128x128xbf16>
    %35 = vector.shape_cast %34 : vector<1x128x128xbf16> to vector<128x128xbf16>
    %cst_16 = arith.constant dense<0.000000e+00> : vector<64x128xf32>
    %36 = tpu.matmul %33, %35, %cst_16 {dimension_numbers = #tpu.dot_dimension_numbers<[1], [0], [0], [1], [0, 0, 1, 1], [], []>} : vector<64x128xbf16>, vector<128x128xbf16>, vector<64x128xf32> -> vector<64x128xf32>
    %37 = arith.addf %28, %36 : vector<64x128xf32>
    %38 = vector.extract_strided_slice %18 {offsets = [0, 0], sizes = [128, 128], strides = [1, 1]} : vector<320x128xf32> to vector<128x128xf32>
    %39 = vector.shape_cast %38 : vector<128x128xf32> to vector<8x16x128xf32>
    %40 = vector.extract_strided_slice %39 {offsets = [0, 1, 0], sizes = [8, 8, 128], strides = [1, 1, 1]} : vector<8x16x128xf32> to vector<8x8x128xf32>
    %41 = vector.shape_cast %40 : vector<8x8x128xf32> to vector<64x128xf32>
    %42 = arith.truncf %41 : vector<64x128xf32> to vector<64x128xbf16>
    %c2 = arith.constant 2 : index
    %c0_17 = arith.constant 0 : index
    %c0_18 = arith.constant 0 : index
    %43 = vector.load %arg5[%c2, %c0_17, %c0_18] : memref<9x128x128xbf16, #tpu.memory_space<vmem>>, vector<1x128x128xbf16>
    %44 = vector.shape_cast %43 : vector<1x128x128xbf16> to vector<128x128xbf16>
    %cst_19 = arith.constant dense<0.000000e+00> : vector<64x128xf32>
    %45 = tpu.matmul %42, %44, %cst_19 {dimension_numbers = #tpu.dot_dimension_numbers<[1], [0], [0], [1], [0, 0, 1, 1], [], []>} : vector<64x128xbf16>, vector<128x128xbf16>, vector<64x128xf32> -> vector<64x128xf32>
    %46 = arith.addf %37, %45 : vector<64x128xf32>
    %47 = vector.extract_strided_slice %18 {offsets = [16, 0], sizes = [128, 128], strides = [1, 1]} : vector<320x128xf32> to vector<128x128xf32>
    %48 = vector.shape_cast %47 : vector<128x128xf32> to vector<8x16x128xf32>
    %49 = vector.extract_strided_slice %48 {offsets = [0, 0, 0], sizes = [8, 8, 128], strides = [1, 1, 1]} : vector<8x16x128xf32> to vector<8x8x128xf32>
    %50 = vector.shape_cast %49 : vector<8x8x128xf32> to vector<64x128xf32>
    %51 = arith.truncf %50 : vector<64x128xf32> to vector<64x128xbf16>
    %c3 = arith.constant 3 : index
    %c0_20 = arith.constant 0 : index
    %c0_21 = arith.constant 0 : index
    %52 = vector.load %arg5[%c3, %c0_20, %c0_21] : memref<9x128x128xbf16, #tpu.memory_space<vmem>>, vector<1x128x128xbf16>
    %53 = vector.shape_cast %52 : vector<1x128x128xbf16> to vector<128x128xbf16>
    %cst_22 = arith.constant dense<0.000000e+00> : vector<64x128xf32>
    %54 = tpu.matmul %51, %53, %cst_22 {dimension_numbers = #tpu.dot_dimension_numbers<[1], [0], [0], [1], [0, 0, 1, 1], [], []>} : vector<64x128xbf16>, vector<128x128xbf16>, vector<64x128xf32> -> vector<64x128xf32>
    %55 = arith.addf %46, %54 : vector<64x128xf32>
    %56 = vector.extract_strided_slice %18 {offsets = [176, 0], sizes = [128, 128], strides = [1, 1]} : vector<320x128xf32> to vector<128x128xf32>
    %57 = vector.shape_cast %56 : vector<128x128xf32> to vector<8x16x128xf32>
    %58 = vector.extract_strided_slice %57 {offsets = [0, 0, 0], sizes = [8, 8, 128], strides = [1, 1, 1]} : vector<8x16x128xf32> to vector<8x8x128xf32>
    %59 = vector.shape_cast %58 : vector<8x8x128xf32> to vector<64x128xf32>
    %60 = arith.truncf %59 : vector<64x128xf32> to vector<64x128xbf16>
    %c4 = arith.constant 4 : index
    %c0_23 = arith.constant 0 : index
    %c0_24 = arith.constant 0 : index
    %61 = vector.load %arg5[%c4, %c0_23, %c0_24] : memref<9x128x128xbf16, #tpu.memory_space<vmem>>, vector<1x128x128xbf16>
    %62 = vector.shape_cast %61 : vector<1x128x128xbf16> to vector<128x128xbf16>
    %cst_25 = arith.constant dense<0.000000e+00> : vector<64x128xf32>
    %63 = tpu.matmul %60, %62, %cst_25 {dimension_numbers = #tpu.dot_dimension_numbers<[1], [0], [0], [1], [0, 0, 1, 1], [], []>} : vector<64x128xbf16>, vector<128x128xbf16>, vector<64x128xf32> -> vector<64x128xf32>
    %64 = arith.addf %55, %63 : vector<64x128xf32>
    %65 = vector.extract_strided_slice %18 {offsets = [16, 0], sizes = [128, 128], strides = [1, 1]} : vector<320x128xf32> to vector<128x128xf32>
    %66 = vector.shape_cast %65 : vector<128x128xf32> to vector<8x16x128xf32>
    %67 = vector.extract_strided_slice %66 {offsets = [0, 1, 0], sizes = [8, 8, 128], strides = [1, 1, 1]} : vector<8x16x128xf32> to vector<8x8x128xf32>
    %68 = vector.shape_cast %67 : vector<8x8x128xf32> to vector<64x128xf32>
    %69 = arith.truncf %68 : vector<64x128xf32> to vector<64x128xbf16>
    %c5 = arith.constant 5 : index
    %c0_26 = arith.constant 0 : index
    %c0_27 = arith.constant 0 : index
    %70 = vector.load %arg5[%c5, %c0_26, %c0_27] : memref<9x128x128xbf16, #tpu.memory_space<vmem>>, vector<1x128x128xbf16>
    %71 = vector.shape_cast %70 : vector<1x128x128xbf16> to vector<128x128xbf16>
    %cst_28 = arith.constant dense<0.000000e+00> : vector<64x128xf32>
    %72 = tpu.matmul %69, %71, %cst_28 {dimension_numbers = #tpu.dot_dimension_numbers<[1], [0], [0], [1], [0, 0, 1, 1], [], []>} : vector<64x128xbf16>, vector<128x128xbf16>, vector<64x128xf32> -> vector<64x128xf32>
    %73 = arith.addf %64, %72 : vector<64x128xf32>
    %74 = vector.extract_strided_slice %18 {offsets = [32, 0], sizes = [128, 128], strides = [1, 1]} : vector<320x128xf32> to vector<128x128xf32>
    %75 = vector.shape_cast %74 : vector<128x128xf32> to vector<8x16x128xf32>
    %76 = vector.extract_strided_slice %75 {offsets = [0, 0, 0], sizes = [8, 8, 128], strides = [1, 1, 1]} : vector<8x16x128xf32> to vector<8x8x128xf32>
    %77 = vector.shape_cast %76 : vector<8x8x128xf32> to vector<64x128xf32>
    %78 = arith.truncf %77 : vector<64x128xf32> to vector<64x128xbf16>
    %c6 = arith.constant 6 : index
    %c0_29 = arith.constant 0 : index
    %c0_30 = arith.constant 0 : index
    %79 = vector.load %arg5[%c6, %c0_29, %c0_30] : memref<9x128x128xbf16, #tpu.memory_space<vmem>>, vector<1x128x128xbf16>
    %80 = vector.shape_cast %79 : vector<1x128x128xbf16> to vector<128x128xbf16>
    %cst_31 = arith.constant dense<0.000000e+00> : vector<64x128xf32>
    %81 = tpu.matmul %78, %80, %cst_31 {dimension_numbers = #tpu.dot_dimension_numbers<[1], [0], [0], [1], [0, 0, 1, 1], [], []>} : vector<64x128xbf16>, vector<128x128xbf16>, vector<64x128xf32> -> vector<64x128xf32>
    %82 = arith.addf %73, %81 : vector<64x128xf32>
    %83 = vector.extract_strided_slice %18 {offsets = [192, 0], sizes = [128, 128], strides = [1, 1]} : vector<320x128xf32> to vector<128x128xf32>
    %84 = vector.shape_cast %83 : vector<128x128xf32> to vector<8x16x128xf32>
    %85 = vector.extract_strided_slice %84 {offsets = [0, 0, 0], sizes = [8, 8, 128], strides = [1, 1, 1]} : vector<8x16x128xf32> to vector<8x8x128xf32>
    %86 = vector.shape_cast %85 : vector<8x8x128xf32> to vector<64x128xf32>
    %87 = arith.truncf %86 : vector<64x128xf32> to vector<64x128xbf16>
    %c7 = arith.constant 7 : index
    %c0_32 = arith.constant 0 : index
    %c0_33 = arith.constant 0 : index
    %88 = vector.load %arg5[%c7, %c0_32, %c0_33] : memref<9x128x128xbf16, #tpu.memory_space<vmem>>, vector<1x128x128xbf16>
    %89 = vector.shape_cast %88 : vector<1x128x128xbf16> to vector<128x128xbf16>
    %cst_34 = arith.constant dense<0.000000e+00> : vector<64x128xf32>
    %90 = tpu.matmul %87, %89, %cst_34 {dimension_numbers = #tpu.dot_dimension_numbers<[1], [0], [0], [1], [0, 0, 1, 1], [], []>} : vector<64x128xbf16>, vector<128x128xbf16>, vector<64x128xf32> -> vector<64x128xf32>
    %91 = arith.addf %82, %90 : vector<64x128xf32>
    %92 = vector.extract_strided_slice %18 {offsets = [32, 0], sizes = [128, 128], strides = [1, 1]} : vector<320x128xf32> to vector<128x128xf32>
    %93 = vector.shape_cast %92 : vector<128x128xf32> to vector<8x16x128xf32>
    %94 = vector.extract_strided_slice %93 {offsets = [0, 1, 0], sizes = [8, 8, 128], strides = [1, 1, 1]} : vector<8x16x128xf32> to vector<8x8x128xf32>
    %95 = vector.shape_cast %94 : vector<8x8x128xf32> to vector<64x128xf32>
    %96 = arith.truncf %95 : vector<64x128xf32> to vector<64x128xbf16>
    %c8 = arith.constant 8 : index
    %c0_35 = arith.constant 0 : index
    %c0_36 = arith.constant 0 : index
    %97 = vector.load %arg5[%c8, %c0_35, %c0_36] : memref<9x128x128xbf16, #tpu.memory_space<vmem>>, vector<1x128x128xbf16>
    %98 = vector.shape_cast %97 : vector<1x128x128xbf16> to vector<128x128xbf16>
    %cst_37 = arith.constant dense<0.000000e+00> : vector<64x128xf32>
    %99 = tpu.matmul %96, %98, %cst_37 {dimension_numbers = #tpu.dot_dimension_numbers<[1], [0], [0], [1], [0, 0, 1, 1], [], []>} : vector<64x128xbf16>, vector<128x128xbf16>, vector<64x128xf32> -> vector<64x128xf32>
    %100 = arith.addf %91, %99 : vector<64x128xf32>
    %cst_38 = arith.constant 0.000000e+00 : f32
    %101 = vector.broadcast %cst_38 : f32 to vector<64x128xf32>
    %102 = vector.extract_strided_slice %18 {offsets = [160, 0], sizes = [128, 128], strides = [1, 1]} : vector<320x128xf32> to vector<128x128xf32>
    %103 = vector.shape_cast %102 : vector<128x128xf32> to vector<8x16x128xf32>
    %104 = vector.extract_strided_slice %103 {offsets = [0, 0, 0], sizes = [8, 8, 128], strides = [1, 1, 1]} : vector<8x16x128xf32> to vector<8x8x128xf32>
    %105 = vector.shape_cast %104 : vector<8x8x128xf32> to vector<64x128xf32>
    %106 = arith.truncf %105 : vector<64x128xf32> to vector<64x128xbf16>
    %c0_39 = arith.constant 0 : index
    %c0_40 = arith.constant 0 : index
    %c0_41 = arith.constant 0 : index
    %107 = vector.load %arg5[%c0_39, %c0_40, %c0_41] : memref<9x128x128xbf16, #tpu.memory_space<vmem>>, vector<1x128x128xbf16>
    %108 = vector.shape_cast %107 : vector<1x128x128xbf16> to vector<128x128xbf16>
    %cst_42 = arith.constant dense<0.000000e+00> : vector<64x128xf32>
    %109 = tpu.matmul %106, %108, %cst_42 {dimension_numbers = #tpu.dot_dimension_numbers<[1], [0], [0], [1], [0, 0, 1, 1], [], []>} : vector<64x128xbf16>, vector<128x128xbf16>, vector<64x128xf32> -> vector<64x128xf32>
    %110 = arith.addf %101, %109 : vector<64x128xf32>
    %111 = vector.extract_strided_slice %18 {offsets = [0, 0], sizes = [128, 128], strides = [1, 1]} : vector<320x128xf32> to vector<128x128xf32>
    %112 = vector.shape_cast %111 : vector<128x128xf32> to vector<8x16x128xf32>
    %113 = vector.extract_strided_slice %112 {offsets = [0, 1, 0], sizes = [8, 8, 128], strides = [1, 1, 1]} : vector<8x16x128xf32> to vector<8x8x128xf32>
    %114 = vector.shape_cast %113 : vector<8x8x128xf32> to vector<64x128xf32>
    %115 = arith.truncf %114 : vector<64x128xf32> to vector<64x128xbf16>
    %c1_43 = arith.constant 1 : index
    %c0_44 = arith.constant 0 : index
    %c0_45 = arith.constant 0 : index
    %116 = vector.load %arg5[%c1_43, %c0_44, %c0_45] : memref<9x128x128xbf16, #tpu.memory_space<vmem>>, vector<1x128x128xbf16>
    %117 = vector.shape_cast %116 : vector<1x128x128xbf16> to vector<128x128xbf16>
    %cst_46 = arith.constant dense<0.000000e+00> : vector<64x128xf32>
    %118 = tpu.matmul %115, %117, %cst_46 {dimension_numbers = #tpu.dot_dimension_numbers<[1], [0], [0], [1], [0, 0, 1, 1], [], []>} : vector<64x128xbf16>, vector<128x128xbf16>, vector<64x128xf32> -> vector<64x128xf32>
    %119 = arith.addf %110, %118 : vector<64x128xf32>
    %120 = vector.extract_strided_slice %18 {offsets = [160, 0], sizes = [128, 128], strides = [1, 1]} : vector<320x128xf32> to vector<128x128xf32>
    %121 = vector.shape_cast %120 : vector<128x128xf32> to vector<8x16x128xf32>
    %122 = vector.extract_strided_slice %121 {offsets = [0, 1, 0], sizes = [8, 8, 128], strides = [1, 1, 1]} : vector<8x16x128xf32> to vector<8x8x128xf32>
    %123 = vector.shape_cast %122 : vector<8x8x128xf32> to vector<64x128xf32>
    %124 = arith.truncf %123 : vector<64x128xf32> to vector<64x128xbf16>
    %c2_47 = arith.constant 2 : index
    %c0_48 = arith.constant 0 : index
    %c0_49 = arith.constant 0 : index
    %125 = vector.load %arg5[%c2_47, %c0_48, %c0_49] : memref<9x128x128xbf16, #tpu.memory_space<vmem>>, vector<1x128x128xbf16>
    %126 = vector.shape_cast %125 : vector<1x128x128xbf16> to vector<128x128xbf16>
    %cst_50 = arith.constant dense<0.000000e+00> : vector<64x128xf32>
    %127 = tpu.matmul %124, %126, %cst_50 {dimension_numbers = #tpu.dot_dimension_numbers<[1], [0], [0], [1], [0, 0, 1, 1], [], []>} : vector<64x128xbf16>, vector<128x128xbf16>, vector<64x128xf32> -> vector<64x128xf32>
    %128 = arith.addf %119, %127 : vector<64x128xf32>
    %129 = vector.extract_strided_slice %18 {offsets = [176, 0], sizes = [128, 128], strides = [1, 1]} : vector<320x128xf32> to vector<128x128xf32>
    %130 = vector.shape_cast %129 : vector<128x128xf32> to vector<8x16x128xf32>
    %131 = vector.extract_strided_slice %130 {offsets = [0, 0, 0], sizes = [8, 8, 128], strides = [1, 1, 1]} : vector<8x16x128xf32> to vector<8x8x128xf32>
    %132 = vector.shape_cast %131 : vector<8x8x128xf32> to vector<64x128xf32>
    %133 = arith.truncf %132 : vector<64x128xf32> to vector<64x128xbf16>
    %c3_51 = arith.constant 3 : index
    %c0_52 = arith.constant 0 : index
    %c0_53 = arith.constant 0 : index
    %134 = vector.load %arg5[%c3_51, %c0_52, %c0_53] : memref<9x128x128xbf16, #tpu.memory_space<vmem>>, vector<1x128x128xbf16>
    %135 = vector.shape_cast %134 : vector<1x128x128xbf16> to vector<128x128xbf16>
    %cst_54 = arith.constant dense<0.000000e+00> : vector<64x128xf32>
    %136 = tpu.matmul %133, %135, %cst_54 {dimension_numbers = #tpu.dot_dimension_numbers<[1], [0], [0], [1], [0, 0, 1, 1], [], []>} : vector<64x128xbf16>, vector<128x128xbf16>, vector<64x128xf32> -> vector<64x128xf32>
    %137 = arith.addf %128, %136 : vector<64x128xf32>
    %138 = vector.extract_strided_slice %18 {offsets = [16, 0], sizes = [128, 128], strides = [1, 1]} : vector<320x128xf32> to vector<128x128xf32>
    %139 = vector.shape_cast %138 : vector<128x128xf32> to vector<8x16x128xf32>
    %140 = vector.extract_strided_slice %139 {offsets = [0, 1, 0], sizes = [8, 8, 128], strides = [1, 1, 1]} : vector<8x16x128xf32> to vector<8x8x128xf32>
    %141 = vector.shape_cast %140 : vector<8x8x128xf32> to vector<64x128xf32>
    %142 = arith.truncf %141 : vector<64x128xf32> to vector<64x128xbf16>
    %c4_55 = arith.constant 4 : index
    %c0_56 = arith.constant 0 : index
    %c0_57 = arith.constant 0 : index
    %143 = vector.load %arg5[%c4_55, %c0_56, %c0_57] : memref<9x128x128xbf16, #tpu.memory_space<vmem>>, vector<1x128x128xbf16>
    %144 = vector.shape_cast %143 : vector<1x128x128xbf16> to vector<128x128xbf16>
    %cst_58 = arith.constant dense<0.000000e+00> : vector<64x128xf32>
    %145 = tpu.matmul %142, %144, %cst_58 {dimension_numbers = #tpu.dot_dimension_numbers<[1], [0], [0], [1], [0, 0, 1, 1], [], []>} : vector<64x128xbf16>, vector<128x128xbf16>, vector<64x128xf32> -> vector<64x128xf32>
    %146 = arith.addf %137, %145 : vector<64x128xf32>
    %147 = vector.extract_strided_slice %18 {offsets = [176, 0], sizes = [128, 128], strides = [1, 1]} : vector<320x128xf32> to vector<128x128xf32>
    %148 = vector.shape_cast %147 : vector<128x128xf32> to vector<8x16x128xf32>
    %149 = vector.extract_strided_slice %148 {offsets = [0, 1, 0], sizes = [8, 8, 128], strides = [1, 1, 1]} : vector<8x16x128xf32> to vector<8x8x128xf32>
    %150 = vector.shape_cast %149 : vector<8x8x128xf32> to vector<64x128xf32>
    %151 = arith.truncf %150 : vector<64x128xf32> to vector<64x128xbf16>
    %c5_59 = arith.constant 5 : index
    %c0_60 = arith.constant 0 : index
    %c0_61 = arith.constant 0 : index
    %152 = vector.load %arg5[%c5_59, %c0_60, %c0_61] : memref<9x128x128xbf16, #tpu.memory_space<vmem>>, vector<1x128x128xbf16>
    %153 = vector.shape_cast %152 : vector<1x128x128xbf16> to vector<128x128xbf16>
    %cst_62 = arith.constant dense<0.000000e+00> : vector<64x128xf32>
    %154 = tpu.matmul %151, %153, %cst_62 {dimension_numbers = #tpu.dot_dimension_numbers<[1], [0], [0], [1], [0, 0, 1, 1], [], []>} : vector<64x128xbf16>, vector<128x128xbf16>, vector<64x128xf32> -> vector<64x128xf32>
    %155 = arith.addf %146, %154 : vector<64x128xf32>
    %156 = vector.extract_strided_slice %18 {offsets = [192, 0], sizes = [128, 128], strides = [1, 1]} : vector<320x128xf32> to vector<128x128xf32>
    %157 = vector.shape_cast %156 : vector<128x128xf32> to vector<8x16x128xf32>
    %158 = vector.extract_strided_slice %157 {offsets = [0, 0, 0], sizes = [8, 8, 128], strides = [1, 1, 1]} : vector<8x16x128xf32> to vector<8x8x128xf32>
    %159 = vector.shape_cast %158 : vector<8x8x128xf32> to vector<64x128xf32>
    %160 = arith.truncf %159 : vector<64x128xf32> to vector<64x128xbf16>
    %c6_63 = arith.constant 6 : index
    %c0_64 = arith.constant 0 : index
    %c0_65 = arith.constant 0 : index
    %161 = vector.load %arg5[%c6_63, %c0_64, %c0_65] : memref<9x128x128xbf16, #tpu.memory_space<vmem>>, vector<1x128x128xbf16>
    %162 = vector.shape_cast %161 : vector<1x128x128xbf16> to vector<128x128xbf16>
    %cst_66 = arith.constant dense<0.000000e+00> : vector<64x128xf32>
    %163 = tpu.matmul %160, %162, %cst_66 {dimension_numbers = #tpu.dot_dimension_numbers<[1], [0], [0], [1], [0, 0, 1, 1], [], []>} : vector<64x128xbf16>, vector<128x128xbf16>, vector<64x128xf32> -> vector<64x128xf32>
    %164 = arith.addf %155, %163 : vector<64x128xf32>
    %165 = vector.extract_strided_slice %18 {offsets = [32, 0], sizes = [128, 128], strides = [1, 1]} : vector<320x128xf32> to vector<128x128xf32>
    %166 = vector.shape_cast %165 : vector<128x128xf32> to vector<8x16x128xf32>
    %167 = vector.extract_strided_slice %166 {offsets = [0, 1, 0], sizes = [8, 8, 128], strides = [1, 1, 1]} : vector<8x16x128xf32> to vector<8x8x128xf32>
    %168 = vector.shape_cast %167 : vector<8x8x128xf32> to vector<64x128xf32>
    %169 = arith.truncf %168 : vector<64x128xf32> to vector<64x128xbf16>
    %c7_67 = arith.constant 7 : index
    %c0_68 = arith.constant 0 : index
    %c0_69 = arith.constant 0 : index
    %170 = vector.load %arg5[%c7_67, %c0_68, %c0_69] : memref<9x128x128xbf16, #tpu.memory_space<vmem>>, vector<1x128x128xbf16>
    %171 = vector.shape_cast %170 : vector<1x128x128xbf16> to vector<128x128xbf16>
    %cst_70 = arith.constant dense<0.000000e+00> : vector<64x128xf32>
    %172 = tpu.matmul %169, %171, %cst_70 {dimension_numbers = #tpu.dot_dimension_numbers<[1], [0], [0], [1], [0, 0, 1, 1], [], []>} : vector<64x128xbf16>, vector<128x128xbf16>, vector<64x128xf32> -> vector<64x128xf32>
    %173 = arith.addf %164, %172 : vector<64x128xf32>
    %174 = vector.extract_strided_slice %18 {offsets = [192, 0], sizes = [128, 128], strides = [1, 1]} : vector<320x128xf32> to vector<128x128xf32>
    %175 = vector.shape_cast %174 : vector<128x128xf32> to vector<8x16x128xf32>
    %176 = vector.extract_strided_slice %175 {offsets = [0, 1, 0], sizes = [8, 8, 128], strides = [1, 1, 1]} : vector<8x16x128xf32> to vector<8x8x128xf32>
    %177 = vector.shape_cast %176 : vector<8x8x128xf32> to vector<64x128xf32>
    %178 = arith.truncf %177 : vector<64x128xf32> to vector<64x128xbf16>
    %c8_71 = arith.constant 8 : index
    %c0_72 = arith.constant 0 : index
    %c0_73 = arith.constant 0 : index
    %179 = vector.load %arg5[%c8_71, %c0_72, %c0_73] : memref<9x128x128xbf16, #tpu.memory_space<vmem>>, vector<1x128x128xbf16>
    %180 = vector.shape_cast %179 : vector<1x128x128xbf16> to vector<128x128xbf16>
    %cst_74 = arith.constant dense<0.000000e+00> : vector<64x128xf32>
    %181 = tpu.matmul %178, %180, %cst_74 {dimension_numbers = #tpu.dot_dimension_numbers<[1], [0], [0], [1], [0, 0, 1, 1], [], []>} : vector<64x128xbf16>, vector<128x128xbf16>, vector<64x128xf32> -> vector<64x128xf32>
    %182 = arith.addf %173, %181 : vector<64x128xf32>
    %183 = tpu.concatenate %100, %182 in 0 : vector<64x128xf32>, vector<64x128xf32> -> vector<128x128xf32>
    %c0_75 = arith.constant 0 : index
    %c0_76 = arith.constant 0 : index
    %184 = vector.load %arg6[%c0_75, %c0_76] : memref<1x128xf32, #tpu.memory_space<vmem>>, vector<1x128xf32>
    %185 = vector.broadcast %184 : vector<1x128xf32> to vector<128x128xf32>
    %186 = arith.mulf %183, %185 : vector<128x128xf32>
    %c0_77 = arith.constant 0 : index
    %c0_78 = arith.constant 0 : index
    %187 = vector.load %arg7[%c0_77, %c0_78] : memref<1x128xf32, #tpu.memory_space<vmem>>, vector<1x128xf32>
    %188 = vector.broadcast %187 : vector<1x128xf32> to vector<128x128xf32>
    %189 = arith.addf %186, %188 : vector<128x128xf32>
    %cst_79 = arith.constant 0.000000e+00 : f32
    %190 = vector.broadcast %cst_79 : f32 to vector<128x128xf32>
    %191 = arith.maximumf %189, %190 : vector<128x128xf32>
    %192 = vector.extract_strided_slice %191 {offsets = [0, 0], sizes = [64, 128], strides = [1, 1]} : vector<128x128xf32> to vector<64x128xf32>
    %193 = vector.extract_strided_slice %191 {offsets = [64, 0], sizes = [64, 128], strides = [1, 1]} : vector<128x128xf32> to vector<64x128xf32>
    %194 = arith.maximumf %192, %193 : vector<64x128xf32>
    %195 = vector.shape_cast %194 : vector<64x128xf32> to vector<4x2x8x128xf32>
    %196 = vector.extract_strided_slice %195 {offsets = [0, 0, 0, 0], sizes = [4, 1, 8, 128], strides = [1, 1, 1, 1]} : vector<4x2x8x128xf32> to vector<4x1x8x128xf32>
    %197 = vector.shape_cast %196 : vector<4x1x8x128xf32> to vector<4x8x128xf32>
    %198 = vector.extract_strided_slice %195 {offsets = [0, 1, 0, 0], sizes = [4, 1, 8, 128], strides = [1, 1, 1, 1]} : vector<4x2x8x128xf32> to vector<4x1x8x128xf32>
    %199 = vector.shape_cast %198 : vector<4x1x8x128xf32> to vector<4x8x128xf32>
    %200 = arith.maximumf %197, %199 : vector<4x8x128xf32>
    %201 = vector.shape_cast %200 : vector<4x8x128xf32> to vector<32x128xf32>
    %202 = arith.truncf %201 : vector<32x128xf32> to vector<32x128xbf16>
    %c0_80 = arith.constant 0 : index
    %c0_81 = arith.constant 0 : index
    %c0_82 = arith.constant 0 : index
    %203 = vector.load %arg8[%c0_80, %c0_81, %c0_82] : memref<1x32x128xbf16, #tpu.memory_space<vmem>>, vector<1x32x128xbf16>
    %204 = vector.shape_cast %203 : vector<1x32x128xbf16> to vector<32x128xbf16>
    %205 = vector.shape_cast %202 : vector<32x128xbf16> to vector<1x32x128xbf16>
    tpu.vector_store %arg8[%c0_80, %c0_81, %c0_82], %205 {strides = array<i32>} : memref<1x32x128xbf16, #tpu.memory_space<vmem>>, vector<1x32x128xbf16>,
    return
  }
  func.func @transform_0(%arg0: i32) -> (i32, i32, i32) {
    %c0_i32 = arith.constant 0 : i32
    %c0_i32_0 = arith.constant 0 : i32
    %c0_i32_1 = arith.constant 0 : i32
    return %arg0, %c0_i32, %c0_i32_0 : i32, i32, i32
  }
  func.func @transform_1(%arg0: i32) -> (i32, i32) {
    %c0_i32 = arith.constant 0 : i32
    %c0_i32_0 = arith.constant 0 : i32
    %c0_i32_1 = arith.constant 0 : i32
    return %c0_i32, %c0_i32_0 : i32, i32
  }
  func.func @transform_2(%arg0: i32) -> (i32, i32) {
    %c0_i32 = arith.constant 0 : i32
    %c0_i32_0 = arith.constant 0 : i32
    %c0_i32_1 = arith.constant 0 : i32
    return %c0_i32, %c0_i32_0 : i32, i32
  }
  func.func @transform_3(%arg0: i32) -> (i32, i32) {
    %c0_i32 = arith.constant 0 : i32
    %c0_i32_0 = arith.constant 0 : i32
    %c0_i32_1 = arith.constant 0 : i32
    return %c0_i32, %c0_i32_0 : i32, i32
  }
  func.func @transform_4(%arg0: i32) -> (i32, i32, i32) {
    %c0_i32 = arith.constant 0 : i32
    %c0_i32_0 = arith.constant 0 : i32
    %c0_i32_1 = arith.constant 0 : i32
    %c0_i32_2 = arith.constant 0 : i32
    return %c0_i32, %c0_i32_0, %c0_i32_1 : i32, i32, i32
  }
  func.func @transform_5(%arg0: i32) -> (i32, i32) {
    %c0_i32 = arith.constant 0 : i32
    %c0_i32_0 = arith.constant 0 : i32
    %c0_i32_1 = arith.constant 0 : i32
    return %c0_i32, %c0_i32_0 : i32, i32
  }
  func.func @transform_6(%arg0: i32) -> (i32, i32) {
    %c0_i32 = arith.constant 0 : i32
    %c0_i32_0 = arith.constant 0 : i32
    %c0_i32_1 = arith.constant 0 : i32
    return %c0_i32, %c0_i32_0 : i32, i32
  }
  func.func @transform_7(%arg0: i32) -> (i32, i32, i32) {
    %c0_i32 = arith.constant 0 : i32
    %c0_i32_0 = arith.constant 0 : i32
    %c0_i32_1 = arith.constant 0 : i32
    return %arg0, %c0_i32, %c0_i32_0 : i32, i32, i32
  }
}

module attributes {stable_mosaic.version = 11 : i64} {
  func.func @_fc_stage_kernel(%arg0: memref<2x4096xbf16, #tpu.memory_space<vmem>>, %arg1: memref<4096x128xbf16, #tpu.memory_space<vmem>>, %arg2: memref<1x128xf32, #tpu.memory_space<vmem>>, %arg3: memref<128x128xbf16, #tpu.memory_space<vmem>>, %arg4: memref<1x128xf32, #tpu.memory_space<vmem>>, %arg5: memref<2x128xf32, #tpu.memory_space<vmem>>) attributes {dimension_semantics = [], scalar_prefetch = 0 : i64, scratch_operands = 0 : i64, tpu.core_type = #tpu.core_type<tc>} {
    %c0 = arith.constant 0 : index
    %c0_0 = arith.constant 0 : index
    %0 = vector.load %arg0[%c0, %c0_0] : memref<2x4096xbf16, #tpu.memory_space<vmem>>, vector<2x4096xbf16>
    %c0_1 = arith.constant 0 : index
    %c0_2 = arith.constant 0 : index
    %1 = vector.load %arg1[%c0_1, %c0_2] : memref<4096x128xbf16, #tpu.memory_space<vmem>>, vector<4096x128xbf16>
    %cst = arith.constant dense<0.000000e+00> : vector<2x128xf32>
    %2 = tpu.matmul %0, %1, %cst {dimension_numbers = #tpu.dot_dimension_numbers<[1], [0], [0], [1], [0, 0, 1, 1], [], []>} : vector<2x4096xbf16>, vector<4096x128xbf16>, vector<2x128xf32> -> vector<2x128xf32>
    %c0_3 = arith.constant 0 : index
    %c0_4 = arith.constant 0 : index
    %3 = vector.load %arg2[%c0_3, %c0_4] : memref<1x128xf32, #tpu.memory_space<vmem>>, vector<1x128xf32>
    %4 = vector.broadcast %3 : vector<1x128xf32> to vector<2x128xf32>
    %5 = arith.addf %2, %4 : vector<2x128xf32>
    %6 = arith.truncf %5 : vector<2x128xf32> to vector<2x128xbf16>
    %c0_5 = arith.constant 0 : index
    %c0_6 = arith.constant 0 : index
    %7 = vector.load %arg3[%c0_5, %c0_6] : memref<128x128xbf16, #tpu.memory_space<vmem>>, vector<128x128xbf16>
    %cst_7 = arith.constant dense<0.000000e+00> : vector<2x128xf32>
    %8 = tpu.matmul %6, %7, %cst_7 {dimension_numbers = #tpu.dot_dimension_numbers<[1], [0], [0], [1], [0, 0, 1, 1], [], []>} : vector<2x128xbf16>, vector<128x128xbf16>, vector<2x128xf32> -> vector<2x128xf32>
    %c0_8 = arith.constant 0 : index
    %c0_9 = arith.constant 0 : index
    %9 = vector.load %arg4[%c0_8, %c0_9] : memref<1x128xf32, #tpu.memory_space<vmem>>, vector<1x128xf32>
    %10 = vector.broadcast %9 : vector<1x128xf32> to vector<2x128xf32>
    %11 = arith.addf %8, %10 : vector<2x128xf32>
    %c0_10 = arith.constant 0 : index
    %c0_11 = arith.constant 0 : index
    %12 = vector.load %arg5[%c0_10, %c0_11] : memref<2x128xf32, #tpu.memory_space<vmem>>, vector<2x128xf32>
    tpu.vector_store %arg5[%c0_10, %c0_11], %11 {strides = array<i32>} : memref<2x128xf32, #tpu.memory_space<vmem>>, vector<2x128xf32>,
    return
  }
}

</mosaic_0001>

<bundles_post_ra>
// kernel: convnet_forward.2
= control target key start
LH: loop header
LB: loop body
LE: loop exit
PB: predicated region body
PF: predicated region fallthrough
CT: control target
= control target key end

     0   :  { %s6042_s24 = smov 0   ;;  %s7891_s0 = inlined_call_operand.vmem [shape: bf16[2,1280,128], index: 0, kind: input, shape index: {}]   ;;  %s7892_s1 = inlined_call_operand.vmem [shape: bf16[128,128], index: 1, kind: input, shape index: {}]   ;;  %s7893_s2 = inlined_call_operand.vmem [shape: f32[1,128], index: 2, kind: input, shape index: {}]   ;;  %s7894_s3 = inlined_call_operand.vmem [shape: f32[1,128], index: 3, kind: input, shape index: {}]   ;;  %s7895_s4 = inlined_call_operand.vmem [shape: bf16[9,128,128], index: 4, kind: input, shape index: {}]   ;;  %s7896_s5 = inlined_call_operand.vmem [shape: f32[1,128], index: 5, kind: input, shape index: {}]   ;;  %s7897_s6 = inlined_call_operand.vmem [shape: f32[1,128], index: 6, kind: input, shape index: {}]   ;;  %s7898_s7 = inlined_call_operand.vmem [shape: bf16[2,32,128], index: 7, kind: output, shape index: {}]  }
   0x1 LB: > { %s4443_s25 = sadd.s32 4294967295, %s6000_s24   ;;  %p4447_p0 = scmp.ge.s32.totalorder %s6000_s24, 1  ;;  %s6000_s24 = sphi %s6042_s24, %s17_s24  }
   0x2   : > { %p237_p1 = scmp.lt.s32.totalorder %s6000_s24, 3 }
   0x4   : > { %p238_p2 = pnand %p4447_p0, %p237_p1 }
   0x6   : > { %241 = sbr.rel (%p238_p2) target bundleno = 1225 (0x4c9), region = 48 }
   0xd   : > { %v5814_v0 = vld [vmem:[%s7892_s1] sm:$0xff]   ;;  %p269_p3 = scmp.lt.s32.totalorder %s4443_s25, 1  ;;  %v5815_v1 = vld [vmem:[%s7892_s1 + $0x8] sm:$0xff]   ;;  %v5816_v2 = vld [vmem:[%s7892_s1 + $0x10] sm:$0xff]   ;;  %vm2554_vm0 = vcmask 1046528  }
   0xe   : > { %5069 = vmatprep.subr.bf16.mxu0 %v5814_v0  ;;  %v5817_v3 = vld [vmem:[%s7892_s1 + $0x18] sm:$0xff]   ;;  %v5818_v5 = vld [vmem:[%s7892_s1 + $0x20] sm:$0xff]   ;;  %v5819_v6 = vld [vmem:[%s7892_s1 + $0x28] sm:$0xff]  }
   0xf   : > { %s8124_s25 = smov (!%p269_p3, %s4443_s25), 1  ;;  %5070 = vmatpush3.bf16.msra.mxu0 %v5814_v0  ;;  %v5820_v7 = vld [vmem:[%s7892_s1 + $0x30] sm:$0xff]   ;;  %v5821_v8 = vld [vmem:[%s7892_s1 + $0x38] sm:$0xff]  }
  0x10   : > { %5071 = vmatprep.subr.bf16.mxu0 %v5815_v1  ;;  %s5805_s9 = smul.u32 640, %s8124_s25  ;;  %s4749_s28 = sshll.u32 %s8124_s25, 4 }
  0x11   : > { %s278_s8 = scalar_lea.vmem %s7898_s7, %s4749_s28 }
  0x12   : > { %s6065_s12 = scalar_lea.vmem %s7891_s0, %s5805_s9 }
  0x13   : > { %5072 = vmatpush3.bf16.msra.mxu0 %v5815_v1  ;;  %v5822_v4 = vld [vmem:[%s6065_s12] sm:$0xff]   ;;  %v5823_v9 = vld [vmem:[%s6065_s12 + $0x8] sm:$0xff]   ;;  %v5824_v10 = vld [vmem:[%s6065_s12 + $0x10] sm:$0xff]  }
  0x14   : > { %5073 = vmatprep.subr.bf16.mxu0 %v5816_v2  ;;  %5085 = vmatprep.mubr.bf16.mxu0 %v5822_v4  ;;  %v5825_v11 = vld [vmem:[%s6065_s12 + $0x18] sm:$0xff]   ;;  %v5826_v12 = vld [vmem:[%s6065_s12 + $0x20] sm:$0xff]   ;;  %v5827_v13 = vld [vmem:[%s6065_s12 + $0x28] sm:$0xff]  }
  0x15   : > { %v5828_v14 = vld [vmem:[%s6065_s12 + $0x30] sm:$0xff]   ;;  %v5829_v15 = vld [vmem:[%s6065_s12 + $0x38] sm:$0xff]   ;;  %v5830_v16 = vld [vmem:[%s6065_s12 + $0x40] sm:$0xff]  }
  0x16   : > { %v5831_v17 = vld [vmem:[%s6065_s12 + $0x48] sm:$0xff]   ;;  %v5832_v18 = vld [vmem:[%s6065_s12 + $0x50] sm:$0xff]   ;;  %v5833_v19 = vld [vmem:[%s6065_s12 + $0x58] sm:$0xff]  }
  0x17   : > { %5074 = vmatpush3.bf16.msra.mxu0 %v5816_v2  ;;  %v5834_v20 = vld [vmem:[%s6065_s12 + $0x60] sm:$0xff]   ;;  %v5835_v21 = vld [vmem:[%s6065_s12 + $0x68] sm:$0xff]   ;;  %v5836_v22 = vld [vmem:[%s6065_s12 + $0x70] sm:$0xff]  }
  0x18   : > { %5075 = vmatprep.subr.bf16.mxu0 %v5817_v3  ;;  %v5837_v23 = vld [vmem:[%s6065_s12 + $0x78] sm:$0xff]   ;;  %v5838_v24 = vld [vmem:[%s6065_s12 + $0x80] sm:$0xff]   ;;  %v5839_v25 = vld [vmem:[%s6065_s12 + $0x88] sm:$0xff]  }
  0x19   : > { %v5840_v26 = vld [vmem:[%s6065_s12 + $0x90] sm:$0xff]   ;;  %v5841_v27 = vld [vmem:[%s6065_s12 + $0x98] sm:$0xff]   ;;  %v5842_v28 = vld [vmem:[%s6065_s12 + $0xa0] sm:$0xff]  }
  0x1a   : > { %v5843_v29 = vld [vmem:[%s6065_s12 + $0xa8] sm:$0xff]   ;;  %v5844_v30 = vld [vmem:[%s6065_s12 + $0xb0] sm:$0xff]   ;;  %v5845_v31 = vld [vmem:[%s6065_s12 + $0xb8] sm:$0xff]  }
  0x1b   : > { %5076 = vmatpush3.bf16.msra.mxu0 %v5817_v3  ;;  %v5846_v32 = vld [vmem:[%s6065_s12 + $0xc0] sm:$0xff]   ;;  %v5847_v33 = vld [vmem:[%s6065_s12 + $0xc8] sm:$0xff]   ;;  %v5848_v34 = vld [vmem:[%s6065_s12 + $0xd0] sm:$0xff]  }
  0x1c   : > { %5077 = vmatprep.subr.bf16.mxu0 %v5818_v5  ;;  %v5849_v35 = vld [vmem:[%s6065_s12 + $0xd8] sm:$0xff]   ;;  %v5850_v36 = vld [vmem:[%s6065_s12 + $0xe0] sm:$0xff]   ;;  %v5851_v37 = vld [vmem:[%s6065_s12 + $0xe8] sm:$0xff]  }
  0x1d   : > { %v5852_v38 = vld [vmem:[%s6065_s12 + $0xf0] sm:$0xff]   ;;  %v5853_v39 = vld [vmem:[%s6065_s12 + $0xf8] sm:$0xff]   ;;  %v5854_v40 = vld [vmem:[%s6065_s12 + $0x100] sm:$0xff]  }
  0x1e   : > { %v5855_v41 = vld [vmem:[%s6065_s12 + $0x108] sm:$0xff]   ;;  %v5856_v42 = vld [vmem:[%s6065_s12 + $0x110] sm:$0xff]   ;;  %v5857_v43 = vld [vmem:[%s6065_s12 + $0x118] sm:$0xff]  }
  0x1f   : > { %5078 = vmatpush3.bf16.msra.mxu0 %v5818_v5  ;;  %v5858_v44 = vld [vmem:[%s6065_s12 + $0x120] sm:$0xff]   ;;  %v5859_v45 = vld [vmem:[%s6065_s12 + $0x128] sm:$0xff]   ;;  %v5860_v46 = vld [vmem:[%s6065_s12 + $0x130] sm:$0xff]  }
  0x20   : > { %5079 = vmatprep.subr.bf16.mxu0 %v5819_v6  ;;  %v5861_v47 = vld [vmem:[%s6065_s12 + $0x138] sm:$0xff]   ;;  %v5862_v48 = vld [vmem:[%s6065_s12 + $0x140] sm:$0xff]   ;;  %v5863_v49 = vld [vmem:[%s6065_s12 + $0x148] sm:$0xff]  }
  0x21   : > { %v5864_v50 = vld [vmem:[%s6065_s12 + $0x150] sm:$0xff]   ;;  %v5865_v51 = vld [vmem:[%s6065_s12 + $0x158] sm:$0xff]   ;;  %v5866_v52 = vld [vmem:[%s6065_s12 + $0x160] sm:$0xff]  }
  0x22   : > { %v5867_v53 = vld [vmem:[%s6065_s12 + $0x168] sm:$0xff]   ;;  %v5868_v54 = vld [vmem:[%s6065_s12 + $0x170] sm:$0xff]   ;;  %v5869_v55 = vld [vmem:[%s6065_s12 + $0x178] sm:$0xff]  }
  0x23   : > { %5080 = vmatpush3.bf16.msra.mxu0 %v5819_v6  ;;  %v5870_v56 = vld [vmem:[%s6065_s12 + $0x180] sm:$0xff]   ;;  %v5871_v57 = vld [vmem:[%s6065_s12 + $0x188] sm:$0xff]   ;;  %v5872_v58 = vld [vmem:[%s6065_s12 + $0x190] sm:$0xff]  }
  0x24   : > { %5081 = vmatprep.subr.bf16.mxu0 %v5820_v7  ;;  %v5873_v59 = vld [vmem:[%s6065_s12 + $0x198] sm:$0xff]   ;;  %v5874_v60 = vld [vmem:[%s6065_s12 + $0x1a0] sm:$0xff]   ;;  %v5875_v61 = vld [vmem:[%s6065_s12 + $0x1a8] sm:$0xff]  }
  0x25   : > { %v5876_v62 = vld [vmem:[%s6065_s12 + $0x1b0] sm:$0xff]   ;;  %v5877_v1 = vld [vmem:[%s6065_s12 + $0x1b8] sm:$0xff]   ;;  %v5878_v3 = vld [vmem:[%s6065_s12 + $0x1c0] sm:$0xff]  }
  0x27   : > { %5082 = vmatpush3.bf16.msra.mxu0 %v5820_v7  ;;  %v5879_v7 = vld [vmem:[%s6065_s12 + $0x1c8] sm:$0xff]  }
  0x28   : > { %5083 = vmatprep.subr.bf16.mxu0 %v5821_v8 }
  0x2b   : > { %5084 = vmatpush3.bf16.msra.mxu0 %v5821_v8 }
  0x2e   : > { %5086 = vmatmul.mubr.bf16.vlgmr.msra.gmra.mrb[0].mxu0 %v5823_v9  ;;  %v5880_v9 = vld [vmem:[%s6065_s12 + $0x1d0] sm:$0xff]  }
  0x2f   : > { %5089 = vmatprep.mubr.bf16.mxu0 %v5824_v10 }
  0x36   : > { %5090 = vmatmul.mubr.bf16.gmra.mrb[4].mxu0 %v5825_v11 }
  0x37   : > { %5093 = vmatprep.mubr.bf16.mxu0 %v5826_v12 }
  0x3e   : > { %5094 = vmatmul.mubr.bf16.gmra.mrb[8].mxu0 %v5827_v13  ;;  %v5881_v13 = vld [vmem:[%s6065_s12 + $0x1d8] sm:$0xff]  }
  0x3f   : > { %5097 = vmatprep.mubr.bf16.mxu0 %v5828_v14 }
  0x46   : > { %5098 = vmatmul.mubr.bf16.gmra.mrb[12].mxu0 %v5829_v15  ;;  %v5882_v15 = vld [vmem:[%s6065_s12 + $0x1e0] sm:$0xff]  }
  0x47   : > { %5101 = vmatprep.mubr.bf16.mxu0 %v5830_v16 }
  0x4e   : > { %5102 = vmatmul.mubr.bf16.gmra.mrb[16].mxu0 %v5831_v17 }
  0x4f   : > { %5105 = vmatprep.mubr.bf16.mxu0 %v5832_v18 }
  0x56   : > { %5106 = vmatmul.mubr.bf16.gmra.mrb[20].mxu0 %v5833_v19  ;;  %v5883_v19 = vld [vmem:[%s6065_s12 + $0x1e8] sm:$0xff]  }
  0x57   : > { %5109 = vmatprep.mubr.bf16.mxu0 %v5834_v20 }
  0x5e   : > { %5110 = vmatmul.mubr.bf16.gmra.mrb[24].mxu0 %v5835_v21  ;;  %v5884_v21 = vld [vmem:[%s6065_s12 + $0x1f0] sm:$0xff]  }
  0x5f   : > { %5113 = vmatprep.mubr.bf16.mxu0 %v5836_v22 }
  0x66   : > { %5114 = vmatmul.mubr.bf16.gmra.mrb[28].mxu0 %v5837_v23 }
  0x67   : > { %5117 = vmatprep.mubr.bf16.mxu0 %v5838_v24 }
  0x6e   : > { %5118 = vmatmul.mubr.bf16.gmra.mrb[32].mxu0 %v5839_v25  ;;  %v5885_v25 = vld [vmem:[%s6065_s12 + $0x1f8] sm:$0xff]  }
  0x6f   : > { %5121 = vmatprep.mubr.bf16.mxu0 %v5840_v26 }
  0x76   : > { %5122 = vmatmul.mubr.bf16.gmra.mrb[36].mxu0 %v5841_v27  ;;  %v5886_v27 = vld [vmem:[%s6065_s12 + $0x200] sm:$0xff]  }
  0x77   : > { %5125 = vmatprep.mubr.bf16.mxu0 %v5842_v28 }
  0x7e   : > { %5126 = vmatmul.mubr.bf16.gmra.mrb[40].mxu0 %v5843_v29 }
  0x7f   : > { %5129 = vmatprep.mubr.bf16.mxu0 %v5844_v30 }
  0x86   : > { %5130 = vmatmul.mubr.bf16.gmra.mrb[44].mxu0 %v5845_v31  ;;  %v5887_v31 = vld [vmem:[%s6065_s12 + $0x208] sm:$0xff]  }
  0x87   : > { %5133 = vmatprep.mubr.bf16.mxu0 %v5846_v32 }
  0x8e   : > { %5134 = vmatmul.mubr.bf16.gmra.mrb[48].mxu0 %v5847_v33  ;;  %v5888_v33 = vld [vmem:[%s6065_s12 + $0x210] sm:$0xff]  }
  0x8f   : > { %5137 = vmatprep.mubr.bf16.mxu0 %v5848_v34 }
  0x96   : > { %5138 = vmatmul.mubr.bf16.gmra.mrb[52].mxu0 %v5849_v35 }
  0x97   : > { %5141 = vmatprep.mubr.bf16.mxu0 %v5850_v36 }
  0x9e   : > { %5142 = vmatmul.mubr.bf16.gmra.mrb[56].mxu0 %v5851_v37  ;;  %v5889_v37 = vld [vmem:[%s6065_s12 + $0x218] sm:$0xff]  }
  0x9f   : > { %5145 = vmatprep.mubr.bf16.mxu0 %v5852_v38 }
  0xa6   : > { %5146 = vmatmul.mubr.bf16.gmra.mrb[60].mxu0 %v5853_v39  ;;  %v5890_v39 = vld [vmem:[%s6065_s12 + $0x220] sm:$0xff]  }
  0xa7   : > { %5149 = vmatprep.mubr.bf16.mxu0 %v5854_v40 }
  0xae   : > { %5150 = vmatmul.mubr.bf16.gmra.mrb[64].mxu0 %v5855_v41 }
  0xaf   : > { %5153 = vmatprep.mubr.bf16.mxu0 %v5856_v42 }
  0xb6   : > { %5154 = vmatmul.mubr.bf16.gmra.mrb[68].mxu0 %v5857_v43  ;;  %v5891_v43 = vld [vmem:[%s6065_s12 + $0x228] sm:$0xff]  }
  0xb7   : > { %5157 = vmatprep.mubr.bf16.mxu0 %v5858_v44 }
  0xbe   : > { %5158 = vmatmul.mubr.bf16.gmra.mrb[72].mxu0 %v5859_v45  ;;  %v5892_v45 = vld [vmem:[%s6065_s12 + $0x230] sm:$0xff]  }
  0xbf   : > { %5161 = vmatprep.mubr.bf16.mxu0 %v5860_v46 }
  0xc6   : > { %5162 = vmatmul.mubr.bf16.gmra.mrb[76].mxu0 %v5861_v47 }
  0xc7   : > { %5165 = vmatprep.mubr.bf16.mxu0 %v5862_v48 }
  0xce   : > { %5166 = vmatmul.mubr.bf16.gmra.mrb[80].mxu0 %v5863_v49  ;;  %v5893_v49 = vld [vmem:[%s6065_s12 + $0x238] sm:$0xff]  }
  0xcf   : > { %5169 = vmatprep.mubr.bf16.mxu0 %v5864_v50 }
  0xd6   : > { %5170 = vmatmul.mubr.bf16.gmra.mrb[84].mxu0 %v5865_v51  ;;  %v5894_v51 = vld [vmem:[%s6065_s12 + $0x240] sm:$0xff]  }
  0xd7   : > { %5173 = vmatprep.mubr.bf16.mxu0 %v5866_v52 }
  0xde   : > { %5174 = vmatmul.mubr.bf16.gmra.mrb[88].mxu0 %v5867_v53 }
  0xdf   : > { %5177 = vmatprep.mubr.bf16.mxu0 %v5868_v54 }
  0xe6   : > { %5178 = vmatmul.mubr.bf16.gmra.mrb[92].mxu0 %v5869_v55  ;;  %v5895_v55 = vld [vmem:[%s6065_s12 + $0x248] sm:$0xff]  }
  0xe7   : > { %5181 = vmatprep.mubr.bf16.mxu0 %v5870_v56  ;;  %v6235_v56 = vld [vmem:[%s7893_s2] ss:$0 sm:$0xff] }
  0xee   : > { %5182 = vmatmul.mubr.bf16.gmra.mrb[96].mxu0 %v5871_v57 }
  0xef   : > { %5185 = vmatprep.mubr.bf16.mxu0 %v5872_v58  ;;  %v5896_v58 = vld [vmem:[%s6065_s12 + $0x250] sm:$0xff]  }
  0xf6   : > { %5186 = vmatmul.mubr.bf16.gmra.mrb[100].mxu0 %v5873_v59 }
  0xf7   : > { %5189 = vmatprep.mubr.bf16.mxu0 %v5874_v60 }
  0xfe   : > { %5190 = vmatmul.mubr.bf16.gmra.mrb[104].mxu0 %v5875_v61  ;;  %v6247_v61 = vld [vmem:[%s7894_s3] ss:$0 sm:$0xff] }
  0xff   : > { %5193 = vmatprep.mubr.bf16.mxu0 %v5876_v62 }
 0x101   : > { %v6137_v63 = vpop.f32.mrb[0].mxu0 }
 0x102   : > { %v6139_v0 = vpop.f32.mrb[1].mxu0  ;;  %v1666_v60 = vmul.f32 %v6137_v63, %v6235_v56 }
 0x103   : > { %v6142_v2 = vpop.f32.mrb[2].mxu0  ;;  %v1664_v62 = vmul.f32 %v6235_v56, %v6139_v0  ;;  %v5898_v0 = vld [vmem:[%s6065_s12 + $0x260] sm:$0xff]  }
 0x104   : > { %v6145_v4 = vpop.f32.mrb[3].mxu0 }
 0x106   : > { %5194 = vmatmul.mubr.bf16.gmra.mrb[108].mxu0 %v5877_v1  ;;  %v1667_v1 = vmul.f32 %v6142_v2, %v6235_v56 }
 0x107   : > { %5197 = vmatprep.mubr.bf16.mxu0 %v5878_v3  ;;  %v1665_v3 = vmul.f32 %v6235_v56, %v6145_v4 }
 0x109   : > { %v6147_v5 = vpop.f32.mrb[4].mxu0 }
 0x10a   : > { %v6149_v6 = vpop.f32.mrb[5].mxu0 }
 0x10b   : > { %v6152_v8 = vpop.f32.mrb[6].mxu0 }
 0x10c   : > { %v6155_v10 = vpop.f32.mrb[7].mxu0 }
 0x10e   : > { %5198 = vmatmul.mubr.bf16.gmra.mrb[112].mxu0 %v5879_v7 }
 0x10f   : > { %5201 = vmatprep.mubr.bf16.mxu0 %v5880_v9  ;;  %v1833_v9 = vadd.f32 %v6247_v61, %v1666_v60 }
 0x111   : > { %v6157_v11 = vpop.f32.mrb[8].mxu0 }
 0x112   : > { %v6159_v12 = vpop.f32.mrb[9].mxu0 }
 0x113   : > { %v6162_v14 = vpop.f32.mrb[10].mxu0 }
 0x114   : > { %v6165_v16 = vpop.f32.mrb[11].mxu0 }
 0x116   : > { %5202 = vmatmul.mubr.bf16.gmra.mrb[116].mxu0 %v5881_v13 }
 0x117   : > { %5205 = vmatprep.mubr.bf16.mxu0 %v5882_v15  ;;  %v5897_v15 = vld [vmem:[%s6065_s12 + $0x258] sm:$0xff]  }
 0x119   : > { %v6167_v17 = vpop.f32.mrb[12].mxu0 }
 0x11a   : > { %v6169_v18 = vpop.f32.mrb[13].mxu0 }
 0x11b   : > { %v6172_v20 = vpop.f32.mrb[14].mxu0 }
 0x11c   : > { %v6175_v22 = vpop.f32.mrb[15].mxu0 }
 0x11e   : > { %5206 = vmatmul.mubr.bf16.gmra.mrb[120].mxu0 %v5883_v19  ;;  %v1831_v19 = vadd.f32 %v6247_v61, %v1664_v62 }
 0x11f   : > { %5209 = vmatprep.mubr.bf16.mxu0 %v5884_v21 }
 0x121   : > { %v6177_v23 = vpop.f32.mrb[16].mxu0 }
 0x122   : > { %v6179_v24 = vpop.f32.mrb[17].mxu0 }
 0x123   : > { %v6182_v26 = vpop.f32.mrb[18].mxu0 }
 0x124   : > { %v6185_v28 = vpop.f32.mrb[19].mxu0 }
 0x126   : > { %5210 = vmatmul.mubr.bf16.gmra.mrb[124].mxu0 %v5885_v25 }
 0x127   : > { %5213 = vmatprep.mubr.bf16.mxu0 %v5886_v27  ;;  %v1834_v27 = vadd.f32 %v6247_v61, %v1667_v1 }
 0x129   : > { %v6187_v29 = vpop.f32.mrb[20].mxu0  ;;  %v1994_v1 = vmax.f32 %v1834_v27, 0.0 }
 0x12a   : > { %v6189_v30 = vpop.f32.mrb[21].mxu0 }
 0x12b   : > { %v6192_v32 = vpop.f32.mrb[22].mxu0 }
 0x12c   : > { %v6195_v34 = vpop.f32.mrb[23].mxu0 }
 0x12e   : > { %5214 = vmatmul.mubr.bf16.gmra.mrb[128].mxu0 %v5887_v31 }
 0x12f   : > { %5217 = vmatprep.mubr.bf16.mxu0 %v5888_v33  ;;  %v1832_v33 = vadd.f32 %v6247_v61, %v1665_v3  ;;  %v1671_v3 = vmul.f32 %v6152_v8, %v6235_v56  ;;  %v5899_v8 = vld [vmem:[%s6065_s12 + $0x268] sm:$0xff]  }
 0x131   : > { %v6197_v35 = vpop.f32.mrb[24].mxu0 }
 0x132   : > { %v6199_v36 = vpop.f32.mrb[25].mxu0 }
 0x133   : > { %v6202_v38 = vpop.f32.mrb[26].mxu0 }
 0x134   : > { %v6205_v40 = vpop.f32.mrb[27].mxu0 }
 0x136   : > { %5218 = vmatmul.mubr.bf16.gmra.mrb[132].mxu0 %v5889_v37 }
 0x137   : > { %5221 = vmatprep.mubr.bf16.mxu0 %v5890_v39 }
 0x139   : > { %v6207_v41 = vpop.f32.mrb[28].mxu0 }
 0x13a   : > { %v6209_v42 = vpop.f32.mrb[29].mxu0 }
 0x13b   : > { %v6212_v44 = vpop.f32.mrb[30].mxu0 }
 0x13c   : > { %v6215_v46 = vpop.f32.mrb[31].mxu0 }
 0x13e   : > { %5222 = vmatmul.mubr.bf16.gmra.mrb[136].mxu0 %v5891_v43  ;;  %v1993_v43 = vmax.f32 %v1833_v9, 0.0  ;;  %v1992_v9 = vmax.f32 %v1832_v33, 0.0  ;;  %v1838_v33 = vadd.f32 %v6247_v61, %v1671_v3  ;;  %v1672_v3 = vmul.f32 %v6235_v56, %v6159_v12 }
 0x13f   : > { %5225 = vmatprep.mubr.bf16.mxu0 %v5892_v45  ;;  %v1670_v45 = vmul.f32 %v6147_v5, %v6235_v56 }
 0x141   : > { %v6217_v47 = vpop.f32.mrb[32].mxu0 }
 0x142   : > { %v6219_v48 = vpop.f32.mrb[33].mxu0 }
 0x143   : > { %v6222_v50 = vpop.f32.mrb[34].mxu0 }
 0x144   : > { %v6225_v52 = vpop.f32.mrb[35].mxu0 }
 0x146   : > { %5226 = vmatmul.mubr.bf16.gmra.mrb[140].mxu0 %v5893_v49 }
 0x147   : > { %5229 = vmatprep.mubr.bf16.mxu0 %v5894_v51 }
 0x149   : > { %v6227_v53 = vpop.f32.mrb[36].mxu0 }
 0x14a   : > { %v6229_v54 = vpop.f32.mrb[37].mxu0 }
 0x14b   : > { %v6237_v57 = vpop.f32.mrb[38].mxu0 }
 0x14c   : > { %v6240_v59 = vpop.f32.mrb[39].mxu0 }
 0x14e   : > { %5230 = vmatmul.mubr.bf16.gmra.mrb[144].mxu0 %v5895_v55  ;;  %v1991_v55 = vmax.f32 %v1831_v19, 0.0  ;;  %v1837_v19 = vadd.f32 %v6247_v61, %v1670_v45 }
 0x14f   : > { %5233 = vmatprep.mubr.bf16.mxu0 %v5896_v58  ;;  %v1668_v58 = vmul.f32 %v6235_v56, %v6149_v6 }
 0x151   : > { %v5127_v7 = vpop.f32.mrb[40].mxu0  ;;  %v1835_v27 = vadd.f32 %v6247_v61, %v1668_v58  ;;  %v1674_v58 = vmul.f32 %v6157_v11, %v6235_v56 }
 0x152   : > { %v1706_v63 = vmul.f32 %v5127_v7, %v6235_v56  ;;  %v1178_v13 = vpop.f32.mrb[41].mxu0 }
 0x153   : > { %v1704_v21 = vmul.f32 %v6235_v56, %v1178_v13  ;;  %v5128_v25 = vpop.f32.mrb[42].mxu0 }
 0x154   : > { %v1873_v2 = vadd.f32 %v6247_v61, %v1706_v63  ;;  %v1707_v31 = vmul.f32 %v5128_v25, %v6235_v56  ;;  %v1181_v4 = vpop.f32.mrb[43].mxu0  ;;  %v1669_v63 = vmul.f32 %v6235_v56, %v6155_v10  ;;  %v5900_v10 = vld [vmem:[%s6065_s12 + $0x270] sm:$0xff]  }
 0x155   : > { %v1871_v37 = vadd.f32 %v6247_v61, %v1704_v21  ;;  %v1705_v39 = vmul.f32 %v6235_v56, %v1181_v4 }
 0x156   : > { %v2033_v49 = vmax.f32 %v1873_v2, 0.0  ;;  %v1874_v51 = vadd.f32 %v6247_v61, %v1707_v31  ;;  %5234 = vmatmul.mubr.bf16.gmra.mrb[148].mxu0 %v5897_v15  ;;  %v1836_v45 = vadd.f32 %v6247_v61, %v1669_v63  ;;  %v1998_v63 = vmax.f32 %v1838_v33, 0.0  ;;  %v5901_v33 = vld [vmem:[%s6065_s12 + $0x278] sm:$0xff]  }
 0x157   : > { %v2031_v60 = vmax.f32 %v1871_v37, 0.0  ;;  %v1872_v62 = vadd.f32 %v6247_v61, %v1705_v39  ;;  %5237 = vmatprep.mubr.bf16.mxu0 %v5898_v0 }
 0x158   : > { %v6275_v7 = vmax.f32 %v1993_v43, %v2033_v49  ;;  %v2034_v5 = vmax.f32 %v1874_v51, 0.0 }
 0x159   : > { %v6279_v13 = vmax.f32 %v1991_v55, %v2031_v60  ;;  %v2032_v6 = vmax.f32 %v1872_v62, 0.0  ;;  %v5131_v15 = vpop.f32.mrb[44].mxu0  ;;  %v1997_v55 = vmax.f32 %v1837_v19, 0.0  ;;  %v1996_v19 = vmax.f32 %v1836_v45, 0.0 }
 0x15a   : > { %v6282_v21 = vmax.f32 %v1994_v1, %v2034_v5  ;;  %v1710_v25 = vmul.f32 %v5131_v15, %v6235_v56  ;;  %v1194_v0 = vpop.f32.mrb[45].mxu0  ;;  %v1995_v1 = vmax.f32 %v1835_v27, 0.0  ;;  %v1841_v27 = vadd.f32 %v6247_v61, %v1674_v58 }
 0x15b   : > { %v6287_v2 = vmax.f32 %v1992_v9, %v2032_v6  ;;  %v1708_v31 = vmul.f32 %v6235_v56, %v1194_v0  ;;  %v5132_v4 = vpop.f32.mrb[46].mxu0  ;;  %v1675_v6 = vmul.f32 %v6162_v14, %v6235_v56  ;;  %v1839_v14 = vadd.f32 %v6247_v61, %v1672_v3 }
 0x15c   : > { %v1877_v37 = vadd.f32 %v6247_v61, %v1710_v25  ;;  %v1711_v39 = vmul.f32 %v5132_v4, %v6235_v56  ;;  %v1197_v43 = vpop.f32.mrb[47].mxu0  ;;  %v1673_v25 = vmul.f32 %v6235_v56, %v6165_v16 }
 0x15d   : > { %v1875_v49 = vadd.f32 %v6247_v61, %v1708_v31  ;;  %v1709_v51 = vmul.f32 %v6235_v56, %v1197_v43  ;;  %v1842_v16 = vadd.f32 %v6247_v61, %v1675_v6 }
 0x15e   : > { %v2037_v60 = vmax.f32 %v1877_v37, 0.0  ;;  %v1878_v62 = vadd.f32 %v6247_v61, %v1711_v39  ;;  %5238 = vmatmul.mubr.bf16.gmra.mrb[152].mxu0 %v5899_v8 }
 0x15f   : > { %v2035_v5 = vmax.f32 %v1875_v49, 0.0  ;;  %v1876_v9 = vadd.f32 %v6247_v61, %v1709_v51  ;;  %5241 = vmatprep.mubr.bf16.mxu0 %v5900_v10 }
 0x160   : > { %v6305_v15 = vmax.f32 %v1997_v55, %v2037_v60  ;;  %v2038_v11 = vmax.f32 %v1878_v62, 0.0  ;;  %v1840_v55 = vadd.f32 %v6247_v61, %v1673_v25  ;;  %v2001_v62 = vmax.f32 %v1841_v27, 0.0 }
 0x161   : > { %v6309_v0 = vmax.f32 %v1995_v1, %v2035_v5  ;;  %v2036_v8 = vmax.f32 %v1876_v9, 0.0  ;;  %v5135_v12 = vpop.f32.mrb[48].mxu0  ;;  %v1678_v1 = vmul.f32 %v6167_v17, %v6235_v56  ;;  %v1999_v9 = vmax.f32 %v1839_v14, 0.0 }
 0x162   : > { %v6312_v31 = vmax.f32 %v1998_v63, %v2038_v11  ;;  %v1714_v4 = vmul.f32 %v5135_v12, %v6235_v56  ;;  %v1210_v10 = vpop.f32.mrb[49].mxu0  ;;  %v1676_v63 = vmul.f32 %v6235_v56, %v6169_v18  ;;  %v1679_v25 = vmul.f32 %v6172_v20, %v6235_v56 }
 0x163   : > { %v6317_v37 = vmax.f32 %v1996_v19, %v2036_v8  ;;  %v1712_v39 = vmul.f32 %v6235_v56, %v1210_v10  ;;  %v5136_v43 = vpop.f32.mrb[50].mxu0  ;;  %v2002_v19 = vmax.f32 %v1842_v16, 0.0  ;;  %v2000_v27 = vmax.f32 %v1840_v55, 0.0 }
 0x164   : > { %v1881_v45 = vadd.f32 %v6247_v61, %v1714_v4  ;;  %v1715_v49 = vmul.f32 %v5136_v43, %v6235_v56  ;;  %v1213_v51 = vpop.f32.mrb[51].mxu0  ;;  %v1677_v17 = vmul.f32 %v6235_v56, %v6175_v22  ;;  %v1845_v18 = vadd.f32 %v6247_v61, %v1678_v1 }
 0x165   : > { %v1879_v58 = vadd.f32 %v6247_v61, %v1712_v39  ;;  %v1713_v60 = vmul.f32 %v6235_v56, %v1213_v51  ;;  %v1843_v20 = vadd.f32 %v6247_v61, %v1676_v63  ;;  %v1846_v22 = vadd.f32 %v6247_v61, %v1679_v25 }
 0x166   : > { %v2041_v3 = vmax.f32 %v1881_v45, 0.0  ;;  %v1882_v5 = vadd.f32 %v6247_v61, %v1715_v49  ;;  %5242 = vmatmul.mubr.bf16.gmra.mrb[156].mxu0 %v5901_v33 }
 0x167   : > { %v2039_v6 = vmax.f32 %v1879_v58, 0.0  ;;  %v1880_v11 = vadd.f32 %v6247_v61, %v1713_v60  ;;  %v1844_v60 = vadd.f32 %v6247_v61, %v1677_v17 }
 0x168   : > { %v6334_v8 = vmax.f32 %v2001_v62, %v2041_v3  ;;  %v2042_v12 = vmax.f32 %v1882_v5, 0.0  ;;  %v2005_v3 = vmax.f32 %v1845_v18, 0.0  ;;  %v1682_v5 = vmul.f32 %v6177_v23, %v6235_v56 }
 0x169   : > { %v6338_v4 = vmax.f32 %v1999_v9, %v2039_v6  ;;  %v2040_v10 = vmax.f32 %v1880_v11, 0.0  ;;  %v5139_v33 = vpop.f32.mrb[52].mxu0  ;;  %v2003_v6 = vmax.f32 %v1843_v20, 0.0  ;;  %v1680_v11 = vmul.f32 %v6235_v56, %v6179_v24 }
 0x16a   : > { %v6341_v14 = vmax.f32 %v2002_v19, %v2042_v12  ;;  %v1718_v39 = vmul.f32 %v5139_v33, %v6235_v56  ;;  %v1226_v43 = vpop.f32.mrb[53].mxu0  ;;  %v2006_v12 = vmax.f32 %v1846_v22, 0.0  ;;  %v2004_v33 = vmax.f32 %v1844_v60, 0.0 }
 0x16b   : > { %v6345_v16 = vmax.f32 %v2000_v27, %v2040_v10  ;;  %v1716_v45 = vmul.f32 %v6235_v56, %v1226_v43  ;;  %v5140_v49 = vpop.f32.mrb[54].mxu0  ;;  %v1683_v27 = vmul.f32 %v6182_v26, %v6235_v56  ;;  %v1681_v23 = vmul.f32 %v6235_v56, %v6185_v28 }
 0x16c   : > { %v1885_v51 = vadd.f32 %v6247_v61, %v1718_v39  ;;  %v1719_v55 = vmul.f32 %v5140_v49, %v6235_v56  ;;  %v1229_v58 = vpop.f32.mrb[55].mxu0  ;;  %v1849_v24 = vadd.f32 %v6247_v61, %v1682_v5  ;;  %v1847_v26 = vadd.f32 %v6247_v61, %v1680_v11 }
 0x16d   : > { %v1883_v62 = vadd.f32 %v6247_v61, %v1716_v45  ;;  %v1717_v1 = vmul.f32 %v6235_v56, %v1229_v58  ;;  %v1850_v28 = vadd.f32 %v6247_v61, %v1683_v27 }
 0x16e   : > { %v2045_v9 = vmax.f32 %v1885_v51, 0.0  ;;  %v1886_v63 = vadd.f32 %v6247_v61, %v1719_v55 }
 0x16f   : > { %v2043_v19 = vmax.f32 %v1883_v62, 0.0  ;;  %v1884_v25 = vadd.f32 %v6247_v61, %v1717_v1  ;;  %v1848_v1 = vadd.f32 %v6247_v61, %v1681_v23 }
 0x170   : > { %v6362_v17 = vmax.f32 %v2005_v3, %v2045_v9  ;;  %v2046_v10 = vmax.f32 %v1886_v63, 0.0  ;;  %v2009_v9 = vmax.f32 %v1849_v24, 0.0  ;;  %v1686_v63 = vmul.f32 %v6187_v29, %v6235_v56 }
 0x171   : > { %v6366_v18 = vmax.f32 %v2003_v6, %v2043_v19  ;;  %v2044_v39 = vmax.f32 %v1884_v25, 0.0  ;;  %v5143_v43 = vpop.f32.mrb[56].mxu0  ;;  %v2007_v19 = vmax.f32 %v1847_v26, 0.0  ;;  %v1684_v25 = vmul.f32 %v6235_v56, %v6189_v30 }
 0x172   : > { %v6369_v20 = vmax.f32 %v2006_v12, %v2046_v10  ;;  %v1722_v45 = vmul.f32 %v5143_v43, %v6235_v56  ;;  %v1242_v49 = vpop.f32.mrb[57].mxu0  ;;  %v2010_v10 = vmax.f32 %v1850_v28, 0.0  ;;  %v2008_v43 = vmax.f32 %v1848_v1, 0.0 }
 0x173   : > { %v6373_v22 = vmax.f32 %v2004_v33, %v2044_v39  ;;  %v1720_v51 = vmul.f32 %v6235_v56, %v1242_v49  ;;  %v5144_v55 = vpop.f32.mrb[58].mxu0  ;;  %v1687_v33 = vmul.f32 %v6192_v32, %v6235_v56  ;;  %v1685_v29 = vmul.f32 %v6235_v56, %v6195_v34 }
 0x174   : > { %v1889_v58 = vadd.f32 %v6247_v61, %v1722_v45  ;;  %v1723_v60 = vmul.f32 %v5144_v55, %v6235_v56  ;;  %v1245_v62 = vpop.f32.mrb[59].mxu0  ;;  %v1853_v30 = vadd.f32 %v6247_v61, %v1686_v63  ;;  %v1851_v32 = vadd.f32 %v6247_v61, %v1684_v25 }
 0x175   : > { %v1887_v3 = vadd.f32 %v6247_v61, %v1720_v51  ;;  %v1721_v5 = vmul.f32 %v6235_v56, %v1245_v62  ;;  %v1854_v34 = vadd.f32 %v6247_v61, %v1687_v33 }
 0x176   : > { %v2049_v6 = vmax.f32 %v1889_v58, 0.0  ;;  %v1890_v11 = vadd.f32 %v6247_v61, %v1723_v60 }
 0x177   : > { %v2047_v12 = vmax.f32 %v1887_v3, 0.0  ;;  %v1888_v27 = vadd.f32 %v6247_v61, %v1721_v5  ;;  %v1852_v5 = vadd.f32 %v6247_v61, %v1685_v29 }
 0x178   : > { %v6390_v23 = vmax.f32 %v2009_v9, %v2049_v6  ;;  %v2050_v39 = vmax.f32 %v1890_v11, 0.0  ;;  %v2013_v6 = vmax.f32 %v1853_v30, 0.0  ;;  %v1690_v11 = vmul.f32 %v6197_v35, %v6235_v56 }
 0x179   : > { %v6394_v24 = vmax.f32 %v2007_v19, %v2047_v12  ;;  %v2048_v45 = vmax.f32 %v1888_v27, 0.0  ;;  %v5147_v49 = vpop.f32.mrb[60].mxu0  ;;  %v2011_v12 = vmax.f32 %v1851_v32, 0.0  ;;  %v1688_v27 = vmul.f32 %v6235_v56, %v6199_v36 }
 0x17a   : > { %7951 = vst [vmem:[#allocation2_spill] sm:$0xff] %v6390_v23  ;;  %v6397_v26 = vmax.f32 %v2010_v10, %v2050_v39  ;;  %v1726_v51 = vmul.f32 %v5147_v49, %v6235_v56  ;;  %v1258_v55 = vpop.f32.mrb[61].mxu0  ;;  %v2014_v39 = vmax.f32 %v1854_v34, 0.0  ;;  %v2012_v49 = vmax.f32 %v1852_v5, 0.0 }
 0x17b   : > { %7952 = vst [vmem:[#allocation3_spill] sm:$0xff] %v6394_v24  ;;  %v6401_v28 = vmax.f32 %v2008_v43, %v2048_v45  ;;  %v1724_v58 = vmul.f32 %v6235_v56, %v1258_v55  ;;  %v5148_v60 = vpop.f32.mrb[62].mxu0  ;;  %v1691_v43 = vmul.f32 %v6202_v38, %v6235_v56  ;;  %v1689_v35 = vmul.f32 %v6235_v56, %v6205_v40 }
 0x17c   : > { %7953 = vst [vmem:[#allocation4_spill] sm:$0xff] %v6397_v26  ;;  %v1893_v62 = vadd.f32 %v6247_v61, %v1726_v51  ;;  %v1727_v1 = vmul.f32 %v5148_v60, %v6235_v56  ;;  %v1261_v3 = vpop.f32.mrb[63].mxu0  ;;  %v1857_v36 = vadd.f32 %v6247_v61, %v1690_v11  ;;  %v1855_v38 = vadd.f32 %v6247_v61, %v1688_v27 }
 0x17d   : > { %7954 = vst [vmem:[#allocation5_spill] sm:$0xff] %v6401_v28  ;;  %v1891_v9 = vadd.f32 %v6247_v61, %v1724_v58  ;;  %v1725_v63 = vmul.f32 %v6235_v56, %v1261_v3  ;;  %v1858_v40 = vadd.f32 %v6247_v61, %v1691_v43 }
 0x17e   : > { %v2053_v19 = vmax.f32 %v1893_v62, 0.0  ;;  %v1894_v25 = vadd.f32 %v6247_v61, %v1727_v1 }
 0x17f   : > { %v2051_v10 = vmax.f32 %v1891_v9, 0.0  ;;  %v1892_v33 = vadd.f32 %v6247_v61, %v1725_v63  ;;  %v1856_v63 = vadd.f32 %v6247_v61, %v1689_v35 }
 0x180   : > { %v6418_v29 = vmax.f32 %v2013_v6, %v2053_v19  ;;  %v2054_v45 = vmax.f32 %v1894_v25, 0.0  ;;  %v2017_v19 = vmax.f32 %v1857_v36, 0.0  ;;  %v1694_v25 = vmul.f32 %v6207_v41, %v6235_v56 }
 0x181   : > { %v6422_v30 = vmax.f32 %v2011_v12, %v2051_v10  ;;  %v2052_v51 = vmax.f32 %v1892_v33, 0.0  ;;  %v5151_v55 = vpop.f32.mrb[64].mxu0  ;;  %v2015_v10 = vmax.f32 %v1855_v38, 0.0  ;;  %v1692_v33 = vmul.f32 %v6235_v56, %v6209_v42 }
 0x182   : > { %7955 = vst [vmem:[#allocation6_spill] sm:$0xff] %v6418_v29  ;;  %v6425_v32 = vmax.f32 %v2014_v39, %v2054_v45  ;;  %v1730_v58 = vmul.f32 %v5151_v55, %v6235_v56  ;;  %v1274_v60 = vpop.f32.mrb[65].mxu0  ;;  %v2018_v45 = vmax.f32 %v1858_v40, 0.0  ;;  %v2016_v55 = vmax.f32 %v1856_v63, 0.0 }
 0x183   : > { %7956 = vst [vmem:[#allocation7_spill] sm:$0xff] %v6422_v30  ;;  %v6429_v34 = vmax.f32 %v2012_v49, %v2052_v51  ;;  %v1728_v62 = vmul.f32 %v6235_v56, %v1274_v60  ;;  %v5152_v1 = vpop.f32.mrb[66].mxu0  ;;  %v1695_v49 = vmul.f32 %v6212_v44, %v6235_v56  ;;  %v1693_v41 = vmul.f32 %v6235_v56, %v6215_v46 }
 0x184   : > { %7957 = vst [vmem:[#allocation8_spill] sm:$0xff] %v6425_v32  ;;  %v1897_v3 = vadd.f32 %v6247_v61, %v1730_v58  ;;  %v1731_v5 = vmul.f32 %v5152_v1, %v6235_v56  ;;  %v1277_v9 = vpop.f32.mrb[67].mxu0  ;;  %v1861_v42 = vadd.f32 %v6247_v61, %v1694_v25  ;;  %v1859_v44 = vadd.f32 %v6247_v61, %v1692_v33 }
 0x185   : > { %7958 = vst [vmem:[#allocation9_spill] sm:$0xff] %v6429_v34  ;;  %v1895_v6 = vadd.f32 %v6247_v61, %v1728_v62  ;;  %v1729_v11 = vmul.f32 %v6235_v56, %v1277_v9  ;;  %v1862_v46 = vadd.f32 %v6247_v61, %v1695_v49 }
 0x186   : > { %v2057_v12 = vmax.f32 %v1897_v3, 0.0  ;;  %v1898_v27 = vadd.f32 %v6247_v61, %v1731_v5 }
 0x187   : > { %v2055_v39 = vmax.f32 %v1895_v6, 0.0  ;;  %v1896_v43 = vadd.f32 %v6247_v61, %v1729_v11  ;;  %v1860_v11 = vadd.f32 %v6247_v61, %v1693_v41  ;;  %v1699_v41 = vmul.f32 %v6222_v50, %v6235_v56 }
 0x188   : > { %v6446_v35 = vmax.f32 %v2017_v19, %v2057_v12  ;;  %v2058_v51 = vmax.f32 %v1898_v27, 0.0  ;;  %v5902_v12 = vld [vmem:[%s7895_s4 + $0x40] sm:$0xff]   ;;  %v2021_v27 = vmax.f32 %v1861_v42, 0.0  ;;  %v1697_v42 = vmul.f32 %v6235_v56, %v6225_v52 }
 0x189   : > { %v6450_v36 = vmax.f32 %v2015_v10, %v2055_v39  ;;  %v2056_v58 = vmax.f32 %v1896_v43, 0.0  ;;  %v5155_v60 = vpop.f32.mrb[68].mxu0  ;;  %v1698_v10 = vmul.f32 %v6217_v47, %v6235_v56  ;;  %v2019_v43 = vmax.f32 %v1859_v44, 0.0  ;;  %5245 = vmatprep.subr.bf16.mxu0 %v5902_v12  ;;  %v5903_v44 = vld [vmem:[%s7895_s4 + $0x48] sm:$0xff]  }
 0x18a   : > { %7959 = vst [vmem:[#allocation10_spill] sm:$0xff] %v6446_v35  ;;  %v6453_v38 = vmax.f32 %v2018_v45, %v2058_v51  ;;  %v1734_v62 = vmul.f32 %v5155_v60, %v6235_v56  ;;  %v1290_v1 = vpop.f32.mrb[69].mxu0  ;;  %v1696_v45 = vmul.f32 %v6235_v56, %v6219_v48  ;;  %5246 = vmatpush3.bf16.msra.mxu0 %v5902_v12  ;;  %v2020_v47 = vmax.f32 %v1860_v11, 0.0 }
 0x18b   : > { %7960 = vst [vmem:[#allocation11_spill] sm:$0xff] %v6450_v36  ;;  %v6457_v40 = vmax.f32 %v2016_v55, %v2056_v58  ;;  %v1732_v3 = vmul.f32 %v6235_v56, %v1290_v1  ;;  %v5156_v5 = vpop.f32.mrb[70].mxu0  ;;  %v2022_v55 = vmax.f32 %v1862_v46, 0.0  ;;  %5247 = vmatprep.subr.bf16.mxu0 %v5903_v44  ;;  %v1866_v11 = vadd.f32 %v6247_v61, %v1699_v41 }
 0x18c   : > { %7961 = vst [vmem:[#allocation12_spill] sm:$0xff] %v6453_v38  ;;  %v1901_v9 = vadd.f32 %v6247_v61, %v1734_v62  ;;  %v1735_v63 = vmul.f32 %v5156_v5, %v6235_v56  ;;  %v1293_v6 = vpop.f32.mrb[71].mxu0 }
 0x18d   : > { %7962 = vst [vmem:[#allocation13_spill] sm:$0xff] %v6457_v40  ;;  %v1899_v19 = vadd.f32 %v6247_v61, %v1732_v3  ;;  %v1733_v25 = vmul.f32 %v6235_v56, %v1293_v6  ;;  %v1865_v3 = vadd.f32 %v6247_v61, %v1698_v10 }
 0x18e   : > { %v2061_v33 = vmax.f32 %v1901_v9, 0.0  ;;  %v1902_v39 = vadd.f32 %v6247_v61, %v1735_v63  ;;  %v1863_v9 = vadd.f32 %v6247_v61, %v1696_v45  ;;  %5248 = vmatpush3.bf16.msra.mxu0 %v5903_v44 }
 0x18f   : > { %v2059_v49 = vmax.f32 %v1899_v19, 0.0  ;;  %v1900_v51 = vadd.f32 %v6247_v61, %v1733_v25  ;;  %v2025_v45 = vmax.f32 %v1865_v3, 0.0 }
 0x190   : > { %v6477_v58 = vmax.f32 %v2021_v27, %v2061_v33  ;;  %v2062_v60 = vmax.f32 %v1902_v39, 0.0  ;;  %v1864_v27 = vadd.f32 %v6247_v61, %v1697_v42  ;;  %v5904_v39 = vld [vmem:[%s7895_s4 + $0x50] sm:$0xff]   ;;  %v2023_v41 = vmax.f32 %v1863_v9, 0.0 }
 0x191   : > { %v6481_v62 = vmax.f32 %v2019_v43, %v2059_v49  ;;  %v2060_v1 = vmax.f32 %v1900_v51, 0.0  ;;  %v5159_v48 = vpop.f32.mrb[72].mxu0  ;;  %v5905_v43 = vld [vmem:[%s7895_s4 + $0x100] sm:$0xff]   ;;  %v1702_v49 = vmul.f32 %v6227_v53, %v6235_v56  ;;  %5249 = vmatprep.subr.bf16.mxu0 %v5904_v39 }
 0x192   : > { %7963 = vst [vmem:[#allocation14_spill] sm:$0xff] %v6477_v58  ;;  %v6487_v5 = vmax.f32 %v2022_v55, %v2062_v60  ;;  %v1738_v50 = vmul.f32 %v5159_v48, %v6235_v56  ;;  %v1306_v46 = vpop.f32.mrb[73].mxu0  ;;  %v1700_v60 = vmul.f32 %v6235_v56, %v6229_v54  ;;  %5341 = vmatprep.subr.bf16.mxu1 %v5905_v43  ;;  %v2024_v53 = vmax.f32 %v1864_v27, 0.0 }
 0x193   : > { %7964 = vst [vmem:[#allocation15_spill] sm:$0xff] %v6481_v62  ;;  %v6491_v63 = vmax.f32 %v2020_v47, %v2060_v1  ;;  %v1736_v52 = vmul.f32 %v6235_v56, %v1306_v46  ;;  %v5160_v6 = vpop.f32.mrb[74].mxu0  ;;  %v2026_v1 = vmax.f32 %v1866_v11, 0.0  ;;  %v1703_v48 = vmul.f32 %v6237_v57, %v6235_v56  ;;  %5250 = vmatpush3.bf16.msra.mxu0 %v5904_v39  ;;  %v5907_v57 = vld [vmem:[%s7895_s4 + $0x108] sm:$0xff]  }
 0x194   : > { %7965 = vst [vmem:[#allocation16_spill] sm:$0xff] %v6487_v5  ;;  %v1905_v19 = vadd.f32 %v6247_v61, %v1738_v50  ;;  %v1739_v25 = vmul.f32 %v5160_v6, %v6235_v56  ;;  %v1309_v12 = vpop.f32.mrb[75].mxu0  ;;  %5342 = vmatpush3.bf16.msra.mxu1 %v5905_v43  ;;  %v1701_v50 = vmul.f32 %v6235_v56, %v6240_v59 }
 0x195   : > { %7966 = vst [vmem:[#allocation17_spill] sm:$0xff] %v6491_v63  ;;  %v1903_v10 = vadd.f32 %v6247_v61, %v1736_v52  ;;  %v1737_v33 = vmul.f32 %v6235_v56, %v1309_v12  ;;  %v5906_v52 = vld [vmem:[%s7895_s4 + $0x58] sm:$0xff]   ;;  %v1869_v6 = vadd.f32 %v6247_v61, %v1702_v49  ;;  %v1867_v59 = vadd.f32 %v6247_v61, %v1700_v60  ;;  %v5909_v60 = vld [vmem:[%s7895_s4 + $0x110] sm:$0xff]  }
 0x196   : > { %v2065_v51 = vmax.f32 %v1905_v19, 0.0  ;;  %v1906_v55 = vadd.f32 %v6247_v61, %v1739_v25  ;;  %5251 = vmatprep.subr.bf16.mxu0 %v5906_v52  ;;  %5343 = vmatprep.subr.bf16.mxu1 %v5907_v57  ;;  %v1868_v49 = vadd.f32 %v6247_v61, %v1701_v50 }
 0x197   : > { %v2063_v47 = vmax.f32 %v1903_v10, 0.0  ;;  %v1904_v42 = vadd.f32 %v6247_v61, %v1737_v33  ;;  %v1870_v33 = vadd.f32 %v6247_v61, %v1703_v48  ;;  %5252 = vmatpush3.bf16.msra.mxu0 %v5906_v52  ;;  %v2027_v48 = vmax.f32 %v1867_v59, 0.0  ;;  %v5911_v59 = vld [vmem:[%s7895_s4 + $0x118] sm:$0xff]  }
 0x198   : > { %v6514_v44 = vmax.f32 %v2025_v45, %v2065_v51  ;;  %v2066_v3 = vmax.f32 %v1906_v55, 0.0  ;;  %5344 = vmatpush3.bf16.msra.mxu1 %v5907_v57  ;;  %v2028_v52 = vmax.f32 %v1868_v49, 0.0  ;;  %v5913_v49 = vld [vmem:[%s7895_s4 + $0x120] sm:$0xff]  }
 0x199   : > { %v6518_v46 = vmax.f32 %v2023_v41, %v2063_v47  ;;  %v2064_v54 = vmax.f32 %v1904_v42, 0.0  ;;  %v5163_v9 = vpop.f32.mrb[76].mxu0  ;;  %v5908_v41 = vld [vmem:[%s7895_s4 + $0x60] sm:$0xff]   ;;  %v2029_v47 = vmax.f32 %v1869_v6, 0.0  ;;  %5345 = vmatprep.subr.bf16.mxu1 %v5909_v60  ;;  %v2030_v50 = vmax.f32 %v1870_v33, 0.0 }
 0x19a   : > { %7967 = vst [vmem:[#allocation18_spill] sm:$0xff] %v6514_v44  ;;  %v6527_v11 = vmax.f32 %v2026_v1, %v2066_v3  ;;  %v1742_v19 = vmul.f32 %v5163_v9, %v6235_v56  ;;  %v1322_v25 = vpop.f32.mrb[77].mxu0  ;;  %5253 = vmatprep.subr.bf16.mxu0 %v5908_v41 }
 0x19b   : > { %7968 = vst [vmem:[#allocation19_spill] sm:$0xff] %v6518_v46  ;;  %v6531_v12 = vmax.f32 %v2024_v53, %v2064_v54  ;;  %v1740_v27 = vmul.f32 %v6235_v56, %v1322_v25  ;;  %v5164_v10 = vpop.f32.mrb[78].mxu0  ;;  %5254 = vmatpush3.bf16.msra.mxu0 %v5908_v41  ;;  %v5910_v25 = vld [vmem:[%s7895_s4 + $0x68] sm:$0xff]  }
 0x19c   : > { %7969 = vst [vmem:[#allocation20_spill] sm:$0xff] %v6527_v11  ;;  %v1909_v39 = vadd.f32 %v6247_v61, %v1742_v19  ;;  %v1743_v43 = vmul.f32 %v5164_v10, %v6235_v56  ;;  %v1325_v45 = vpop.f32.mrb[79].mxu0  ;;  %5346 = vmatpush3.bf16.msra.mxu1 %v5909_v60  ;;  %5255 = vmatprep.subr.bf16.mxu0 %v5910_v25  ;;  %v5915_v41 = vld [vmem:[%s7895_s4 + $0x128] sm:$0xff]  }
 0x19d   : > { %7970 = vst [vmem:[#allocation21_spill] sm:$0xff] %v6531_v12  ;;  %v1907_v51 = vadd.f32 %v6247_v61, %v1740_v27  ;;  %v1741_v55 = vmul.f32 %v6235_v56, %v1325_v45  ;;  %5347 = vmatprep.subr.bf16.mxu1 %v5911_v59  ;;  %v5912_v45 = vld [vmem:[%s7895_s4 + $0x70] sm:$0xff]  }
 0x19e   : > { %v2069_v42 = vmax.f32 %v1909_v39, 0.0  ;;  %v1910_v1 = vadd.f32 %v6247_v61, %v1743_v43 }
 0x19f   : > { %v2067_v3 = vmax.f32 %v1907_v51, 0.0  ;;  %v1908_v53 = vadd.f32 %v6247_v61, %v1741_v55  ;;  %5256 = vmatpush3.bf16.msra.mxu0 %v5910_v25  ;;  %v5914_v55 = vld [vmem:[%s7895_s4 + $0x78] sm:$0xff]  }
 0x1a0   : > { %v6548_v54 = vmax.f32 %v2029_v47, %v2069_v42  ;;  %v2070_v9 = vmax.f32 %v1910_v1, 0.0  ;;  %5348 = vmatpush3.bf16.msra.mxu1 %v5911_v59  ;;  %5257 = vmatprep.subr.bf16.mxu0 %v5912_v45  ;;  %v6577_v1 = vld [vmem:[%s7895_s4] sm:$0xff]  }
 0x1a1   : > { %v6550_v57 = vmax.f32 %v2027_v48, %v2067_v3  ;;  %v2068_v19 = vmax.f32 %v1908_v53, 0.0  ;;  %v5167_v6 = vpop.f32.mrb[80].mxu0  ;;  %5349 = vmatprep.subr.bf16.mxu1 %v5913_v49  ;;  %7975 = vst [vmem:[#allocation26_spill] sm:$0xff] %v6577_v1  ;;  %v5917_v48 = vld [vmem:[%s7895_s4 + $0x130] sm:$0xff]  }
 0x1a2   : > { %7971 = vst [vmem:[#allocation22_spill] sm:$0xff] %v6548_v54  ;;  %v6558_v27 = vmax.f32 %v2030_v50, %v2070_v9  ;;  %v1338_v10 = vpop.f32.mrb[81].mxu0  ;;  %v5919_v50 = vld [vmem:[%s7895_s4 + $0x138] sm:$0xff]   ;;  %v1746_v63 = vmul.f32 %v5167_v6, %v6235_v56 }
 0x1a3   : > { %7972 = vst [vmem:[#allocation23_spill] sm:$0xff] %v6550_v57  ;;  %v6560_v33 = vmax.f32 %v2028_v52, %v2068_v19  ;;  %v5168_v39 = vpop.f32.mrb[82].mxu0  ;;  %5258 = vmatpush3.bf16.msra.mxu0 %v5912_v45  ;;  %v6589_v19 = vld [vmem:[%s7895_s4 + $0x140] sm:$0xff]   ;;  %v1744_v62 = vmul.f32 %v6235_v56, %v1338_v10 }
 0x1a4   : > { %7973 = vst [vmem:[#allocation24_spill] sm:$0xff] %v6558_v27  ;;  %v1341_v43 = vpop.f32.mrb[83].mxu0  ;;  %5350 = vmatpush3.bf16.msra.mxu1 %v5913_v49  ;;  %5259 = vmatprep.subr.bf16.mxu0 %v5914_v55  ;;  %7976 = vst [vmem:[#allocation27_spill] sm:$0xff] %v6589_v19  ;;  %v6619_v34 = vadd.f32 %v6247_v61, %v1746_v63 }
 0x1a5   : > { %7974 = vst [vmem:[#allocation25_spill] sm:$0xff] %v6560_v33  ;;  %5351 = vmatprep.subr.bf16.mxu1 %v5915_v41  ;;  %v1745_v40 = vmul.f32 %v6235_v56, %v1341_v43  ;;  %v6623_v32 = vadd.f32 %v6247_v61, %v1744_v62 }
 0x1a7   : > { %5260 = vmatpush3.bf16.msra.mxu0 %v5914_v55  ;;  %v6630_v43 = vadd.f32 %v6247_v61, %v1745_v40 }
 0x1a8   : > { %5352 = vmatpush3.bf16.msra.mxu1 %v5915_v41  ;;  %5269 = vmatprep.subr.bf16.mxu0 %v6577_v1  ;;  %v1747_v1 = vmul.f32 %v5168_v39, %v6235_v56 }
 0x1a9   : > { %v5171_v51 = vpop.f32.mrb[84].mxu0  ;;  %5353 = vmatprep.subr.bf16.mxu1 %v5917_v48 }
 0x1aa   : > { %v1354_v60 = vpop.f32.mrb[85].mxu0  ;;  %v1750_v36 = vmul.f32 %v5171_v51, %v6235_v56  ;;  %v6627_v39 = vadd.f32 %v6247_v61, %v1747_v1 }
 0x1ab   : > { %v5172_v47 = vpop.f32.mrb[86].mxu0  ;;  %v1748_v35 = vmul.f32 %v6235_v56, %v1354_v60 }
 0x1ac   : > { %v1357_v42 = vpop.f32.mrb[87].mxu0  ;;  %5354 = vmatpush3.bf16.msra.mxu1 %v5917_v48  ;;  %v1751_v6 = vmul.f32 %v5172_v47, %v6235_v56  ;;  %v6634_v60 = vadd.f32 %v6247_v61, %v1750_v36 }
 0x1ad   : > { %5355 = vmatprep.subr.bf16.mxu1 %v5919_v50  ;;  %v1749_v10 = vmul.f32 %v6235_v56, %v1357_v42  ;;  %v6637_v63 = vadd.f32 %v6247_v61, %v1748_v35 }
 0x1ae   : > { %v6643_v42 = vadd.f32 %v6247_v61, %v1751_v6 }
 0x1b0   : > { %5356 = vmatpush3.bf16.msra.mxu1 %v5919_v50 }
 0x1b1   : > { %v5175_v3 = vpop.f32.mrb[88].mxu0  ;;  %5365 = vmatprep.subr.bf16.mxu1 %v6589_v19 }
 0x1b2   : > { %v1370_v53 = vpop.f32.mrb[89].mxu0  ;;  %v1754_v51 = vmul.f32 %v5175_v3, %v6235_v56  ;;  %v6650_v3 = vadd.f32 %v6247_v61, %v1749_v10 }
 0x1b3   : > { %v5176_v9 = vpop.f32.mrb[90].mxu0  ;;  %v1752_v1 = vmul.f32 %v6235_v56, %v1370_v53 }
 0x1b4   : > { %v1373_v52 = vpop.f32.mrb[91].mxu0  ;;  %v1755_v36 = vmul.f32 %v5176_v9, %v6235_v56  ;;  %v6659_v28 = vadd.f32 %v6247_v61, %v1754_v51 }
 0x1b5   : > { %v1753_v35 = vmul.f32 %v6235_v56, %v1373_v52  ;;  %v6670_v62 = vadd.f32 %v6247_v61, %v1752_v1 }
 0x1b6   : > { %v6676_v23 = vadd.f32 %v6247_v61, %v1755_v36 }
 0x1b7   : > { %v6679_v40 = vadd.f32 %v6247_v61, %v1753_v35 }
 0x1b9   : > { %v5179_v25 = vpop.f32.mrb[92].mxu0 }
 0x1ba   : > { %v1386_v59 = vpop.f32.mrb[93].mxu0  ;;  %v1758_v53 = vmul.f32 %v5179_v25, %v6235_v56 }
 0x1bb   : > { %v5180_v45 = vpop.f32.mrb[94].mxu0  ;;  %v1756_v9 = vmul.f32 %v6235_v56, %v1386_v59 }
 0x1bc   : > { %v1389_v49 = vpop.f32.mrb[95].mxu0  ;;  %v1759_v52 = vmul.f32 %v5180_v45, %v6235_v56  ;;  %v6684_v24 = vadd.f32 %v6247_v61, %v1758_v53 }
 0x1bd   : > { %v1757_v51 = vmul.f32 %v6235_v56, %v1389_v49 }
 0x1be   : > { %v6692_v36 = vadd.f32 %v6247_v61, %v1759_v52 }
 0x1bf   : > { %v6700_v53 = vadd.f32 %v6247_v61, %v1757_v51 }
 0x1c1   : > { %v5183_v55 = vpop.f32.mrb[96].mxu0 }
 0x1c2   : > { %v1402_v41 = vpop.f32.mrb[97].mxu0  ;;  %v1762_v6 = vmul.f32 %v5183_v55, %v6235_v56  ;;  %v6689_v55 = vadd.f32 %v6247_v61, %v1756_v9 }
 0x1c3   : > { %v5184_v48 = vpop.f32.mrb[98].mxu0  ;;  %v1760_v59 = vmul.f32 %v6235_v56, %v1402_v41 }
 0x1c4   : > { %v1405_v33 = vpop.f32.mrb[99].mxu0  ;;  %v1763_v1 = vmul.f32 %v5184_v48, %v6235_v56  ;;  %v6703_v48 = vadd.f32 %v6247_v61, %v1762_v6 }
 0x1c5   : > { %v1761_v49 = vmul.f32 %v6235_v56, %v1405_v33 }
 0x1c6   : > { %v6720_v10 = vadd.f32 %v6247_v61, %v1763_v1 }
 0x1c9   : > { %v5187_v27 = vpop.f32.mrb[100].mxu0 }
 0x1ca   : > { %v1418_v57 = vpop.f32.mrb[101].mxu0  ;;  %v1766_v35 = vmul.f32 %v5187_v27, %v6235_v56 }
 0x1cb   : > { %v6592_v54 = vpop.f32.mrb[102].mxu0  ;;  %v1764_v25 = vmul.f32 %v6235_v56, %v1418_v57  ;;  %v6712_v57 = vadd.f32 %v6247_v61, %v1760_v59 }
 0x1cc   : > { %v6594_v50 = vpop.f32.mrb[103].mxu0  ;;  %v1767_v33 = vmul.f32 %v6592_v54, %v6235_v56  ;;  %v6723_v54 = vadd.f32 %v6247_v61, %v1761_v49 }
 0x1cd   : > { %v1765_v45 = vmul.f32 %v6235_v56, %v6594_v50  ;;  %v6732_v50 = vadd.f32 %v6247_v61, %v1766_v35  ;;  %v6735_v6 = vadd.f32 %v6247_v61, %v1764_v25 }
 0x1cf   : > { %7980 = vst [vmem:[#allocation31_spill] sm:$0xff] %v6732_v50  ;;  %7981 = vst [vmem:[#allocation32_spill] sm:$0xff] %v6735_v6 }
 0x1d1   : > { %v6596_v12 = vpop.f32.mrb[104].mxu0 }
 0x1d2   : > { %v6598_v11 = vpop.f32.mrb[105].mxu0  ;;  %v1770_v52 = vmul.f32 %v6596_v12, %v6235_v56 }
 0x1d3   : > { %v6600_v46 = vpop.f32.mrb[106].mxu0  ;;  %v1768_v12 = vmul.f32 %v6235_v56, %v6598_v11 }
 0x1d4   : > { %v6602_v44 = vpop.f32.mrb[107].mxu0  ;;  %v1771_v35 = vmul.f32 %v6600_v46, %v6235_v56 }
 0x1d5   : > { %v1769_v25 = vmul.f32 %v6235_v56, %v6602_v44  ;;  %v6767_v49 = vadd.f32 %v6247_v61, %v1768_v12 }
 0x1d6   : > { %v6774_v6 = vadd.f32 %v6247_v61, %v1771_v35 }
 0x1d7   : > { %7985 = vst [vmem:[#allocation36_spill] sm:$0xff] %v6767_v49 }
 0x1d8   : > { %7986 = vst [vmem:[#allocation37_spill] sm:$0xff] %v6774_v6 }
 0x1d9   : > { %v6604_v19 = vpop.f32.mrb[108].mxu0 }
 0x1da   : > { %v6607_v5 = vpop.f32.mrb[109].mxu0  ;;  %v1774_v11 = vmul.f32 %v6604_v19, %v6235_v56 }
 0x1db   : > { %v6610_v58 = vpop.f32.mrb[110].mxu0  ;;  %v1772_v46 = vmul.f32 %v6235_v56, %v6607_v5  ;;  %v6777_v5 = vadd.f32 %v6247_v61, %v1769_v25 }
 0x1dc   : > { %v6614_v38 = vpop.f32.mrb[111].mxu0  ;;  %v1775_v44 = vmul.f32 %v6610_v58, %v6235_v56  ;;  %v6782_v58 = vld [vmem:[%s7893_s2] ss:$0 sm:$0xff] }
 0x1e1   : > { %v6639_v47 = vpop.f32.mrb[112].mxu0 }
 0x1e2   : > { %v6646_v30 = vpop.f32.mrb[113].mxu0 }
 0x1e3   : > { %v6654_v29 = vpop.f32.mrb[114].mxu0 }
 0x1e4   : > { %v6662_v26 = vpop.f32.mrb[115].mxu0 }
 0x1e9   : > { %v6696_v41 = vpop.f32.mrb[116].mxu0 }
 0x1ea   : > { %v6707_v9 = vpop.f32.mrb[117].mxu0 }
 0x1eb   : > { %7977 = vst [vmem:[#allocation28_spill] sm:$0xff] %v6707_v9  ;;  %v6716_v51 = vpop.f32.mrb[118].mxu0  ;;  %v6746_v9 = vadd.f32 %v6247_v61, %v1765_v45 }
 0x1ec   : > { %7978 = vst [vmem:[#allocation29_spill] sm:$0xff] %v6716_v51  ;;  %v6727_v27 = vpop.f32.mrb[119].mxu0  ;;  %v6740_v51 = vadd.f32 %v6247_v61, %v1767_v33  ;;  %v6755_v33 = vadd.f32 %v6247_v61, %v1770_v52  ;;  %v1773_v52 = vmul.f32 %v6235_v56, %v6614_v38 }
 0x1ed   : > { %7979 = vst [vmem:[#allocation30_spill] sm:$0xff] %v6727_v27  ;;  %7983 = vst [vmem:[#allocation34_spill] sm:$0xff] %v6746_v9  ;;  %v7988_v9 = vmax.f32 %v6619_v34, 0.0 }
 0x1ee   : > { %7982 = vst [vmem:[#allocation33_spill] sm:$0xff] %v6740_v51  ;;  %7984 = vst [vmem:[#allocation35_spill] sm:$0xff] %v6755_v33  ;;  %v7989_v51 = vmax.f32 %v6623_v32, 0.0 }
 0x1f1   : > { %v5207_v27 = vpop.f32.mrb[120].mxu0 }
 0x1f2   : > { %v1786_v19 = vmul.f32 %v5207_v27, %v6235_v56  ;;  %v1498_v59 = vpop.f32.mrb[121].mxu0  ;;  %v6789_v56 = vld [vmem:[%s7894_s3] ss:$0 sm:$0xff] }
 0x1f3   : > { %v1784_v12 = vmul.f32 %v6782_v58, %v1498_v59  ;;  %v5208_v1 = vpop.f32.mrb[122].mxu0  ;;  %v6792_v27 = vadd.f32 %v6789_v56, %v1774_v11  ;;  %v6797_v45 = vadd.f32 %v6789_v56, %v1772_v46  ;;  %v6800_v59 = vadd.f32 %v6789_v56, %v1775_v44 }
 0x1f4   : > { %v1953_v61 = vadd.f32 %v6789_v56, %v1786_v19  ;;  %v1787_v35 = vmul.f32 %v6782_v58, %v5208_v1  ;;  %v1501_v25 = vpop.f32.mrb[123].mxu0  ;;  %v6806_v11 = vadd.f32 %v6789_v56, %v1773_v52 }
 0x1f5   : > { %7987 = vst [vmem:[#allocation38_spill] sm:$0xff] %v6792_v27  ;;  %v1951_v38 = vadd.f32 %v6789_v56, %v1784_v12  ;;  %v1785_v33 = vmul.f32 %v6782_v58, %v1501_v25  ;;  %v1778_v25 = vmul.f32 %v6782_v58, %v6639_v47  ;;  %v7990_v47 = vmax.f32 %v6627_v39, 0.0 }
 0x1f6   : > { %v2113_v19 = vmax.f32 %v1953_v61, 0.0  ;;  %v1954_v1 = vadd.f32 %v6789_v56, %v1787_v35  ;;  %v2099_v61 = vmax.f32 %v6797_v45, 0.0  ;;  %v2102_v35 = vmax.f32 %v6800_v59, 0.0 }
 0x1f7   : > { %v2111_v50 = vmax.f32 %v1951_v38, 0.0  ;;  %v1952_v44 = vadd.f32 %v6789_v56, %v1785_v33  ;;  %v8048_v59 = vmax.f32 %v6806_v11, 0.0  ;;  %v7161_v11 = vld [vmem:[%s7895_s4 + $0x18] sm:$0xff]  }
 0x1f8   : > { %v2193_v49 = vmax.f32 %v7988_v9, %v2113_v19  ;;  %v2114_v52 = vmax.f32 %v1954_v1, 0.0  ;;  %v1776_v19 = vmul.f32 %v6782_v58, %v6646_v30  ;;  %v7991_v1 = vmax.f32 %v6630_v43, 0.0 }
 0x1f9   : > { %v2191_v6 = vmax.f32 %v7989_v51, %v2111_v50  ;;  %v2112_v46 = vmax.f32 %v1952_v44, 0.0  ;;  %v5211_v38 = vpop.f32.mrb[124].mxu0 }
 0x1fa   : > { %v6823_v12 = vmax.f32 %v6275_v7, %v2193_v49  ;;  %v2194_v27 = vmax.f32 %v7990_v47, %v2114_v52  ;;  %v1790_v34 = vmul.f32 %v6782_v58, %v5211_v38  ;;  %v1514_v9 = vpop.f32.mrb[125].mxu0  ;;  %v6837_v7 = vadd.f32 %v6789_v56, %v1778_v25 }
 0x1fb   : > { %v2192_v32 = vmax.f32 %v7991_v1, %v2112_v46  ;;  %v1788_v51 = vmul.f32 %v6782_v58, %v1514_v9  ;;  %v5212_v50 = vpop.f32.mrb[126].mxu0  ;;  %v6834_v44 = vmax.f32 %v6279_v13, %v2191_v6 }
 0x1fc   : > { %v2234_v39 = vmax.f32 %v6282_v21, %v2194_v27  ;;  %v1957_v49 = vadd.f32 %v6789_v56, %v1790_v34  ;;  %v1791_v52 = vmul.f32 %v6782_v58, %v5212_v50  ;;  %v1517_v38 = vpop.f32.mrb[127].mxu0  ;;  %v2558_v21 = vrot.slane %v6823_v12, 1 }
 0x1fd   : > { %v2232_v30 = vmax.f32 %v6287_v2, %v2192_v32  ;;  %v1955_v43 = vadd.f32 %v6789_v56, %v1788_v51  ;;  %v1789_v46 = vmul.f32 %v6782_v58, %v1517_v38  ;;  %v2555_v1 = vrot.slane %v6834_v44, 1 }
 0x1fe   : > { %v2559_v6 = vrot.slane %v2234_v39, 1  ;;  %v2117_v47 = vmax.f32 %v1957_v49, 0.0  ;;  %v1958_v25 = vadd.f32 %v6789_v56, %v1791_v52  ;;  %v1779_v2 = vmul.f32 %v6782_v58, %v6654_v29 }
 0x1ff   : > { %v2556_v27 = vrot.slane %v2232_v30, 1  ;;  %v2115_v34 = vmax.f32 %v1955_v43, 0.0  ;;  %v1956_v9 = vadd.f32 %v6789_v56, %v1789_v46  ;;  %v7992_v32 = vmax.f32 %v6634_v60, 0.0 }
 0x200   : > { %v2118_v50 = vmax.f32 %v1958_v25, 0.0  ;;  %v2560_v39 = vsel %vm2554_vm0, %v2558_v21, %v2559_v6  ;;  %v6857_v49 = vadd.f32 %v6789_v56, %v1776_v19  ;;  %v7993_v52 = vmax.f32 %v6637_v63, 0.0 }
 0x201   : > { %v2197_v51 = vmax.f32 %v7992_v32, %v2117_v47  ;;  %v2116_v30 = vmax.f32 %v1956_v9, 0.0  ;;  %v5215_v43 = vpop.f32.mrb[128].mxu0  ;;  %v2557_v46 = vsel %vm2554_vm0, %v2555_v1, %v2556_v27  ;;  %v7994_v29 = vmax.f32 %v6643_v42, 0.0 }
 0x202   : > { %v2195_v38 = vmax.f32 %v7993_v52, %v2115_v34  ;;  %v1794_v47 = vmul.f32 %v6782_v58, %v5215_v43  ;;  %v1530_v25 = vpop.f32.mrb[129].mxu0  ;;  %v6868_v6 = vpack.c.bf16 %v2560_v39, %v2557_v46  ;;  %v6872_v19 = vmul.f32 %v6782_v58, %v6662_v26 }
 0x203   : > { %v6863_v13 = vmax.f32 %v6305_v15, %v2197_v51  ;;  %v2198_v60 = vmax.f32 %v7994_v29, %v2118_v50  ;;  %v7995_v21 = vmax.f32 %v6650_v3, 0.0  ;;  %v1792_v15 = vmul.f32 %v6782_v58, %v1530_v25  ;;  %v5216_v34 = vpop.f32.mrb[130].mxu0 }
 0x204   : > { %v6875_v63 = vmax.f32 %v6309_v0, %v2195_v38  ;;  %v1961_v9 = vadd.f32 %v6789_v56, %v1794_v47  ;;  %v1795_v1 = vmul.f32 %v6782_v58, %v5216_v34  ;;  %v1533_v32 = vpop.f32.mrb[131].mxu0  ;;  %v7997_v34 = vmax.f32 %v6670_v62, 0.0  ;;  %v8038_v47 = vld [vmem:[#allocation13_spill] sm:$0xff] }
 0x205   : > { %v2196_v27 = vmax.f32 %v7995_v21, %v2116_v30  ;;  %v2238_v42 = vmax.f32 %v6312_v31, %v2198_v60  ;;  %v2564_v51 = vrot.slane %v6863_v13, 1  ;;  %v1959_v3 = vadd.f32 %v6789_v56, %v1792_v15 }
 0x206   : > { %v6886_v26 = vpack.c.bf16 %v6863_v13, %v6875_v63  ;;  %v1793_v50 = vmul.f32 %v6782_v58, %v1533_v32  ;;  %v2121_v38 = vmax.f32 %v1961_v9, 0.0  ;;  %v1962_v31 = vadd.f32 %v6789_v56, %v1795_v1 }
 0x207   : > { %v2236_v0 = vmax.f32 %v6317_v37, %v2196_v27  ;;  %v2565_v52 = vrot.slane %v2238_v42, 1  ;;  %v2561_v30 = vrot.slane %v6875_v63, 1  ;;  %v2119_v46 = vmax.f32 %v1959_v3, 0.0 }
 0x208   : > { %v1960_v29 = vadd.f32 %v6789_v56, %v1793_v50  ;;  %v7996_v37 = vmax.f32 %v6659_v28, 0.0  ;;  %v2122_v21 = vmax.f32 %v1962_v31, 0.0  ;;  %v6901_v15 = vadd.f32 %v6789_v56, %v1779_v2 }
 0x209   : > { %v2562_v43 = vrot.slane %v2236_v0, 1  ;;  %v2566_v27 = vsel %vm2554_vm0, %v2564_v51, %v2565_v52  ;;  %v2199_v42 = vmax.f32 %v7997_v34, %v2119_v46  ;;  %v5219_v1 = vpop.f32.mrb[132].mxu0  ;;  %v7998_v3 = vmax.f32 %v6676_v23, 0.0 }
 0x20a   : > { %v2201_v25 = vmax.f32 %v7996_v37, %v2121_v38  ;;  %v2120_v9 = vmax.f32 %v1960_v29, 0.0  ;;  %v1798_v50 = vmul.f32 %v6782_v58, %v5219_v1  ;;  %v1546_v38 = vpop.f32.mrb[133].mxu0  ;;  %v7999_v62 = vmax.f32 %v6679_v40, 0.0 }
 0x20b   : > { %v2563_v32 = vsel %vm2554_vm0, %v2561_v30, %v2562_v43  ;;  %v2202_v28 = vmax.f32 %v7998_v3, %v2122_v21  ;;  %v6915_v2 = vmax.f32 %v6338_v4, %v2199_v42  ;;  %v1796_v31 = vmul.f32 %v6782_v58, %v1546_v38  ;;  %v5220_v30 = vpop.f32.mrb[134].mxu0  ;;  %v8017_v4 = vld [vmem:[#allocation6_spill] sm:$0xff] }
 0x20c   : > { %v6907_v0 = vmax.f32 %v6334_v8, %v2201_v25  ;;  %v6912_v51 = vpack.c.bf16 %v2566_v27, %v2563_v32  ;;  %v2200_v52 = vmax.f32 %v7999_v62, %v2120_v9  ;;  %v6920_v43 = vpack.c.bf16 %v2563_v32, %v2560_v39  ;;  %v1549_v37 = vpop.f32.mrb[135].mxu0  ;;  %v8032_v8 = vld [vmem:[#allocation37_spill] sm:$0xff] }
 0x20d   : > { %v2242_v23 = vmax.f32 %v6341_v14, %v2202_v28  ;;  %v1965_v46 = vadd.f32 %v6789_v56, %v1798_v50  ;;  %v1799_v29 = vmul.f32 %v6782_v58, %v5220_v30  ;;  %v1963_v25 = vadd.f32 %v6789_v56, %v1796_v31 }
 0x20e   : > { %v2240_v40 = vmax.f32 %v6345_v16, %v2200_v52  ;;  %v2570_v21 = vrot.slane %v6907_v0, 1  ;;  %v1797_v14 = vmul.f32 %v6782_v58, %v1549_v37  ;;  %v2567_v9 = vrot.slane %v6915_v2, 1  ;;  %v8031_v52 = vld [vmem:[#allocation10_spill] sm:$0xff] }
 0x20f   : > { %v2571_v39 = vrot.slane %v2242_v23, 1  ;;  %v2125_v34 = vmax.f32 %v1965_v46, 0.0  ;;  %v1966_v42 = vadd.f32 %v6789_v56, %v1799_v29  ;;  %v2123_v32 = vmax.f32 %v1963_v25, 0.0 }
 0x210   : > { %v2568_v1 = vrot.slane %v2240_v40, 1  ;;  %v6936_v3 = vpack.c.bf16 %v6907_v0, %v6915_v2  ;;  %v8000_v16 = vmax.f32 %v6684_v24, 0.0  ;;  %v1964_v38 = vadd.f32 %v6789_v56, %v1797_v14 }
 0x211   : > { %v2126_v50 = vmax.f32 %v1966_v42, 0.0  ;;  %v2572_v62 = vsel %vm2554_vm0, %v2570_v21, %v2571_v39  ;;  %v6945_v31 = vadd.f32 %v6789_v56, %v6872_v19  ;;  %v8001_v30 = vmax.f32 %v6689_v55, 0.0  ;;  %v5223_v46 = vpop.f32.mrb[136].mxu0 }
 0x212   : > { %v2205_v28 = vmax.f32 %v8000_v16, %v2125_v34  ;;  %v2569_v29 = vsel %vm2554_vm0, %v2567_v9, %v2568_v1  ;;  %v8002_v37 = vmax.f32 %v6692_v36, 0.0  ;;  %v2124_v25 = vmax.f32 %v1964_v38, 0.0  ;;  %v1562_v39 = vpop.f32.mrb[137].mxu0 }
 0x213   : > { %v2203_v23 = vmax.f32 %v8001_v30, %v2123_v32  ;;  %v1802_v21 = vmul.f32 %v6782_v58, %v5223_v46  ;;  %v1800_v19 = vmul.f32 %v6782_v58, %v1562_v39  ;;  %v5224_v55 = vpop.f32.mrb[138].mxu0  ;;  %v6960_v42 = vpack.c.bf16 %v2569_v29, %v2566_v27 }
 0x214   : > { %v6951_v24 = vmax.f32 %v6362_v17, %v2205_v28  ;;  %v2206_v40 = vmax.f32 %v8002_v37, %v2126_v50  ;;  %v6962_v14 = vpack.c.bf16 %v2572_v62, %v2569_v29  ;;  %v8003_v9 = vmax.f32 %v6700_v53, 0.0  ;;  %v1565_v16 = vpop.f32.mrb[139].mxu0 }
 0x215   : > { %v6957_v34 = vmax.f32 %v6366_v18, %v2203_v23  ;;  %v1969_v1 = vadd.f32 %v6789_v56, %v1802_v21  ;;  %v1803_v32 = vmul.f32 %v6782_v58, %v5224_v55  ;;  %v1967_v28 = vadd.f32 %v6789_v56, %v1800_v19 }
 0x216   : > { %v2246_v17 = vmax.f32 %v6369_v20, %v2206_v40  ;;  %v2204_v36 = vmax.f32 %v8003_v9, %v2124_v25  ;;  %v1801_v50 = vmul.f32 %v6782_v58, %v1565_v16  ;;  %v2576_v29 = vrot.slane %v6951_v24, 1 }
 0x217   : > { %v6974_v27 = vpack.c.bf16 %v6951_v24, %v6957_v34  ;;  %v2129_v53 = vmax.f32 %v1969_v1, 0.0  ;;  %v1970_v30 = vadd.f32 %v6789_v56, %v1803_v32  ;;  %v2127_v23 = vmax.f32 %v1967_v28, 0.0 }
 0x218   : > { %v2577_v38 = vrot.slane %v2246_v17, 1  ;;  %v2244_v20 = vmax.f32 %v6373_v22, %v2204_v36  ;;  %v1968_v46 = vadd.f32 %v6789_v56, %v1801_v50  ;;  %v8004_v25 = vmax.f32 %v6703_v48, 0.0 }
 0x219   : > { %v2130_v39 = vmax.f32 %v1970_v30, 0.0  ;;  %v2573_v19 = vrot.slane %v6957_v34, 1  ;;  %v1782_v22 = vmul.f32 %v6782_v58, %v6696_v41  ;;  %v8005_v55 = vmax.f32 %v6712_v57, 0.0  ;;  %v5227_v36 = vpop.f32.mrb[140].mxu0  ;;  %v8008_v30 = vld [vmem:[#allocation3_spill] sm:$0xff] }
 0x21a   : > { %v2574_v40 = vrot.slane %v2244_v20, 1  ;;  %v2209_v21 = vmax.f32 %v8004_v25, %v2129_v53  ;;  %v2128_v9 = vmax.f32 %v1968_v46, 0.0  ;;  %v2578_v1 = vsel %vm2554_vm0, %v2576_v29, %v2577_v38  ;;  %v1578_v48 = vpop.f32.mrb[141].mxu0  ;;  %v8007_v20 = vld [vmem:[#allocation2_spill] sm:$0xff] }
 0x21b   : > { %v2207_v17 = vmax.f32 %v8005_v55, %v2127_v23  ;;  %v8006_v32 = vmax.f32 %v6720_v10, 0.0  ;;  %v1806_v28 = vmul.f32 %v6782_v58, %v5227_v36  ;;  %v8009_v57 = vmax.f32 %v6723_v54, 0.0  ;;  %v5228_v38 = vpop.f32.mrb[142].mxu0  ;;  %v8010_v10 = vld [vmem:[#allocation4_spill] sm:$0xff]  ;;  %v8011_v55 = vld [vmem:[#allocation5_spill] sm:$0xff] }
 0x21c   : > { %v2575_v50 = vsel %vm2554_vm0, %v2573_v19, %v2574_v40  ;;  %v6995_v53 = vmax.f32 %v8007_v20, %v2209_v21  ;;  %v1804_v46 = vmul.f32 %v6782_v58, %v1578_v48  ;;  %v1807_v40 = vmul.f32 %v6782_v58, %v5228_v38  ;;  %v1581_v19 = vpop.f32.mrb[143].mxu0 }
 0x21d   : > { %v2210_v16 = vmax.f32 %v8006_v32, %v2130_v39  ;;  %v6998_v41 = vmax.f32 %v8008_v30, %v2207_v17  ;;  %v2208_v23 = vmax.f32 %v8009_v57, %v2128_v9  ;;  %v7003_v29 = vpack.c.bf16 %v2575_v50, %v2572_v62  ;;  %v8012_v57 = vld [vmem:[#allocation28_spill] sm:$0xff] }
 0x21e   : > { %v1973_v39 = vadd.f32 %v6789_v56, %v1806_v28  ;;  %v7008_v21 = vpack.c.bf16 %v2578_v1, %v2575_v50  ;;  %v1971_v36 = vadd.f32 %v6789_v56, %v1804_v46  ;;  %v1805_v54 = vmul.f32 %v6782_v58, %v1581_v19  ;;  %v8013_v46 = vld [vmem:[#allocation31_spill] sm:$0xff] }
 0x21f   : > { %v2250_v25 = vmax.f32 %v8010_v10, %v2210_v16  ;;  %v2248_v17 = vmax.f32 %v8011_v55, %v2208_v23  ;;  %v3015_v9 = vrot.slane %v6998_v41, 1  ;;  %v1974_v48 = vadd.f32 %v6789_v56, %v1807_v40 }
 0x220   : > { %v2133_v62 = vmax.f32 %v1973_v39, 0.0  ;;  %v2131_v20 = vmax.f32 %v1971_v36, 0.0  ;;  %v1972_v50 = vadd.f32 %v6789_v56, %v1805_v54  ;;  %v3441_v30 = vrot.slane %v6995_v53, 1  ;;  %v8015_v39 = vld [vmem:[#allocation32_spill] sm:$0xff] }
 0x221   : > { %v3442_v32 = vrot.slane %v2250_v25, 1  ;;  %v3016_v28 = vrot.slane %v2248_v17, 1  ;;  %v1780_v23 = vmul.f32 %v6782_v58, %v8012_v57  ;;  %v8014_v38 = vmax.f32 %v8013_v46, 0.0  ;;  %v5231_v17 = vpop.f32.mrb[144].mxu0  ;;  %v8018_v57 = vld [vmem:[#allocation33_spill] sm:$0xff]  ;;  %v8020_v25 = vld [vmem:[#allocation34_spill] sm:$0xff] }
 0x222   : > { %v2134_v19 = vmax.f32 %v1974_v48, 0.0  ;;  %v8016_v40 = vmax.f32 %v8015_v39, 0.0  ;;  %v2132_v37 = vmax.f32 %v1972_v50, 0.0  ;;  %v8019_v60 = vmax.f32 %v8018_v57, 0.0  ;;  %v1594_v48 = vpop.f32.mrb[145].mxu0 }
 0x223   : > { %v2213_v10 = vmax.f32 %v8014_v38, %v2133_v62  ;;  %v3017_v36 = vsel %vm2554_vm0, %v3015_v9, %v3016_v28  ;;  %v3443_v54 = vsel %vm2554_vm0, %v3441_v30, %v3442_v32  ;;  %v1810_v62 = vmul.f32 %v6782_v58, %v5231_v17  ;;  %v8022_v9 = vld [vmem:[#allocation7_spill] sm:$0xff]  ;;  %v8023_v30 = vld [vmem:[#allocation8_spill] sm:$0xff]  ;;  %v8024_v17 = vld [vmem:[#allocation9_spill] sm:$0xff] }
 0x224   : > { %v2211_v55 = vmax.f32 %v8016_v40, %v2131_v20  ;;  %v2214_v46 = vmax.f32 %v8019_v60, %v2134_v19  ;;  %v7035_v38 = vpack.c.bf16 %v3017_v36, %v2578_v1  ;;  %v8021_v39 = vmax.f32 %v8020_v25, 0.0  ;;  %v5232_v40 = vpop.f32.mrb[146].mxu0 }
 0x225   : > { %v7030_v16 = vmax.f32 %v8017_v4, %v2213_v10  ;;  %v1808_v50 = vmul.f32 %v6782_v58, %v1594_v48  ;;  %v7041_v32 = vpack.c.bf16 %v3443_v54, %v3017_v36  ;;  %v7044_v4 = vadd.f32 %v6789_v56, %v1782_v22  ;;  %v1597_v19 = vpop.f32.mrb[147].mxu0 }
 0x226   : > { %v2212_v20 = vmax.f32 %v8021_v39, %v2132_v37  ;;  %v2251_v28 = vmax.f32 %v8022_v9, %v2211_v55  ;;  %v2254_v60 = vmax.f32 %v8023_v30, %v2214_v46  ;;  %v1977_v10 = vadd.f32 %v6789_v56, %v1810_v62  ;;  %v8026_v9 = vld [vmem:[#allocation35_spill] sm:$0xff] }
 0x227   : > { %v1811_v1 = vmul.f32 %v6782_v58, %v5232_v40  ;;  %v1975_v37 = vadd.f32 %v6789_v56, %v1808_v50  ;;  %v1809_v57 = vmul.f32 %v6782_v58, %v1597_v19  ;;  %v3733_v46 = vrot.slane %v7030_v16, 1  ;;  %v8025_v40 = vld [vmem:[#allocation29_spill] sm:$0xff] }
 0x228   : > { %v2252_v25 = vmax.f32 %v8024_v17, %v2212_v20  ;;  %v7053_v55 = vpack.c.bf16 %v7030_v16, %v2251_v28  ;;  %v3734_v36 = vrot.slane %v2254_v60, 1  ;;  %v2137_v54 = vmax.f32 %v1977_v10, 0.0 }
 0x229   : > { %v1978_v22 = vadd.f32 %v6789_v56, %v1811_v1  ;;  %v2135_v62 = vmax.f32 %v1975_v37, 0.0  ;;  %v1976_v39 = vadd.f32 %v6789_v56, %v1809_v57  ;;  %v3730_v20 = vrot.slane %v2251_v28, 1  ;;  %v8028_v1 = vld [vmem:[#allocation36_spill] sm:$0xff]  ;;  %v5235_v18 = vpop.f32.mrb[148].mxu0 }
 0x22a   : > { %v3731_v48 = vrot.slane %v2252_v25, 1  ;;  %5261 = vmatprep.mubr.bf16.mxu0 %v7053_v55  ;;  %v1783_v50 = vmul.f32 %v6782_v58, %v8025_v40  ;;  %v8027_v30 = vmax.f32 %v8026_v9, 0.0  ;;  %v7064_v60 = vsel %vm2554_vm0, %v3733_v46, %v3734_v36  ;;  %v1610_v36 = vpop.f32.mrb[149].mxu0  ;;  %v8034_v46 = vld [vmem:[#allocation30_spill] sm:$0xff] }
 0x22b   : > { %v2138_v17 = vmax.f32 %v1978_v22, 0.0  ;;  %v7067_v10 = vadd.f32 %v6789_v56, %v1780_v23  ;;  %v8029_v25 = vmax.f32 %v8028_v1, 0.0  ;;  %v2136_v57 = vmax.f32 %v1976_v39, 0.0 }
 0x22c   : > { %v2217_v19 = vmax.f32 %v8027_v30, %v2137_v54  ;;  %v7072_v28 = vsel %vm2554_vm0, %v3730_v20, %v3731_v48  ;;  %v8033_v9 = vmax.f32 %v8032_v8, 0.0  ;;  %v1814_v22 = vmul.f32 %v6782_v58, %v5235_v18 }
 0x22d   : > { %v2215_v37 = vmax.f32 %v8029_v25, %v2135_v62  ;;  %8030 = vst [vmem:[#allocation2_spill] sm:$0xff] %v7072_v28  ;;  %v7082_v30 = vmul.f32 %v6782_v58, %v8034_v46  ;;  %v8035_v62 = vld [vmem:[#allocation11_spill] sm:$0xff]  ;;  %v8036_v48 = vmax.f32 %v6777_v5, 0.0 }
 0x22e   : > { %v2257_v40 = vmax.f32 %v8031_v52, %v2217_v19  ;;  %v2218_v54 = vmax.f32 %v8033_v9, %v2138_v17  ;;  %v1812_v52 = vmul.f32 %v6782_v58, %v1610_v36  ;;  %v5236_v19 = vpop.f32.mrb[150].mxu0  ;;  %v8037_v17 = vld [vmem:[#allocation12_spill] sm:$0xff]  ;;  %v1981_v1 = vadd.f32 %v6789_v56, %v1814_v22 }
 0x22f   : > { %v2255_v39 = vmax.f32 %v8035_v62, %v2215_v37  ;;  %v2216_v20 = vmax.f32 %v8036_v48, %v2136_v57  ;;  %v1815_v25 = vmul.f32 %v6782_v58, %v5236_v19  ;;  %v1613_v9 = vpop.f32.mrb[151].mxu0  ;;  %v7099_v57 = vld [vmem:[%s7895_s4 + $0x8] sm:$0xff]  }
 0x230   : > { %v2258_v18 = vmax.f32 %v8037_v17, %v2218_v54  ;;  %v3739_v23 = vrot.slane %v2257_v40, 1  ;;  %v1979_v5 = vadd.f32 %v6789_v56, %v1812_v52  ;;  %v2141_v62 = vmax.f32 %v1981_v1, 0.0  ;;  %v8040_v52 = vld [vmem:[#allocation38_spill] sm:$0xff] }
 0x231   : > { %v7092_v46 = vpack.c.bf16 %v2257_v40, %v2255_v39  ;;  %v2256_v37 = vmax.f32 %v8038_v47, %v2216_v20  ;;  %v1982_v54 = vadd.f32 %v6789_v56, %v1815_v25  ;;  %v1813_v22 = vmul.f32 %v6782_v58, %v1613_v9  ;;  %v8042_v25 = vld [vmem:[#allocation26_spill] sm:$0xff] }
 0x232   : > { %v3740_v36 = vrot.slane %v2258_v18, 1  ;;  %v3736_v48 = vrot.slane %v2255_v39, 1  ;;  %v2139_v17 = vmax.f32 %v1979_v5, 0.0  ;;  %v7105_v47 = vpack.c.bf16 %v2255_v39, %v7030_v16  ;;  %v7128_v39 = vld [vmem:[%s7895_s4 + $0x10] sm:$0xff]  }
 0x233   : > { %v3737_v19 = vrot.slane %v2256_v37, 1  ;;  %5262 = vmatmul.mubr.bf16.vlgmr.msra.gmra.mrb[160].mxu0 %v7092_v46  ;;  %v8041_v8 = vmax.f32 %v8040_v52, 0.0  ;;  %v2142_v18 = vmax.f32 %v1982_v54, 0.0  ;;  %v1980_v1 = vadd.f32 %v6789_v56, %v1813_v22  ;;  %v8045_v54 = vld [vmem:[#allocation15_spill] sm:$0xff]  ;;  %v8047_v52 = vld [vmem:[#allocation16_spill] sm:$0xff] }
 0x234   : > { %8039 = vst [vmem:[#allocation3_spill] sm:$0xff] %v7105_v47  ;;  %v7108_v20 = vsel %vm2554_vm0, %v3739_v23, %v3740_v36  ;;  %5270 = vmatpush3.bf16.msra.mxu0 %v8042_v25  ;;  %v7116_v37 = vadd.f32 %v6789_v56, %v1783_v50  ;;  %v2219_v16 = vmax.f32 %v2099_v61, %v2139_v17  ;;  %v5239_v23 = vpop.f32.mrb[152].mxu0 }
 0x235   : > { %v2221_v33 = vmax.f32 %v8041_v8, %v2141_v62  ;;  %v7119_v5 = vsel %vm2554_vm0, %v3736_v48, %v3737_v19  ;;  %5357 = vmatprep.mubr.bf16.mxu1 %v7105_v47  ;;  %5271 = vmatprep.subr.bf16.mxu0 %v7099_v57  ;;  %v8044_v8 = vld [vmem:[#allocation14_spill] sm:$0xff]  ;;  %v2222_v50 = vmax.f32 %v2102_v35, %v2142_v18  ;;  %v2140_v62 = vmax.f32 %v1980_v1, 0.0  ;;  %v1626_v61 = vpop.f32.mrb[153].mxu0 }
 0x236   : > { %8043 = vst [vmem:[#allocation4_spill] sm:$0xff] %v7119_v5  ;;  %v1818_v45 = vmul.f32 %v6782_v58, %v5239_v23  ;;  %v2259_v22 = vmax.f32 %v8045_v54, %v2219_v16  ;;  %v1816_v48 = vmul.f32 %v6782_v58, %v1626_v61  ;;  %v5240_v19 = vpop.f32.mrb[154].mxu0  ;;  %v7140_v17 = vpack.c.bf16 %v7108_v20, %v7119_v5  ;;  %v8050_v54 = vld [vmem:[#allocation17_spill] sm:$0xff] }
 0x237   : > { %v7131_v36 = vmax.f32 %v8044_v8, %v2221_v33  ;;  %v2262_v25 = vmax.f32 %v8047_v52, %v2222_v50  ;;  %v2220_v35 = vmax.f32 %v8048_v59, %v2140_v62  ;;  %v1819_v1 = vmul.f32 %v6782_v58, %v5240_v19  ;;  %v1629_v16 = vpop.f32.mrb[155].mxu0  ;;  %v7166_v62 = vld [vmem:[%s7895_s4 + $0x148] sm:$0xff]  }
 0x238   : > { %8046 = vst [vmem:[#allocation5_spill] sm:$0xff] %v7140_v17  ;;  %v1985_v18 = vadd.f32 %v6789_v56, %v1818_v45  ;;  %5272 = vmatpush3.bf16.msra.mxu0 %v7099_v57  ;;  %v1983_v23 = vadd.f32 %v6789_v56, %v1816_v48  ;;  %v1817_v8 = vmul.f32 %v6782_v58, %v1629_v16 }
 0x239   : > { %5273 = vmatprep.subr.bf16.mxu0 %v7128_v39  ;;  %v7154_v61 = vpack.c.bf16 %v7131_v36, %v2259_v22  ;;  %v7156_v50 = vpack.c.bf16 %v2259_v22, %v2257_v40  ;;  %v3746_v45 = vrot.slane %v2262_v25, 1  ;;  %v2260_v48 = vmax.f32 %v8050_v54, %v2220_v35  ;;  %v5243_v47 = vpop.f32.mrb[156].mxu0 }
 0x23a   : > { %v2145_v19 = vmax.f32 %v1985_v18, 0.0  ;;  %v1986_v52 = vadd.f32 %v6789_v56, %v1819_v1  ;;  %v7172_v40 = vadd.f32 %v6789_v56, %v7082_v30  ;;  %v2143_v59 = vmax.f32 %v1983_v23, 0.0  ;;  %v8052_v1 = vld [vmem:[#allocation27_spill] sm:$0xff] }
 0x23b   : > { %8049 = vst [vmem:[#allocation28_spill] sm:$0xff] %v7156_v50  ;;  %v1984_v16 = vadd.f32 %v6789_v56, %v1817_v8  ;;  %5265 = vmatprep.mubr.bf16.mxu0 %v7154_v61  ;;  %5358 = vmatmul.mubr.bf16.vlgmr.msra.gmra.mrb[0].mxu1 %v7156_v50  ;;  %v3745_v33 = vrot.slane %v7131_v36, 1  ;;  %v3743_v9 = vrot.slane %v2260_v48, 1  ;;  %v8051_v25 = vmax.f32 %v6837_v7, 0.0  ;;  %v7190_v7 = vld [vmem:[%s7895_s4 + $0x20] sm:$0xff]  }
 0x23c   : > { %v2146_v18 = vmax.f32 %v1986_v52, 0.0  ;;  %5274 = vmatpush3.bf16.msra.mxu0 %v7128_v39  ;;  %5366 = vmatpush3.bf16.msra.mxu1 %v8052_v1  ;;  %v3742_v30 = vrot.slane %v2259_v22, 1  ;;  %v2110_v23 = vmax.f32 %v7116_v37, 0.0  ;;  %v8053_v8 = vmax.f32 %v6857_v49, 0.0  ;;  %v7195_v22 = vld [vmem:[%s7895_s4 + $0x150] sm:$0xff]   ;;  %v8055_v49 = vld [vmem:[#allocation18_spill] sm:$0xff] }
 0x23d   : > { %v2225_v35 = vmax.f32 %v8051_v25, %v2145_v19  ;;  %v2144_v5 = vmax.f32 %v1984_v16, 0.0  ;;  %5275 = vmatprep.subr.bf16.mxu0 %v7161_v11  ;;  %5367 = vmatprep.subr.bf16.mxu1 %v7166_v62  ;;  %v7198_v37 = vsel %vm2554_vm0, %v3745_v33, %v3746_v45  ;;  %v8056_v19 = vmax.f32 %v6901_v15, 0.0  ;;  %v1642_v16 = vpop.f32.mrb[157].mxu0  ;;  %v8057_v1 = vld [vmem:[#allocation19_spill] sm:$0xff]  ;;  %v8059_v15 = vld [vmem:[#allocation20_spill] sm:$0xff] }
 0x23e   : > { %v2223_v54 = vmax.f32 %v8053_v8, %v2143_v59  ;;  %8054 = vst [vmem:[#allocation31_spill] sm:$0xff] %v7198_v37  ;;  %v1822_v59 = vmul.f32 %v6782_v58, %v5243_v47  ;;  %v7205_v25 = vsel %vm2554_vm0, %v3742_v30, %v3743_v9  ;;  %v8058_v50 = vmax.f32 %v6945_v31, 0.0  ;;  %v5244_v33 = vpop.f32.mrb[158].mxu0 }
 0x23f   : > { %v2265_v48 = vmax.f32 %v8055_v49, %v2225_v35  ;;  %v2226_v52 = vmax.f32 %v8056_v19, %v2146_v18  ;;  %v1820_v28 = vmul.f32 %v6782_v58, %v1642_v16  ;;  %v7213_v45 = vpack.c.bf16 %v7198_v37, %v7205_v25  ;;  %v1645_v9 = vpop.f32.mrb[159].mxu0  ;;  %v7502_v37 = vld [vmem:[%s7895_s4 + $0xe0] sm:$0xff]  }
 0x240   : > { %v2263_v8 = vmax.f32 %v8057_v1, %v2223_v54  ;;  %v2224_v17 = vmax.f32 %v8058_v50, %v2144_v5  ;;  %v1989_v47 = vadd.f32 %v6789_v56, %v1822_v59  ;;  %v1823_v18 = vmul.f32 %v6782_v58, %v5244_v33  ;;  %5276 = vmatpush3.bf16.msra.mxu0 %v7161_v11  ;;  %v8060_v5 = vld [vmem:[#allocation21_spill] sm:$0xff]  ;;  %v7231_v1 = vld [vmem:[%s7895_s4 + $0x28] sm:$0xff]  }
 0x241   : > { %v2266_v35 = vmax.f32 %v8059_v15, %v2226_v52  ;;  %5368 = vmatpush3.bf16.msra.mxu1 %v7166_v62  ;;  %v3751_v31 = vrot.slane %v2265_v48, 1  ;;  %v1987_v30 = vadd.f32 %v6789_v56, %v1820_v28  ;;  %v1821_v54 = vmul.f32 %v6782_v58, %v1645_v9  ;;  %5277 = vmatprep.subr.bf16.mxu0 %v7190_v7  ;;  %v7240_v15 = vld [vmem:[%s7895_s4 + $0x158] sm:$0xff]   ;;  %v7418_v9 = vld [vmem:[%s7895_s4 + $0x1a0] sm:$0xff]  }
 0x242   : > { %v2264_v50 = vmax.f32 %v8060_v5, %v2224_v17  ;;  %5369 = vmatprep.subr.bf16.mxu1 %v7195_v22  ;;  %v3748_v49 = vrot.slane %v2263_v8, 1  ;;  %v2149_v52 = vmax.f32 %v1989_v47, 0.0  ;;  %v1990_v59 = vadd.f32 %v6789_v56, %v1823_v18  ;;  %8074 = vst [vmem:[#allocation9_spill] sm:$0xff] %v7418_v9 }
 0x243   : > { %v3752_v19 = vrot.slane %v2266_v35, 1  ;;  %v7226_v16 = vpack.c.bf16 %v2265_v48, %v2263_v8  ;;  %v2147_v28 = vmax.f32 %v1987_v30, 0.0  ;;  %v1988_v58 = vadd.f32 %v6789_v56, %v1821_v54  ;;  %v8065_v54 = vld [vmem:[#allocation22_spill] sm:$0xff] }
 0x244   : > { %v3749_v17 = vrot.slane %v2264_v50, 1  ;;  %v7235_v33 = vpack.c.bf16 %v2263_v8, %v7131_v36  ;;  %v8061_v35 = vmax.f32 %v7044_v4, 0.0  ;;  %v2150_v18 = vmax.f32 %v1990_v59, 0.0  ;;  %5278 = vmatpush3.bf16.msra.mxu0 %v7190_v7  ;;  %v7259_v4 = vld [vmem:[%s7895_s4 + $0x160] sm:$0xff]  }
 0x245   : > { %5266 = vmatmul.mubr.bf16.gmra.mrb[164].mxu0 %v7226_v16  ;;  %5370 = vmatpush3.bf16.msra.mxu1 %v7195_v22  ;;  %v7249_v56 = vsel %vm2554_vm0, %v3751_v31, %v3752_v19  ;;  %v2108_v36 = vmax.f32 %v7172_v40, 0.0  ;;  %v8063_v8 = vmax.f32 %v7067_v10, 0.0  ;;  %v2148_v50 = vmax.f32 %v1988_v58, 0.0  ;;  %v7271_v10 = vld [vmem:[%s7895_s4 + $0x30] sm:$0xff]   ;;  %v8068_v58 = vld [vmem:[#allocation25_spill] sm:$0xff] }
 0x246   : > { %v2229_v47 = vmax.f32 %v8061_v35, %v2149_v52  ;;  %8062 = vst [vmem:[#allocation32_spill] sm:$0xff] %v7249_v56  ;;  %5361 = vmatprep.mubr.bf16.mxu1 %v7235_v33  ;;  %v7262_v30 = vsel %vm2554_vm0, %v3748_v49, %v3749_v17  ;;  %v2230_v31 = vmax.f32 %v2110_v23, %v2150_v18  ;;  %v8066_v49 = vld [vmem:[#allocation23_spill] sm:$0xff]  ;;  %v8067_v17 = vld [vmem:[#allocation24_spill] sm:$0xff] }
 0x247   : > { %v2227_v5 = vmax.f32 %v8063_v8, %v2147_v28  ;;  %v8064_v40 = vpack.c.bf16 %v6823_v12, %v6834_v44  ;;  %5279 = vmatprep.subr.bf16.mxu0 %v7231_v1  ;;  %v7276_v52 = vpack.c.bf16 %v7249_v56, %v7262_v30  ;;  %v2228_v23 = vmax.f32 %v2108_v36, %v2148_v50  ;;  %v7292_v18 = vld [vmem:[%s7895_s4 + $0x168] sm:$0xff]   ;;  %v7412_v44 = vld [vmem:[%s7895_s4 + $0xb0] sm:$0xff]  }
 0x248   : > { %v2269_v19 = vmax.f32 %v8065_v54, %v2229_v47  ;;  %5371 = vmatprep.subr.bf16.mxu1 %v7240_v15  ;;  %v2270_v28 = vmax.f32 %v8067_v17, %v2230_v31  ;;  %5280 = vmatpush3.bf16.msra.mxu0 %v7231_v1  ;;  %v7313_v54 = vld [vmem:[%s7895_s4 + $0x170] sm:$0xff]   ;;  %v7335_v17 = vld [vmem:[%s7895_s4 + $0x88] sm:$0xff]  }
 0x249   : > { %5285 = vmatprep.mubr.bf16.mxu0 %v8064_v40  ;;  %v2267_v59 = vmax.f32 %v8066_v49, %v2227_v5  ;;  %5372 = vmatpush3.bf16.msra.mxu1 %v7240_v15  ;;  %v2268_v35 = vmax.f32 %v8068_v58, %v2228_v23  ;;  %v7300_v5 = vld [vmem:[%s7895_s4 + $0x38] sm:$0xff]   ;;  %v7322_v49 = vld [vmem:[%s7895_s4 + $0x80] sm:$0xff]   ;;  %v7396_v23 = vld [vmem:[%s7895_s4 + $0xa8] sm:$0xff]  }
 0x24a   : > { %5373 = vmatprep.subr.bf16.mxu1 %v7259_v4  ;;  %v4217_v8 = vrot.slane %v2270_v28, 1  ;;  %5281 = vmatprep.subr.bf16.mxu0 %v7271_v10  ;;  %v4216_v50 = vrot.slane %v2269_v19, 1  ;;  %v7340_v28 = vld [vmem:[%s7895_s4 + $0x178] sm:$0xff]   ;;  %v7349_v58 = vld [vmem:[%s7895_s4 + $0x180] sm:$0xff]   ;;  %v7446_v56 = vld [vmem:[%s7895_s4 + $0x1b0] sm:$0xff]  }
 0x24b   : > { %v7287_v47 = vpack.c.bf16 %v2267_v59, %v2265_v48  ;;  %v7294_v36 = vpack.c.bf16 %v2269_v19, %v2267_v59  ;;  %v3988_v31 = vrot.slane %v2268_v35, 1  ;;  %v3987_v48 = vrot.slane %v2267_v59, 1  ;;  %v7356_v35 = vld [vmem:[%s7895_s4 + $0x90] sm:$0xff]   ;;  %v7403_v59 = vld [vmem:[%s7895_s4 + $0x198] sm:$0xff]   ;;  %8076 = vst [vmem:[#allocation35_spill] sm:$0xff] %v7446_v56 }
 0x24c   : > { %v7306_v40 = vsel %vm2554_vm0, %v4216_v50, %v4217_v8  ;;  %5282 = vmatpush3.bf16.msra.mxu0 %v7271_v10  ;;  %v7365_v8 = vld [vmem:[%s7895_s4 + $0x98] sm:$0xff]   ;;  %v7371_v50 = vld [vmem:[%s7895_s4 + $0x188] sm:$0xff]   ;;  %8073 = vst [vmem:[#allocation8_spill] sm:$0xff] %v7403_v59 }
 0x24d   : > { %5362 = vmatmul.mubr.bf16.gmra.mrb[4].mxu1 %v7287_v47  ;;  %8069 = vst [vmem:[#allocation6_spill] sm:$0xff] %v7306_v40  ;;  %v7316_v19 = vsel %vm2554_vm0, %v3987_v48, %v3988_v31  ;;  %5283 = vmatprep.subr.bf16.mxu0 %v7300_v5  ;;  %8071 = vst [vmem:[#allocation34_spill] sm:$0xff] %v7371_v50  ;;  %v7382_v31 = vld [vmem:[%s7895_s4 + $0xa0] sm:$0xff]   ;;  %v7388_v48 = vld [vmem:[%s7895_s4 + $0x190] sm:$0xff]  }
 0x24e   : > { %5374 = vmatpush3.bf16.msra.mxu1 %v7259_v4  ;;  %5381 = vmatprep.mubr.bf16.mxu1 %v6920_v43  ;;  %8070 = vst [vmem:[#allocation33_spill] sm:$0xff] %v7316_v19  ;;  %8072 = vst [vmem:[#allocation7_spill] sm:$0xff] %v7388_v48  ;;  %v7432_v40 = vld [vmem:[%s7895_s4 + $0x1a8] sm:$0xff]   ;;  %v7460_v19 = vld [vmem:[%s7895_s4 + $0x1b8] sm:$0xff]  }
 0x24f   : > { %5375 = vmatprep.subr.bf16.mxu1 %v7292_v18  ;;  %8075 = vst [vmem:[#allocation29_spill] sm:$0xff] %v7432_v40  ;;  %8077 = vst [vmem:[#allocation36_spill] sm:$0xff] %v7460_v19 }
 0x250   : > { %5284 = vmatpush3.bf16.msra.mxu0 %v7300_v5 }
 0x251   : > { %5293 = vmatprep.subr.bf16.mxu0 %v7322_v49 }
 0x252   : > { %5376 = vmatpush3.bf16.msra.mxu1 %v7292_v18 }
 0x253   : > { %5377 = vmatprep.subr.bf16.mxu1 %v7313_v54  ;;  %5286 = vmatmul.mubr.bf16.vlgmr.msra.gmra.mrb[160].mxu0 %v6886_v26 }
 0x254   : > { %5289 = vmatprep.mubr.bf16.mxu0 %v6936_v3  ;;  %5294 = vmatpush3.bf16.msra.mxu0 %v7322_v49 }
 0x255   : > { %5295 = vmatprep.subr.bf16.mxu0 %v7335_v17 }
 0x256   : > { %5378 = vmatpush3.bf16.msra.mxu1 %v7313_v54 }
 0x257   : > { %5379 = vmatprep.subr.bf16.mxu1 %v7340_v28 }
 0x258   : > { %5296 = vmatpush3.bf16.msra.mxu0 %v7335_v17 }
 0x259   : > { %5297 = vmatprep.subr.bf16.mxu0 %v7356_v35 }
 0x25a   : > { %5380 = vmatpush3.bf16.msra.mxu1 %v7340_v28 }
 0x25b   : > { %5389 = vmatprep.subr.bf16.mxu1 %v7349_v58  ;;  %5290 = vmatmul.mubr.bf16.gmra.mrb[164].mxu0 %v6974_v27 }
 0x25c   : > { %5298 = vmatpush3.bf16.msra.mxu0 %v7356_v35  ;;  %5309 = vmatprep.mubr.bf16.mxu0 %v6868_v6 }
 0x25d   : > { %5382 = vmatmul.mubr.bf16.vlgmr.msra.gmra.mrb[0].mxu1 %v6960_v42  ;;  %5299 = vmatprep.subr.bf16.mxu0 %v7365_v8 }
 0x25e   : > { %5385 = vmatprep.mubr.bf16.mxu1 %v7003_v29  ;;  %5390 = vmatpush3.bf16.msra.mxu1 %v7349_v58 }
 0x25f   : > { %5391 = vmatprep.subr.bf16.mxu1 %v7371_v50 }
 0x260   : > { %5300 = vmatpush3.bf16.msra.mxu0 %v7365_v8 }
 0x261   : > { %5301 = vmatprep.subr.bf16.mxu0 %v7382_v31 }
 0x262   : > { %5392 = vmatpush3.bf16.msra.mxu1 %v7371_v50  ;;  %v7491_v50 = vld [vmem:[%s7895_s4 + $0x1c8] sm:$0xff]  }
 0x263   : > { %5393 = vmatprep.subr.bf16.mxu1 %v7388_v48  ;;  %8079 = vst [vmem:[#allocation37_spill] sm:$0xff] %v7491_v50 }
 0x264   : > { %5302 = vmatpush3.bf16.msra.mxu0 %v7382_v31 }
 0x265   : > { %5386 = vmatmul.mubr.bf16.gmra.mrb[4].mxu1 %v7035_v38  ;;  %5303 = vmatprep.subr.bf16.mxu0 %v7396_v23 }
 0x266   : > { %5405 = vmatprep.mubr.bf16.mxu1 %v6886_v26  ;;  %5394 = vmatpush3.bf16.msra.mxu1 %v7388_v48  ;;  %v7426_v26 = vld [vmem:[%s7895_s4 + $0xb8] sm:$0xff]   ;;  %v7476_v48 = vld [vmem:[%s7895_s4 + $0x1c0] sm:$0xff]  }
 0x267   : > { %5395 = vmatprep.subr.bf16.mxu1 %v7403_v59  ;;  %8078 = vst [vmem:[#allocation10_spill] sm:$0xff] %v7476_v48 }
 0x268   : > { %5304 = vmatpush3.bf16.msra.mxu0 %v7396_v23 }
 0x269   : > { %5305 = vmatprep.subr.bf16.mxu0 %v7412_v44 }
 0x26a   : > { %5396 = vmatpush3.bf16.msra.mxu1 %v7403_v59  ;;  %v7440_v59 = vld [vmem:[%s7895_s4 + $0xc0] sm:$0xff]  }
 0x26b   : > { %5397 = vmatprep.subr.bf16.mxu1 %v7418_v9 }
 0x26c   : > { %5306 = vmatpush3.bf16.msra.mxu0 %v7412_v44 }
 0x26d   : > { %5307 = vmatprep.subr.bf16.mxu0 %v7426_v26 }
 0x26e   : > { %5398 = vmatpush3.bf16.msra.mxu1 %v7418_v9  ;;  %v7454_v9 = vld [vmem:[%s7895_s4 + $0xc8] sm:$0xff]  }
 0x26f   : > { %5399 = vmatprep.subr.bf16.mxu1 %v7432_v40 }
 0x270   : > { %5308 = vmatpush3.bf16.msra.mxu0 %v7426_v26 }
 0x271   : > { %5317 = vmatprep.subr.bf16.mxu0 %v7440_v59 }
 0x272   : > { %5400 = vmatpush3.bf16.msra.mxu1 %v7432_v40  ;;  %v7470_v40 = vld [vmem:[%s7895_s4 + $0xd0] sm:$0xff]  }
 0x273   : > { %5401 = vmatprep.subr.bf16.mxu1 %v7446_v56  ;;  %5310 = vmatmul.mubr.bf16.vlgmr.msra.gmra.mrb[160].mxu0 %v6912_v51 }
 0x274   : > { %5313 = vmatprep.mubr.bf16.mxu0 %v6962_v14  ;;  %5318 = vmatpush3.bf16.msra.mxu0 %v7440_v59 }
 0x275   : > { %5319 = vmatprep.subr.bf16.mxu0 %v7454_v9 }
 0x276   : > { %5402 = vmatpush3.bf16.msra.mxu1 %v7446_v56  ;;  %v7485_v56 = vld [vmem:[%s7895_s4 + $0xd8] sm:$0xff]  }
 0x277   : > { %5403 = vmatprep.subr.bf16.mxu1 %v7460_v19 }
 0x278   : > { %5320 = vmatpush3.bf16.msra.mxu0 %v7454_v9 }
 0x279   : > { %5321 = vmatprep.subr.bf16.mxu0 %v7470_v40 }
 0x27a   : > { %5404 = vmatpush3.bf16.msra.mxu1 %v7460_v19  ;;  %v8080_v19 = vpack.c.bf16 %v6875_v63, %v6823_v12  ;;  %v7517_v12 = vld [vmem:[%s7895_s4 + $0xe8] sm:$0xff]   ;;  %v7524_v63 = vld [vmem:[%s7895_s4 + $0x1d8] sm:$0xff]  }
 0x27b   : > { %5413 = vmatprep.subr.bf16.mxu1 %v7476_v48  ;;  %5314 = vmatmul.mubr.bf16.gmra.mrb[164].mxu0 %v7008_v21  ;;  %8082 = vst [vmem:[#allocation11_spill] sm:$0xff] %v7524_v63 }
 0x27c   : > { %5322 = vmatpush3.bf16.msra.mxu0 %v7470_v40  ;;  %5333 = vmatprep.mubr.bf16.mxu0 %v8080_v19  ;;  %v7535_v19 = vld [vmem:[%s7895_s4 + $0xf0] sm:$0xff]  }
 0x27d   : > { %5406 = vmatmul.mubr.bf16.vlgmr.msra.gmra.mrb[0].mxu1 %v6936_v3  ;;  %5323 = vmatprep.subr.bf16.mxu0 %v7485_v56  ;;  %v7510_v3 = vld [vmem:[%s7895_s4 + $0x1d0] sm:$0xff]  }
 0x27e   : > { %5409 = vmatprep.mubr.bf16.mxu1 %v6974_v27  ;;  %5414 = vmatpush3.bf16.msra.mxu1 %v7476_v48  ;;  %8081 = vst [vmem:[#allocation30_spill] sm:$0xff] %v7510_v3  ;;  %v8083_v27 = vpack.c.bf16 %v6995_v53, %v6998_v41  ;;  %v7542_v53 = vld [vmem:[%s7895_s4 + $0x1e0] sm:$0xff]   ;;  %v8086_v48 = vpack.c.bf16 %v6957_v34, %v6907_v0  ;;  %v7596_v0 = vld [vmem:[%s7895_s4 + $0x208] sm:$0xff]   ;;  %v7612_v34 = vld [vmem:[%s7895_s4 + $0x218] sm:$0xff]  }
 0x27f   : > { %5415 = vmatprep.subr.bf16.mxu1 %v7491_v50  ;;  %8084 = vst [vmem:[#allocation12_spill] sm:$0xff] %v7542_v53 }
 0x280   : > { %5324 = vmatpush3.bf16.msra.mxu0 %v7485_v56 }
 0x281   : > { %5325 = vmatprep.subr.bf16.mxu0 %v7502_v37 }
 0x282   : > { %5416 = vmatpush3.bf16.msra.mxu1 %v7491_v50  ;;  %v7565_v50 = vld [vmem:[%s7895_s4 + $0x1f0] sm:$0xff]  }
 0x283   : > { %5417 = vmatprep.subr.bf16.mxu1 %v7510_v3 }
 0x284   : > { %5326 = vmatpush3.bf16.msra.mxu0 %v7502_v37 }
 0x285   : > { %5410 = vmatmul.mubr.bf16.gmra.mrb[4].mxu1 %v8083_v27  ;;  %5327 = vmatprep.subr.bf16.mxu0 %v7517_v12  ;;  %v7549_v27 = vld [vmem:[%s7895_s4 + $0xf8] sm:$0xff]  }
 0x286   : > { %5429 = vmatprep.mubr.bf16.mxu1 %v7092_v46  ;;  %5418 = vmatpush3.bf16.msra.mxu1 %v7510_v3  ;;  %v7556_v3 = vld [vmem:[%s7895_s4 + $0x1e8] sm:$0xff]  }
 0x287   : > { %5419 = vmatprep.subr.bf16.mxu1 %v7524_v63 }
 0x288   : > { %5328 = vmatpush3.bf16.msra.mxu0 %v7517_v12 }
 0x289   : > { %5329 = vmatprep.subr.bf16.mxu0 %v7535_v19 }
 0x28a   : > { %5420 = vmatpush3.bf16.msra.mxu1 %v7524_v63  ;;  %v8085_v63 = vpack.c.bf16 %v6915_v2, %v6863_v13  ;;  %v7586_v13 = vld [vmem:[%s7895_s4 + $0x200] sm:$0xff]   ;;  %v8087_v2 = vpack.c.bf16 %v6998_v41, %v6951_v24  ;;  %v7605_v24 = vld [vmem:[%s7895_s4 + $0x210] sm:$0xff]  }
 0x28b   : > { %5421 = vmatprep.subr.bf16.mxu1 %v7542_v53  ;;  %v7621_v41 = vld [vmem:[%s7895_s4 + $0x220] sm:$0xff]  }
 0x28c   : > { %5330 = vmatpush3.bf16.msra.mxu0 %v7535_v19  ;;  %8088 = vst [vmem:[#allocation13_spill] sm:$0xff] %v7621_v41 }
 0x28d   : > { %5331 = vmatprep.subr.bf16.mxu0 %v7549_v27 }
 0x28e   : > { %5422 = vmatpush3.bf16.msra.mxu1 %v7542_v53  ;;  %v7576_v53 = vld [vmem:[%s7895_s4 + $0x1f8] sm:$0xff]  }
 0x28f   : > { %5423 = vmatprep.subr.bf16.mxu1 %v7556_v3 }
 0x290   : > { %5332 = vmatpush3.bf16.msra.mxu0 %v7549_v27 }
 0x292   : > { %5424 = vmatpush3.bf16.msra.mxu1 %v7556_v3 }
 0x293   : > { %5334 = vmatmul.mubr.bf16.vlgmr.msra.gmra.mrb[160].mxu0 %v8085_v63  ;;  %5425 = vmatprep.subr.bf16.mxu1 %v7565_v50  ;;  %v7635_v63 = vld [vmem:[%s7895_s4 + $0x230] sm:$0xff]  }
 0x294   : > { %5337 = vmatprep.mubr.bf16.mxu0 %v8086_v48  ;;  %v7628_v48 = vld [vmem:[%s7895_s4 + $0x228] sm:$0xff]   ;;  %8090 = vst [vmem:[#allocation26_spill] sm:$0xff] %v7635_v63 }
 0x295   : > { %8089 = vst [vmem:[#allocation38_spill] sm:$0xff] %v7628_v48 }
 0x296   : > { %5426 = vmatpush3.bf16.msra.mxu1 %v7565_v50 }
 0x297   : > { %5427 = vmatprep.subr.bf16.mxu1 %v7576_v53 }
 0x29a   : > { %5428 = vmatpush3.bf16.msra.mxu1 %v7576_v53 }
 0x29b   : > { %5338 = vmatmul.mubr.bf16.gmra.mrb[164].mxu0 %v8087_v2  ;;  %5437 = vmatprep.subr.bf16.mxu1 %v7586_v13  ;;  %v7642_v2 = vld [vmem:[%s7895_s4 + $0x238] sm:$0xff]  }
 0x29c   : > { %8091 = vst [vmem:[#allocation14_spill] sm:$0xff] %v7642_v2 }
 0x29d   : > { %5430 = vmatmul.mubr.bf16.vlgmr.msra.gmra.mrb[0].mxu1 %v7154_v61 }
 0x29e   : > { %5433 = vmatprep.mubr.bf16.mxu1 %v7226_v16  ;;  %5438 = vmatpush3.bf16.msra.mxu1 %v7586_v13 }
 0x29f   : > { %5439 = vmatprep.subr.bf16.mxu1 %v7596_v0 }
 0x2a2   : > { %5440 = vmatpush3.bf16.msra.mxu1 %v7596_v0 }
 0x2a3   : > { %5441 = vmatprep.subr.bf16.mxu1 %v7605_v24 }
 0x2a5   : > { %5434 = vmatmul.mubr.bf16.gmra.mrb[4].mxu1 %v7294_v36 }
 0x2a6   : > { %5442 = vmatpush3.bf16.msra.mxu1 %v7605_v24  ;;  %5453 = vmatprep.mubr.bf16.mxu1 %v6912_v51 }
 0x2a7   : > { %5443 = vmatprep.subr.bf16.mxu1 %v7612_v34 }
 0x2aa   : > { %5444 = vmatpush3.bf16.msra.mxu1 %v7612_v34 }
 0x2ab   : > { %5445 = vmatprep.subr.bf16.mxu1 %v7621_v41 }
 0x2ae   : > { %5446 = vmatpush3.bf16.msra.mxu1 %v7621_v41  ;;  %v5976_v41 = vld [vmem:[%s7895_s4 + $0x40] sm:$0xff]  }
 0x2af   : > { %5447 = vmatprep.subr.bf16.mxu1 %v7628_v48 }
 0x2b2   : > { %5448 = vmatpush3.bf16.msra.mxu1 %v7628_v48  ;;  %v5977_v48 = vld [vmem:[%s7895_s4 + $0x48] sm:$0xff]  }
 0x2b3   : > { %5449 = vmatprep.subr.bf16.mxu1 %v7635_v63 }
 0x2b6   : > { %5450 = vmatpush3.bf16.msra.mxu1 %v7635_v63  ;;  %v5981_v63 = vld [vmem:[%s7895_s4 + $0x68] sm:$0xff]  }
 0x2b7   : > { %5451 = vmatprep.subr.bf16.mxu1 %v7642_v2 }
 0x2ba   : > { %5452 = vmatpush3.bf16.msra.mxu1 %v7642_v2  ;;  %v5978_v2 = vld [vmem:[%s7895_s4 + $0x50] sm:$0xff]  }
 0x2bb   : > { %5461 = vmatprep.subr.bf16.mxu1 %v5976_v41 }
 0x2bd   : > { %5454 = vmatmul.mubr.bf16.vlgmr.msra.gmra.mrb[0].mxu1 %v6962_v14 }
 0x2be   : > { %5457 = vmatprep.mubr.bf16.mxu1 %v7008_v21  ;;  %5462 = vmatpush3.bf16.msra.mxu1 %v5976_v41  ;;  %v5979_v41 = vld [vmem:[%s7895_s4 + $0x58] sm:$0xff]  }
 0x2bf   : > { %5463 = vmatprep.subr.bf16.mxu1 %v5977_v48 }
 0x2c2   : > { %5464 = vmatpush3.bf16.msra.mxu1 %v5977_v48  ;;  %v5980_v48 = vld [vmem:[%s7895_s4 + $0x60] sm:$0xff]  }
 0x2c3   : > { %5465 = vmatprep.subr.bf16.mxu1 %v5978_v2 }
 0x2c5   : > { %5458 = vmatmul.mubr.bf16.gmra.mrb[4].mxu1 %v7041_v32 }
 0x2c6   : > { %5466 = vmatpush3.bf16.msra.mxu1 %v5978_v2  ;;  %5477 = vmatprep.mubr.bf16.mxu1 %v6868_v6  ;;  %v5982_v6 = vld [vmem:[%s7895_s4 + $0x70] sm:$0xff]   ;;  %v5983_v2 = vld [vmem:[%s7895_s4 + $0x78] sm:$0xff]  }
 0x2c7   : > { %5467 = vmatprep.subr.bf16.mxu1 %v5979_v41 }
 0x2ca   : > { %5468 = vmatpush3.bf16.msra.mxu1 %v5979_v41  ;;  %v5984_v41 = vld [vmem:[%s7895_s4] sm:$0xff]  }
 0x2cb   : > { %5469 = vmatprep.subr.bf16.mxu1 %v5980_v48 }
 0x2ce   : > { %5470 = vmatpush3.bf16.msra.mxu1 %v5980_v48  ;;  %v8111_v48 = vld [vmem:[#allocation36_spill] sm:$0xff] }
 0x2cf   : > { %5471 = vmatprep.subr.bf16.mxu1 %v5981_v63 }
 0x2d2   : > { %5472 = vmatpush3.bf16.msra.mxu1 %v5981_v63 }
 0x2d3   : > { %5473 = vmatprep.subr.bf16.mxu1 %v5982_v6 }
 0x2d6   : > { %5474 = vmatpush3.bf16.msra.mxu1 %v5982_v6 }
 0x2d7   : > { %5475 = vmatprep.subr.bf16.mxu1 %v5983_v2 }
 0x2da   : > { %5476 = vmatpush3.bf16.msra.mxu1 %v5983_v2 }
 0x2db   : > { %5485 = vmatprep.subr.bf16.mxu1 %v5984_v41 }
 0x2dd   : > { %5478 = vmatmul.mubr.bf16.vlgmr.msra.gmra.mrb[8].mxu1 %v6912_v51 }
 0x2de   : > { %5481 = vmatprep.mubr.bf16.mxu1 %v6962_v14  ;;  %5486 = vmatpush3.bf16.msra.mxu1 %v5984_v41 }
 0x2df   : > { %5487 = vmatprep.subr.bf16.mxu1 %v7099_v57 }
 0x2e2   : > { %5488 = vmatpush3.bf16.msra.mxu1 %v7099_v57 }
 0x2e3   : > { %5489 = vmatprep.subr.bf16.mxu1 %v7128_v39 }
 0x2e5   : > { %5482 = vmatmul.mubr.bf16.gmra.mrb[12].mxu1 %v7008_v21 }
 0x2e6   : > { %5490 = vmatpush3.bf16.msra.mxu1 %v7128_v39  ;;  %5501 = vmatprep.mubr.bf16.mxu1 %v7053_v55  ;;  %v8092_v55 = vld [vmem:[#allocation2_spill] sm:$0xff]  ;;  %v8094_v39 = vld [vmem:[#allocation5_spill] sm:$0xff] }
 0x2e7   : > { %5491 = vmatprep.subr.bf16.mxu1 %v7161_v11  ;;  %v8093_v57 = vpack.c.bf16 %v7064_v60, %v8092_v55 }
 0x2ea   : > { %5492 = vmatpush3.bf16.msra.mxu1 %v7161_v11  ;;  %v8095_v11 = vld [vmem:[#allocation3_spill] sm:$0xff] }
 0x2eb   : > { %5493 = vmatprep.subr.bf16.mxu1 %v7190_v7 }
 0x2ee   : > { %5494 = vmatpush3.bf16.msra.mxu1 %v7190_v7  ;;  %v5985_v7 = vld [vmem:[%s7895_s4 + $0x100] sm:$0xff]  }
 0x2ef   : > { %5495 = vmatprep.subr.bf16.mxu1 %v7231_v1 }
 0x2f2   : > { %5496 = vmatpush3.bf16.msra.mxu1 %v7231_v1  ;;  %v8096_v1 = vld [vmem:[#allocation28_spill] sm:$0xff] }
 0x2f3   : > { %5497 = vmatprep.subr.bf16.mxu1 %v7271_v10 }
 0x2f6   : > { %5498 = vmatpush3.bf16.msra.mxu1 %v7271_v10  ;;  %v5990_v10 = vld [vmem:[%s7895_s4 + $0x128] sm:$0xff]  }
 0x2f7   : > { %5499 = vmatprep.subr.bf16.mxu1 %v7300_v5 }
 0x2fa   : > { %5500 = vmatpush3.bf16.msra.mxu1 %v7300_v5  ;;  %v8097_v5 = vld [vmem:[#allocation4_spill] sm:$0xff] }
 0x2fb   : > { %5509 = vmatprep.subr.bf16.mxu1 %v7322_v49 }
 0x2fd   : > { %5502 = vmatmul.mubr.bf16.vlgmr.msra.gmra.mrb[8].mxu1 %v7092_v46 }
 0x2fe   : > { %5505 = vmatprep.mubr.bf16.mxu1 %v7154_v61  ;;  %5510 = vmatpush3.bf16.msra.mxu1 %v7322_v49 }
 0x2ff   : > { %5511 = vmatprep.subr.bf16.mxu1 %v7335_v17 }
 0x302   : > { %5512 = vmatpush3.bf16.msra.mxu1 %v7335_v17  ;;  %v8104_v17 = vld [vmem:[#allocation33_spill] sm:$0xff] }
 0x303   : > { %5513 = vmatprep.subr.bf16.mxu1 %v7356_v35 }
 0x305   : > { %5506 = vmatmul.mubr.bf16.gmra.mrb[12].mxu1 %v7226_v16 }
 0x306   : > { %5514 = vmatpush3.bf16.msra.mxu1 %v7356_v35  ;;  %5525 = vmatprep.mubr.bf16.mxu1 %v8093_v57 }
 0x307   : > { %5515 = vmatprep.subr.bf16.mxu1 %v7365_v8 }
 0x30a   : > { %5516 = vmatpush3.bf16.msra.mxu1 %v7365_v8 }
 0x30b   : > { %5517 = vmatprep.subr.bf16.mxu1 %v7382_v31 }
 0x30e   : > { %5518 = vmatpush3.bf16.msra.mxu1 %v7382_v31 }
 0x30f   : > { %5519 = vmatprep.subr.bf16.mxu1 %v7396_v23 }
 0x312   : > { %5520 = vmatpush3.bf16.msra.mxu1 %v7396_v23 }
 0x313   : > { %5521 = vmatprep.subr.bf16.mxu1 %v7412_v44 }
 0x316   : > { %5522 = vmatpush3.bf16.msra.mxu1 %v7412_v44  ;;  %v5992_v44 = vld [vmem:[%s7895_s4 + $0x138] sm:$0xff]  }
 0x317   : > { %5523 = vmatprep.subr.bf16.mxu1 %v7426_v26 }
 0x31a   : > { %5524 = vmatpush3.bf16.msra.mxu1 %v7426_v26 }
 0x31b   : > { %5533 = vmatprep.subr.bf16.mxu1 %v7440_v59 }
 0x31d   : > { %5526 = vmatmul.mubr.bf16.vlgmr.msra.gmra.mrb[8].mxu1 %v8094_v39 }
 0x31e   : > { %5529 = vmatprep.mubr.bf16.mxu1 %v7213_v45  ;;  %5534 = vmatpush3.bf16.msra.mxu1 %v7440_v59 }
 0x31f   : > { %5535 = vmatprep.subr.bf16.mxu1 %v7454_v9 }
 0x322   : > { %5536 = vmatpush3.bf16.msra.mxu1 %v7454_v9  ;;  %v5987_v9 = vld [vmem:[%s7895_s4 + $0x110] sm:$0xff]  }
 0x323   : > { %5537 = vmatprep.subr.bf16.mxu1 %v7470_v40 }
 0x325   : > { %5530 = vmatmul.mubr.bf16.gmra.mrb[12].mxu1 %v7276_v52 }
 0x326   : > { %5538 = vmatpush3.bf16.msra.mxu1 %v7470_v40  ;;  %5549 = vmatprep.mubr.bf16.mxu1 %v8095_v11  ;;  %v8098_v40 = vpack.c.bf16 %v8097_v5, %v7064_v60  ;;  %v8099_v60 = vpack.c.bf16 %v7205_v25, %v7108_v20  ;;  %v8107_v20 = vld [vmem:[#allocation8_spill] sm:$0xff]  ;;  %v8108_v25 = vld [vmem:[#allocation9_spill] sm:$0xff] }
 0x327   : > { %5539 = vmatprep.subr.bf16.mxu1 %v7485_v56 }
 0x32a   : > { %5540 = vmatpush3.bf16.msra.mxu1 %v7485_v56  ;;  %v5989_v56 = vld [vmem:[%s7895_s4 + $0x120] sm:$0xff]  }
 0x32b   : > { %5541 = vmatprep.subr.bf16.mxu1 %v7502_v37 }
 0x32e   : > { %5542 = vmatpush3.bf16.msra.mxu1 %v7502_v37  ;;  %v5986_v37 = vld [vmem:[%s7895_s4 + $0x108] sm:$0xff]  }
 0x32f   : > { %5543 = vmatprep.subr.bf16.mxu1 %v7517_v12 }
 0x332   : > { %5544 = vmatpush3.bf16.msra.mxu1 %v7517_v12 }
 0x333   : > { %5545 = vmatprep.subr.bf16.mxu1 %v7535_v19 }
 0x336   : > { %5546 = vmatpush3.bf16.msra.mxu1 %v7535_v19 }
 0x337   : > { %5547 = vmatprep.subr.bf16.mxu1 %v7549_v27 }
 0x33a   : > { %5548 = vmatpush3.bf16.msra.mxu1 %v7549_v27  ;;  %v8110_v27 = vld [vmem:[#allocation35_spill] sm:$0xff] }
 0x33b   : > { %5557 = vmatprep.subr.bf16.mxu1 %v5985_v7 }
 0x33d   : > { %5550 = vmatmul.mubr.bf16.vlgmr.msra.gmra.mrb[8].mxu1 %v8096_v1  ;;  %v8112_v1 = vld [vmem:[#allocation10_spill] sm:$0xff] }
 0x33e   : > { %5553 = vmatprep.mubr.bf16.mxu1 %v7235_v33  ;;  %5558 = vmatpush3.bf16.msra.mxu1 %v5985_v7  ;;  %v5988_v33 = vld [vmem:[%s7895_s4 + $0x118] sm:$0xff]  }
 0x33f   : > { %5559 = vmatprep.subr.bf16.mxu1 %v5986_v37 }
 0x342   : > { %5560 = vmatpush3.bf16.msra.mxu1 %v5986_v37 }
 0x343   : > { %5561 = vmatprep.subr.bf16.mxu1 %v5987_v9 }
 0x345   : > { %5554 = vmatmul.mubr.bf16.gmra.mrb[12].mxu1 %v7287_v47  ;;  %v5993_v47 = vld [vmem:[%s7895_s4 + $0x140] sm:$0xff]  }
 0x346   : > { %5562 = vmatpush3.bf16.msra.mxu1 %v5987_v9  ;;  %5573 = vmatprep.mubr.bf16.mxu1 %v6920_v43  ;;  %v5991_v43 = vld [vmem:[%s7895_s4 + $0x130] sm:$0xff]   ;;  %v8113_v9 = vld [vmem:[#allocation37_spill] sm:$0xff] }
 0x347   : > { %5563 = vmatprep.subr.bf16.mxu1 %v5988_v33 }
 0x34a   : > { %5564 = vmatpush3.bf16.msra.mxu1 %v5988_v33  ;;  %v8114_v33 = vld [vmem:[#allocation30_spill] sm:$0xff] }
 0x34b   : > { %5565 = vmatprep.subr.bf16.mxu1 %v5989_v56 }
 0x34e   : > { %5566 = vmatpush3.bf16.msra.mxu1 %v5989_v56  ;;  %v8115_v56 = vld [vmem:[#allocation11_spill] sm:$0xff] }
 0x34f   : > { %5567 = vmatprep.subr.bf16.mxu1 %v5990_v10 }
 0x352   : > { %5568 = vmatpush3.bf16.msra.mxu1 %v5990_v10 }
 0x353   : > { %5569 = vmatprep.subr.bf16.mxu1 %v5991_v43 }
 0x356   : > { %5570 = vmatpush3.bf16.msra.mxu1 %v5991_v43 }
 0x357   : > { %5571 = vmatprep.subr.bf16.mxu1 %v5992_v44 }
 0x35a   : > { %5572 = vmatpush3.bf16.msra.mxu1 %v5992_v44 }
 0x35b   : > { %5581 = vmatprep.subr.bf16.mxu1 %v5993_v47 }
 0x35d   : > { %5574 = vmatmul.mubr.bf16.vlgmr.msra.gmra.mrb[8].mxu1 %v6960_v42 }
 0x35e   : > { %5577 = vmatprep.mubr.bf16.mxu1 %v7003_v29  ;;  %5582 = vmatpush3.bf16.msra.mxu1 %v5993_v47 }
 0x35f   : > { %5583 = vmatprep.subr.bf16.mxu1 %v7166_v62 }
 0x362   : > { %5584 = vmatpush3.bf16.msra.mxu1 %v7166_v62 }
 0x363   : > { %5585 = vmatprep.subr.bf16.mxu1 %v7195_v22 }
 0x365   : > { %5578 = vmatmul.mubr.bf16.gmra.mrb[12].mxu1 %v7035_v38 }
 0x366   : > { %5586 = vmatpush3.bf16.msra.mxu1 %v7195_v22  ;;  %5597 = vmatprep.mubr.bf16.mxu1 %v8098_v40  ;;  %v5335_v49 = vpop.f32.mrb[160].mxu0 }
 0x367   : > { %v2832_v59 = vpop.f32.mrb[161].mxu0  ;;  %5587 = vmatprep.subr.bf16.mxu1 %v7240_v15 }
 0x368   : > { %v5336_v42 = vpop.f32.mrb[162].mxu0 }
 0x369   : > { %v2835_v29 = vpop.f32.mrb[163].mxu0 }
 0x36a   : > { %5588 = vmatpush3.bf16.msra.mxu1 %v7240_v15  ;;  %v8100_v15 = vld [vmem:[#allocation31_spill] sm:$0xff] }
 0x36b   : > { %5589 = vmatprep.subr.bf16.mxu1 %v7259_v4 }
 0x36e   : > { %5590 = vmatpush3.bf16.msra.mxu1 %v7259_v4  ;;  %v5339_v62 = vpop.f32.mrb[164].mxu0  ;;  %v8101_v4 = vpack.c.bf16 %v7262_v30, %v8100_v15  ;;  %v8109_v30 = vld [vmem:[#allocation29_spill] sm:$0xff] }
 0x36f   : > { %v2848_v38 = vpop.f32.mrb[165].mxu0  ;;  %5591 = vmatprep.subr.bf16.mxu1 %v7292_v18 }
 0x370   : > { %v5340_v22 = vpop.f32.mrb[166].mxu0 }
 0x371   : > { %v2851_v23 = vpop.f32.mrb[167].mxu0 }
 0x372   : > { %5592 = vmatpush3.bf16.msra.mxu1 %v7292_v18  ;;  %v8102_v18 = vld [vmem:[#allocation34_spill] sm:$0xff] }
 0x373   : > { %5593 = vmatprep.subr.bf16.mxu1 %v7313_v54 }
 0x376   : > { %5594 = vmatpush3.bf16.msra.mxu1 %v7313_v54  ;;  %v8103_v54 = vld [vmem:[#allocation7_spill] sm:$0xff] }
 0x377   : > { %5595 = vmatprep.subr.bf16.mxu1 %v7340_v28 }
 0x37a   : > { %5596 = vmatpush3.bf16.msra.mxu1 %v7340_v28  ;;  %v8105_v28 = vld [vmem:[#allocation32_spill] sm:$0xff] }
 0x37b   : > { %5605 = vmatprep.subr.bf16.mxu1 %v7349_v58  ;;  %v8106_v35 = vpack.c.bf16 %v8104_v17, %v8105_v28 }
 0x37d   : > { %5598 = vmatmul.mubr.bf16.vlgmr.msra.gmra.mrb[8].mxu1 %v8099_v60 }
 0x37e   : > { %5601 = vmatprep.mubr.bf16.mxu1 %v8101_v4  ;;  %5606 = vmatpush3.bf16.msra.mxu1 %v7349_v58 }
 0x37f   : > { %5607 = vmatprep.subr.bf16.mxu1 %v8102_v18 }
 0x382   : > { %5608 = vmatpush3.bf16.msra.mxu1 %v8102_v18 }
 0x383   : > { %5609 = vmatprep.subr.bf16.mxu1 %v8103_v54 }
 0x385   : > { %5602 = vmatmul.mubr.bf16.gmra.mrb[12].mxu1 %v8106_v35 }
 0x386   : > { %5610 = vmatpush3.bf16.msra.mxu1 %v8103_v54  ;;  %5621 = vmatprep.mubr.bf16.mxu1 %v7092_v46 }
 0x387   : > { %5611 = vmatprep.subr.bf16.mxu1 %v8107_v20 }
 0x38a   : > { %5612 = vmatpush3.bf16.msra.mxu1 %v8107_v20 }
 0x38b   : > { %5613 = vmatprep.subr.bf16.mxu1 %v8108_v25 }
 0x38e   : > { %5614 = vmatpush3.bf16.msra.mxu1 %v8108_v25 }
 0x38f   : > { %5615 = vmatprep.subr.bf16.mxu1 %v8109_v30 }
 0x390   : > { %v5455_v58 = vpop.f32.mrb[0].mxu1 }
 0x391   : > { %v7810_v8 = vadd.f32 %v5455_v58, %v5335_v49  ;;  %v3545_v31 = vpop.f32.mrb[1].mxu1 }
 0x392   : > { %v7812_v26 = vadd.f32 %v3545_v31, %v2832_v59  ;;  %v5456_v12 = vpop.f32.mrb[2].mxu1  ;;  %5616 = vmatpush3.bf16.msra.mxu1 %v8109_v30 }
 0x393   : > { %v5679_v46 = vadd.f32 %v5456_v12, %v5336_v42  ;;  %v3548_v19 = vpop.f32.mrb[3].mxu1  ;;  %5617 = vmatprep.subr.bf16.mxu1 %v8110_v27 }
 0x394   : > { %v5680_v63 = vadd.f32 %v3548_v19, %v2835_v29 }
 0x396   : > { %5618 = vmatpush3.bf16.msra.mxu1 %v8110_v27 }
 0x397   : > { %5619 = vmatprep.subr.bf16.mxu1 %v8111_v48 }
 0x398   : > { %v5459_v6 = vpop.f32.mrb[4].mxu1 }
 0x399   : > { %v7818_v2 = vadd.f32 %v5459_v6, %v5339_v62  ;;  %v3561_v41 = vpop.f32.mrb[5].mxu1 }
 0x39a   : > { %v7820_v55 = vadd.f32 %v3561_v41, %v2848_v38  ;;  %v5460_v57 = vpop.f32.mrb[6].mxu1  ;;  %5620 = vmatpush3.bf16.msra.mxu1 %v8111_v48 }
 0x39b   : > { %v7823_v11 = vadd.f32 %v5460_v57, %v5340_v22  ;;  %v3564_v7 = vpop.f32.mrb[7].mxu1  ;;  %5629 = vmatprep.subr.bf16.mxu1 %v8112_v1 }
 0x39c   : > { %v7826_v37 = vadd.f32 %v3564_v7, %v2851_v23 }
 0x39d   : > { %5622 = vmatmul.mubr.bf16.vlgmr.msra.gmra.mrb[8].mxu1 %v7154_v61  ;;  %v8116_v61 = vld [vmem:[#allocation12_spill] sm:$0xff] }
 0x39e   : > { %5625 = vmatprep.mubr.bf16.mxu1 %v7226_v16  ;;  %5630 = vmatpush3.bf16.msra.mxu1 %v8112_v1  ;;  %v8121_v16 = vld [vmem:[#allocation6_spill] sm:$0xff] }
 0x39f   : > { %5631 = vmatprep.subr.bf16.mxu1 %v8113_v9 }
 0x3a2   : > { %5632 = vmatpush3.bf16.msra.mxu1 %v8113_v9 }
 0x3a3   : > { %5633 = vmatprep.subr.bf16.mxu1 %v8114_v33 }
 0x3a5   : > { %5626 = vmatmul.mubr.bf16.gmra.mrb[12].mxu1 %v7294_v36  ;;  %v8122_v36 = vpack.c.bf16 %v8121_v16, %v8104_v17 }
 0x3a6   : > { %5634 = vmatpush3.bf16.msra.mxu1 %v8114_v33  ;;  %5645 = vmatprep.mubr.bf16.mxu1 %v6912_v51  ;;  %v8117_v51 = vld [vmem:[#allocation13_spill] sm:$0xff] }
 0x3a7   : > { %5635 = vmatprep.subr.bf16.mxu1 %v8115_v56 }
 0x3aa   : > { %5636 = vmatpush3.bf16.msra.mxu1 %v8115_v56 }
 0x3ab   : > { %5637 = vmatprep.subr.bf16.mxu1 %v8116_v61 }
 0x3ae   : > { %5638 = vmatpush3.bf16.msra.mxu1 %v8116_v61 }
 0x3af   : > { %5639 = vmatprep.subr.bf16.mxu1 %v7556_v3 }
 0x3b2   : > { %5640 = vmatpush3.bf16.msra.mxu1 %v7556_v3 }
 0x3b3   : > { %5641 = vmatprep.subr.bf16.mxu1 %v7565_v50 }
 0x3b6   : > { %5642 = vmatpush3.bf16.msra.mxu1 %v7565_v50  ;;  %v4741_v50 = vld [vmem:[%s7896_s5] ss:$0 sm:$0xff] }
 0x3b7   : > { %5643 = vmatprep.subr.bf16.mxu1 %v7576_v53  ;;  %v4303_v3 = vmul.f32 %v7810_v8, %v4741_v50  ;;  %v4307_v38 = vmul.f32 %v7818_v2, %v4741_v50  ;;  %v4305_v15 = vmul.f32 %v7820_v55, %v4741_v50  ;;  %v4308_v17 = vmul.f32 %v7823_v11, %v4741_v50 }
 0x3b8   : > { %v4306_v25 = vmul.f32 %v7826_v37, %v4741_v50 }
 0x3ba   : > { %5644 = vmatpush3.bf16.msra.mxu1 %v7576_v53  ;;  %v4742_v53 = vld [vmem:[%s7897_s6] ss:$0 sm:$0xff] }
 0x3bb   : > { %5653 = vmatprep.subr.bf16.mxu1 %v7586_v13  ;;  %v4330_v31 = vadd.f32 %v4742_v53, %v4307_v38  ;;  %v4328_v19 = vadd.f32 %v4742_v53, %v4305_v15  ;;  %v4331_v6 = vadd.f32 %v4742_v53, %v4308_v17  ;;  %v4329_v11 = vadd.f32 %v4742_v53, %v4306_v25 }
 0x3bd   : > { %5646 = vmatmul.mubr.bf16.vlgmr.msra.gmra.mrb[8].mxu1 %v6962_v14  ;;  %v8118_v14 = vld [vmem:[#allocation38_spill] sm:$0xff]  ;;  %v4346_v9 = vmax.f32 %v4330_v31, 0.0  ;;  %v4344_v61 = vmax.f32 %v4328_v19, 0.0 }
 0x3be   : > { %5649 = vmatprep.mubr.bf16.mxu1 %v7008_v21  ;;  %5654 = vmatpush3.bf16.msra.mxu1 %v7586_v13  ;;  %v8119_v21 = vld [vmem:[#allocation26_spill] sm:$0xff]  ;;  %v4301_v13 = vmul.f32 %v7812_v26, %v4741_v50 }
 0x3bf   : > { %5655 = vmatprep.subr.bf16.mxu1 %v7596_v0 }
 0x3c0   : > { %v4324_v10 = vadd.f32 %v4742_v53, %v4301_v13 }
 0x3c2   : > { %5656 = vmatpush3.bf16.msra.mxu1 %v7596_v0  ;;  %v4304_v0 = vmul.f32 %v5679_v46, %v4741_v50  ;;  %v4340_v60 = vmax.f32 %v4324_v10, 0.0 }
 0x3c3   : > { %5657 = vmatprep.subr.bf16.mxu1 %v7605_v24 }
 0x3c4   : > { %v4327_v47 = vadd.f32 %v4742_v53, %v4304_v0 }
 0x3c5   : > { %5650 = vmatmul.mubr.bf16.gmra.mrb[12].mxu1 %v7041_v32  ;;  %v8120_v32 = vld [vmem:[#allocation14_spill] sm:$0xff] }
 0x3c6   : > { %5658 = vmatpush3.bf16.msra.mxu1 %v7605_v24  ;;  %5669 = vmatprep.mubr.bf16.mxu1 %v8094_v39  ;;  %v4343_v54 = vmax.f32 %v4327_v47, 0.0 }
 0x3c7   : > { %5659 = vmatprep.subr.bf16.mxu1 %v7612_v34 }
 0x3ca   : > { %5660 = vmatpush3.bf16.msra.mxu1 %v7612_v34 }
 0x3cb   : > { %5661 = vmatprep.subr.bf16.mxu1 %v8117_v51 }
 0x3ce   : > { %5662 = vmatpush3.bf16.msra.mxu1 %v8117_v51 }
 0x3cf   : > { %5663 = vmatprep.subr.bf16.mxu1 %v8118_v14 }
 0x3d2   : > { %5664 = vmatpush3.bf16.msra.mxu1 %v8118_v14 }
 0x3d3   : > { %5665 = vmatprep.subr.bf16.mxu1 %v8119_v21 }
 0x3d6   : > { %5666 = vmatpush3.bf16.msra.mxu1 %v8119_v21 }
 0x3d7   : > { %5667 = vmatprep.subr.bf16.mxu1 %v8120_v32 }
 0x3da   : > { %5668 = vmatpush3.bf16.msra.mxu1 %v8120_v32  ;;  %v4347_v32 = vmax.f32 %v4331_v6, 0.0 }
 0x3dd   : > { %5670 = vmatmul.mubr.bf16.vlgmr.msra.gmra.mrb[8].mxu1 %v7213_v45  ;;  %v4302_v45 = vmul.f32 %v5680_v63, %v4741_v50 }
 0x3de   : > { %5673 = vmatprep.mubr.bf16.mxu1 %v7276_v52  ;;  %v4326_v52 = vadd.f32 %v4742_v53, %v4303_v3  ;;  %v4345_v3 = vmax.f32 %v4329_v11, 0.0 }
 0x3df   : > { %v4325_v59 = vadd.f32 %v4742_v53, %v4302_v45 }
 0x3e0   : > { %v4342_v62 = vmax.f32 %v4326_v52, 0.0 }
 0x3e1   : > { %v4341_v20 = vmax.f32 %v4325_v59, 0.0 }
 0x3e5   : > { %5674 = vmatmul.mubr.bf16.gmra.mrb[12].mxu1 %v8122_v36 }
 0x4b0   : > { %v5671_v24 = vpop.f32.mrb[8].mxu1 }
 0x4b1   : > { %v4311_v34 = vmul.f32 %v5671_v24, %v4741_v50  ;;  %v4255_v39 = vpop.f32.mrb[9].mxu1 }
 0x4b2   : > { %v4309_v43 = vmul.f32 %v4741_v50, %v4255_v39  ;;  %v5672_v44 = vpop.f32.mrb[10].mxu1 }
 0x4b3   : > { %v4334_v5 = vadd.f32 %v4742_v53, %v4311_v34  ;;  %v4312_v40 = vmul.f32 %v5672_v44, %v4741_v50  ;;  %v4258_v49 = vpop.f32.mrb[11].mxu1 }
 0x4b4   : > { %v4332_v42 = vadd.f32 %v4742_v53, %v4309_v43  ;;  %v4310_v29 = vmul.f32 %v4741_v50, %v4258_v49 }
 0x4b5   : > { %v4350_v22 = vmax.f32 %v4334_v5, 0.0  ;;  %v4335_v23 = vadd.f32 %v4742_v53, %v4312_v40 }
 0x4b6   : > { %v4348_v4 = vmax.f32 %v4332_v42, 0.0  ;;  %v4333_v18 = vadd.f32 %v4742_v53, %v4310_v29 }
 0x4b7   : > { %v4358_v28 = vmax.f32 %v4342_v62, %v4350_v22  ;;  %v4351_v35 = vmax.f32 %v4335_v23, 0.0 }
 0x4b8   : > { %v4356_v30 = vmax.f32 %v4340_v60, %v4348_v4  ;;  %v4349_v58 = vmax.f32 %v4333_v18, 0.0  ;;  %v5675_v8 = vpop.f32.mrb[12].mxu1 }
 0x4b9   : > { %v4359_v26 = vmax.f32 %v4343_v54, %v4351_v35  ;;  %v4315_v12 = vmul.f32 %v5675_v8, %v4741_v50  ;;  %v4271_v46 = vpop.f32.mrb[13].mxu1 }
 0x4ba   : > { %v4357_v27 = vmax.f32 %v4341_v20, %v4349_v58  ;;  %v4313_v63 = vmul.f32 %v4741_v50, %v4271_v46  ;;  %v5676_v48 = vpop.f32.mrb[14].mxu1 }
 0x4bb   : > { %v4365_v2 = vmax.f32 %v4358_v28, %v4359_v26  ;;  %v4338_v41 = vadd.f32 %v4742_v53, %v4315_v12  ;;  %v4316_v55 = vmul.f32 %v5676_v48, %v4741_v50  ;;  %v4274_v57 = vpop.f32.mrb[15].mxu1 }
 0x4bc   : > { %v4364_v7 = vmax.f32 %v4356_v30, %v4357_v27  ;;  %v4336_v1 = vadd.f32 %v4742_v53, %v4313_v63  ;;  %v4314_v37 = vmul.f32 %v4741_v50, %v4274_v57 }
 0x4bd   : > { %v4354_v33 = vmax.f32 %v4338_v41, 0.0  ;;  %v4339_v56 = vadd.f32 %v4742_v53, %v4316_v55 }
 0x4be   : > { %v4757_v51 = vpack.c.bf16 %v4365_v2, %v4364_v7  ;;  %v4352_v14 = vmax.f32 %v4336_v1, 0.0  ;;  %v4337_v21 = vadd.f32 %v4742_v53, %v4314_v37 }
 0x4bf   : > { %v4362_v16 = vmax.f32 %v4346_v9, %v4354_v33  ;;  %v4355_v36 = vmax.f32 %v4339_v56, 0.0 }
 0x4c0   : > { %4758 = vst [vmem:[%s278_s8] sm:$0xff] %v4757_v51   ;;  %v4360_v13 = vmax.f32 %v4344_v61, %v4352_v14  ;;  %v4353_v0 = vmax.f32 %v4337_v21, 0.0 }
 0x4c1   : > { %v4363_v45 = vmax.f32 %v4347_v32, %v4355_v36 }
 0x4c2   : > { %v4361_v50 = vmax.f32 %v4345_v3, %v4353_v0 }
 0x4c3   : > { %v4367_v24 = vmax.f32 %v4362_v16, %v4363_v45 }
 0x4c4   : > { %v4366_v52 = vmax.f32 %v4360_v13, %v4361_v50 }
 0x4c6   : > { %v4762_v34 = vpack.c.bf16 %v4367_v24, %v4366_v52 }
 0x4c8   : > { %4764 = vst [vmem:[%s278_s8 + $0x8] sm:$0xff] %v4762_v34  }
 0x4c9 PF: > { %s17_s24 = sadd.s32 1, %s6000_s24  }
 0x4ca   : > { %p14_p4 = scmp.ge.s32.totalorder %s17_s24, 4  }
 0x4cc   :  { %16 = sbr.rel (!%p14_p4) target bundleno = 1 (0x1), region = 86 }

// kernel: convnet_forward.3
= control target key start
LH: loop header
LB: loop body
LE: loop exit
PB: predicated region body
PF: predicated region fallthrough
CT: control target
= control target key end

     0   :  { %v553_v28 = vlaneseq  ;;  %v4023_v36 = vmov 1966171168   ;;  %s4925_s0 = inlined_call_operand.vmem [shape: bf16[2,4096], index: 0, kind: input, shape index: {}]   ;;  %s4926_s1 = inlined_call_operand.vmem [shape: bf16[4096,128], index: 1, kind: input, shape index: {}]   ;;  %s4927_s2 = inlined_call_operand.vmem [shape: f32[1,128], index: 2, kind: input, shape index: {}]   ;;  %s4928_s3 = inlined_call_operand.vmem [shape: bf16[128,128], index: 3, kind: input, shape index: {}]   ;;  %s4929_s4 = inlined_call_operand.vmem [shape: f32[1,128], index: 4, kind: input, shape index: {}]   ;;  %s4930_s5 = inlined_call_operand.hbm [shape: f32[2,128], index: 5, kind: output, shape index: {}]  }
   0x1   :  { %v3731_v0 = vld [vmem:[%s4926_s1 + $0x40] sm:$0xff]   ;;  %v3735_v4 = vld [vmem:[%s4926_s1 + $0x48] sm:$0xff]   ;;  %v3739_v8 = vld [vmem:[%s4926_s1 + $0x50] sm:$0xff]   ;;  %v551_v37 = vunpack.c.l.s4 %v4023_v36 }
   0x2   :  { %v3732_v1 = vld [vmem:[%s4926_s1 + $0xc0] sm:$0xff]   ;;  %3346 = vmatprep.subr.bf16.mxu0 %v3731_v0  ;;  %v3736_v5 = vld [vmem:[%s4926_s1 + $0xc8] sm:$0xff]   ;;  %v3740_v9 = vld [vmem:[%s4926_s1 + $0xd0] sm:$0xff]   ;;  %v554_v33 = vshrl.u32 %v553_v28, 7 }
   0x3   :  { %v3733_v2 = vld [vmem:[%s4926_s1] sm:$0xff]   ;;  %3368 = vmatprep.subr.bf16.mxu1 %v3732_v1  ;;  %v3737_v6 = vld [vmem:[%s4926_s1 + $0x8] sm:$0xff]   ;;  %v3741_v10 = vld [vmem:[%s4926_s1 + $0x10] sm:$0xff]   ;;  %v552_v40 = vunpack.c.0.s8 %v551_v37 }
   0x4   :  { %v3734_v3 = vld [vmem:[%s4926_s1 + $0x80] sm:$0xff]   ;;  %3347 = vmatpush3.bf16.msra.mxu0 %v3733_v2  ;;  %v3738_v7 = vld [vmem:[%s4926_s1 + $0x88] sm:$0xff]   ;;  %v3742_v11 = vld [vmem:[%s4926_s1 + $0x90] sm:$0xff]  }
   0x5   :  { %3369 = vmatpush3.bf16.msra.mxu1 %v3734_v3  ;;  %3348 = vmatprep.subr.bf16.mxu0 %v3735_v4  ;;  %v3743_v12 = vld [vmem:[%s4926_s1 + $0x58] sm:$0xff]   ;;  %v3747_v16 = vld [vmem:[%s4926_s1 + $0x60] sm:$0xff]   ;;  %v3751_v20 = vld [vmem:[%s4926_s1 + $0x68] sm:$0xff]   ;;  %v4162_v41 = vsub.s32 %v552_v40, %v554_v33 }
   0x6   :  { %3370 = vmatprep.subr.bf16.mxu1 %v3736_v5  ;;  %v3744_v13 = vld [vmem:[%s4926_s1 + $0xd8] sm:$0xff]   ;;  %v3748_v17 = vld [vmem:[%s4926_s1 + $0xe0] sm:$0xff]   ;;  %v3752_v21 = vld [vmem:[%s4926_s1 + $0xe8] sm:$0xff]  }
   0x7   :  { %v3745_v14 = vld [vmem:[%s4926_s1 + $0x18] sm:$0xff]   ;;  %v3749_v18 = vld [vmem:[%s4926_s1 + $0x20] sm:$0xff]   ;;  %v3753_v22 = vld [vmem:[%s4926_s1 + $0x28] sm:$0xff]  }
   0x8   :  { %3349 = vmatpush3.bf16.msra.mxu0 %v3737_v6  ;;  %v3746_v15 = vld [vmem:[%s4926_s1 + $0x98] sm:$0xff]   ;;  %v3750_v19 = vld [vmem:[%s4926_s1 + $0xa0] sm:$0xff]   ;;  %v3754_v23 = vld [vmem:[%s4926_s1 + $0xa8] sm:$0xff]  }
   0x9   :  { %3371 = vmatpush3.bf16.msra.mxu1 %v3738_v7  ;;  %3350 = vmatprep.subr.bf16.mxu0 %v3739_v8  ;;  %v3755_v24 = vld [vmem:[%s4926_s1 + $0x70] sm:$0xff]   ;;  %v3759_v29 = vld [vmem:[%s4926_s1 + $0x78] sm:$0xff]   ;;  %v22_v34 = vld [vmem:[%s4925_s0] sm:$0xff] }
   0xa   :  { %3372 = vmatprep.subr.bf16.mxu1 %v3740_v9  ;;  %v3756_v25 = vld [vmem:[%s4926_s1 + $0xf0] sm:$0xff]   ;;  %v3760_v30 = vld [vmem:[%s4926_s1 + $0xf8] sm:$0xff]   ;;  %v3764_v35 = vld [vmem:[%s4926_s1 + $0x140] sm:$0xff]   ;;  %v549_v39 = vcombine.high %v22_v34, %v22_v34  ;;  %v556_v42 = vrot.slane %v22_v34, %v4162_v41 }
   0xb   :  { %v3757_v26 = vld [vmem:[%s4926_s1 + $0x30] sm:$0xff]   ;;  %v3761_v31 = vld [vmem:[%s4926_s1 + $0x38] sm:$0xff]   ;;  %v3765_v38 = vld [vmem:[%s4926_s1 + $0x1c0] sm:$0xff]  }
   0xc   :  { %3351 = vmatpush3.bf16.msra.mxu0 %v3741_v10  ;;  %v3758_v27 = vld [vmem:[%s4926_s1 + $0xb0] sm:$0xff]   ;;  %v3762_v32 = vld [vmem:[%s4926_s1 + $0xb8] sm:$0xff]   ;;  %v4166_v43 = vrot.slane %v549_v39, %v4162_v41  ;;  %v564_v44 = vcombine.high %v556_v42, %v556_v42  ;;  %v572_v45 = vrot.slane %v556_v42, %v4162_v41  ;;  %v3766_v47 = vld [vmem:[%s4926_s1 + $0x100] sm:$0xff]  }
   0xd   :  { %3373 = vmatpush3.bf16.msra.mxu1 %v3742_v11  ;;  %3352 = vmatprep.subr.bf16.mxu0 %v3743_v12  ;;  %v3767_v49 = vld [vmem:[%s4926_s1 + $0x180] sm:$0xff]   ;;  %v3768_v52 = vld [vmem:[%s4926_s1 + $0x148] sm:$0xff]   ;;  %v3772_v58 = vld [vmem:[%s4926_s1 + $0x150] sm:$0xff]  }
   0xe   :  { %3374 = vmatprep.subr.bf16.mxu1 %v3744_v13  ;;  %v565_v46 = vcombine.high %v4166_v43, %v4166_v43  ;;  %v586_v48 = vrot.slane %v564_v44, %v4162_v41  ;;  %v594_v51 = vcombine.high %v572_v45, %v572_v45  ;;  %v3769_v54 = vld [vmem:[%s4926_s1 + $0x1c8] sm:$0xff]   ;;  %v3773_v59 = vld [vmem:[%s4926_s1 + $0x1d0] sm:$0xff]   ;;  %v3776_v62 = vld [vmem:[%s4926_s1 + $0x158] sm:$0xff]  }
   0xf   :  { %v3770_v55 = vld [vmem:[%s4926_s1 + $0x108] sm:$0xff]   ;;  %v3774_v60 = vld [vmem:[%s4926_s1 + $0x110] sm:$0xff]   ;;  %v3777_v63 = vld [vmem:[%s4926_s1 + $0x1d8] sm:$0xff]  }
  0x10   :  { %3353 = vmatpush3.bf16.msra.mxu0 %v3745_v14  ;;  %v593_v50 = vrot.slane %v565_v46, %v4162_v41  ;;  %2345 = vmatprep.mubr.bf16.mxu0 %v586_v48  ;;  %v596_v53 = vcombine.high %v586_v48, %v586_v48  ;;  %v3771_v57 = vld [vmem:[%s4926_s1 + $0x188] sm:$0xff]   ;;  %v3775_v61 = vld [vmem:[%s4926_s1 + $0x190] sm:$0xff]   ;;  %v3778_v0 = vld [vmem:[%s4926_s1 + $0x118] sm:$0xff]  }
  0x11   :  { %3375 = vmatpush3.bf16.msra.mxu1 %v3746_v15  ;;  %3354 = vmatprep.subr.bf16.mxu0 %v3747_v16  ;;  %v3779_v1 = vld [vmem:[%s4926_s1 + $0x198] sm:$0xff]   ;;  %v3780_v2 = vld [vmem:[%s4926_s1 + $0x160] sm:$0xff]   ;;  %v3784_v6 = vld [vmem:[%s4926_s1 + $0x168] sm:$0xff]  }
  0x12   :  { %3376 = vmatprep.subr.bf16.mxu1 %v3748_v17  ;;  %v597_v56 = vcombine.high %v593_v50, %v593_v50  ;;  %2385 = vmatprep.mubr.bf16.mxu1 %v596_v53  ;;  %v3781_v3 = vld [vmem:[%s4926_s1 + $0x1e0] sm:$0xff]   ;;  %v3785_v7 = vld [vmem:[%s4926_s1 + $0x1e8] sm:$0xff]   ;;  %v3788_v10 = vld [vmem:[%s4926_s1 + $0x170] sm:$0xff]  }
  0x13   :  { %v3782_v4 = vld [vmem:[%s4926_s1 + $0x120] sm:$0xff]   ;;  %v3786_v8 = vld [vmem:[%s4926_s1 + $0x128] sm:$0xff]   ;;  %v3789_v11 = vld [vmem:[%s4926_s1 + $0x1f0] sm:$0xff]  }
  0x14   :  { %3355 = vmatpush3.bf16.msra.mxu0 %v3749_v18  ;;  %v3783_v5 = vld [vmem:[%s4926_s1 + $0x1a0] sm:$0xff]   ;;  %v3787_v9 = vld [vmem:[%s4926_s1 + $0x1a8] sm:$0xff]   ;;  %v3790_v12 = vld [vmem:[%s4926_s1 + $0x130] sm:$0xff]   ;;  %v579_v18 = vrot.slane %v4166_v43, %v4162_v41 }
  0x15   :  { %3377 = vmatpush3.bf16.msra.mxu1 %v3750_v19  ;;  %3356 = vmatprep.subr.bf16.mxu0 %v3751_v20  ;;  %v3791_v13 = vld [vmem:[%s4926_s1 + $0x1b0] sm:$0xff]   ;;  %v3792_v14 = vld [vmem:[%s4926_s1 + $0x178] sm:$0xff]   ;;  %v3796_v19 = vld [vmem:[%s4926_s1 + $0x240] sm:$0xff]  }
  0x16   :  { %3378 = vmatprep.subr.bf16.mxu1 %v3752_v21  ;;  %v3793_v15 = vld [vmem:[%s4926_s1 + $0x1f8] sm:$0xff]   ;;  %v3797_v20 = vld [vmem:[%s4926_s1 + $0x2c0] sm:$0xff]   ;;  %v3804_v28 = vld [vmem:[%s4926_s1 + $0x250] sm:$0xff]  }
  0x17   :  { %v3794_v16 = vld [vmem:[%s4926_s1 + $0x138] sm:$0xff]   ;;  %v3798_v21 = vld [vmem:[%s4926_s1 + $0x200] sm:$0xff]   ;;  %v3816_v40 = vld [vmem:[%s4926_s1 + $0x268] sm:$0xff]  }
  0x18   :  { %3357 = vmatpush3.bf16.msra.mxu0 %v3753_v22  ;;  %v3795_v17 = vld [vmem:[%s4926_s1 + $0x1b8] sm:$0xff]   ;;  %v3799_v22 = vld [vmem:[%s4926_s1 + $0x280] sm:$0xff]   ;;  %v3817_v42 = vld [vmem:[%s4926_s1 + $0x2e8] sm:$0xff]  }
  0x19   :  { %3379 = vmatpush3.bf16.msra.mxu1 %v3754_v23  ;;  %3358 = vmatprep.subr.bf16.mxu0 %v3755_v24  ;;  %v595_v23 = vcombine.high %v579_v18, %v579_v18  ;;  %v3800_v24 = vld [vmem:[%s4926_s1 + $0x248] sm:$0xff]   ;;  %v3809_v33 = vld [vmem:[%s4926_s1 + $0x2d8] sm:$0xff]   ;;  %v3812_v36 = vld [vmem:[%s4926_s1 + $0x260] sm:$0xff]  }
  0x1a   :  { %3380 = vmatprep.subr.bf16.mxu1 %v3756_v25  ;;  %v3801_v25 = vld [vmem:[%s4926_s1 + $0x2c8] sm:$0xff]   ;;  %v3810_v34 = vld [vmem:[%s4926_s1 + $0x218] sm:$0xff]   ;;  %v3813_v37 = vld [vmem:[%s4926_s1 + $0x2e0] sm:$0xff]  }
  0x1b   :  { %v3815_v39 = vld [vmem:[%s4926_s1 + $0x2a0] sm:$0xff]   ;;  %v3818_v43 = vld [vmem:[%s4926_s1 + $0x228] sm:$0xff]  }
  0x1c   :  { %3359 = vmatpush3.bf16.msra.mxu0 %v3757_v26  ;;  %v3802_v26 = vld [vmem:[%s4926_s1 + $0x208] sm:$0xff]  }
  0x1d   :  { %3381 = vmatpush3.bf16.msra.mxu1 %v3758_v27  ;;  %3360 = vmatprep.subr.bf16.mxu0 %v3759_v29  ;;  %v3803_v27 = vld [vmem:[%s4926_s1 + $0x288] sm:$0xff]   ;;  %v3805_v29 = vld [vmem:[%s4926_s1 + $0x2d0] sm:$0xff]  }
  0x1e   :  { %3382 = vmatprep.subr.bf16.mxu1 %v3760_v30  ;;  %v3806_v30 = vld [vmem:[%s4926_s1 + $0x210] sm:$0xff]   ;;  %v3819_v44 = vld [vmem:[%s4926_s1 + $0x2a8] sm:$0xff]  }
  0x1f   :  { %v23_v46 = vld [vmem:[%s4925_s0 + $0x8] sm:$0xff] }
  0x20   :  { %3361 = vmatpush3.bf16.msra.mxu0 %v3761_v31  ;;  %v3807_v31 = vld [vmem:[%s4926_s1 + $0x290] sm:$0xff]   ;;  %v605_v48 = vrot.slane %v23_v46, %v4162_v41 }
  0x21   :  { %3383 = vmatpush3.bf16.msra.mxu1 %v3762_v32  ;;  %3390 = vmatprep.subr.bf16.mxu0 %v3764_v35  ;;  %v3808_v32 = vld [vmem:[%s4926_s1 + $0x258] sm:$0xff]  }
  0x22   :  { %3412 = vmatprep.subr.bf16.mxu1 %v3765_v38  ;;  %v3811_v35 = vld [vmem:[%s4926_s1 + $0x298] sm:$0xff]   ;;  %v3814_v38 = vld [vmem:[%s4926_s1 + $0x220] sm:$0xff]  }
  0x23   :  { %2346 = vmatmul.mubr.bf16.vlgmr.msra.gmra.mrb[0].mxu0 %v572_v45  ;;  %v3820_v45 = vld [vmem:[%s4926_s1 + $0x270] sm:$0xff]  }
  0x24   :  { %3391 = vmatpush3.bf16.msra.mxu0 %v3766_v47  ;;  %2386 = vmatmul.mubr.bf16.vlgmr.msra.gmra.mrb[0].mxu1 %v594_v51  ;;  %v3821_v47 = vld [vmem:[%s4926_s1 + $0x2f0] sm:$0xff]  }
  0x25   :  { %3392 = vmatprep.subr.bf16.mxu0 %v3768_v52  ;;  %3413 = vmatpush3.bf16.msra.mxu1 %v3767_v49  ;;  %v598_v49 = vcombine.high %v23_v46, %v23_v46  ;;  %v3823_v51 = vld [vmem:[%s4926_s1 + $0x2b0] sm:$0xff]   ;;  %v613_v52 = vcombine.high %v605_v48, %v605_v48 }
  0x26   :  { %2425 = vmatprep.mubr.bf16.mxu0 %v593_v50  ;;  %3414 = vmatprep.subr.bf16.mxu1 %v3769_v54  ;;  %v3822_v50 = vld [vmem:[%s4926_s1 + $0x230] sm:$0xff]   ;;  %v3824_v54 = vld [vmem:[%s4926_s1 + $0x278] sm:$0xff]  }
  0x27   :  { %2465 = vmatprep.mubr.bf16.mxu1 %v597_v56  ;;  %v4354_v53 = vrot.slane %v598_v49, %v4162_v41  ;;  %v635_v56 = vrot.slane %v613_v52, %v4162_v41  ;;  %v3871_v46 = vld [vmem:[%s4926_s1 + $0x410] sm:$0xff]   ;;  %v3874_v49 = vld [vmem:[%s4926_s1 + $0x4d8] sm:$0xff]   ;;  %v3877_v52 = vld [vmem:[%s4926_s1 + $0x460] sm:$0xff]  }
  0x28   :  { %3393 = vmatpush3.bf16.msra.mxu0 %v3770_v55  ;;  %v3825_v55 = vld [vmem:[%s4926_s1 + $0x2f8] sm:$0xff]  }
  0x29   :  { %3394 = vmatprep.subr.bf16.mxu0 %v3772_v58  ;;  %3415 = vmatpush3.bf16.msra.mxu1 %v3771_v57  ;;  %v614_v57 = vcombine.high %v4354_v53, %v4354_v53  ;;  %v3826_v58 = vld [vmem:[%s4926_s1 + $0x238] sm:$0xff]  }
  0x2a   :  { %3416 = vmatprep.subr.bf16.mxu1 %v3773_v59  ;;  %v3827_v59 = vld [vmem:[%s4926_s1 + $0x2b8] sm:$0xff]  }
  0x2c   :  { %3395 = vmatpush3.bf16.msra.mxu0 %v3774_v60  ;;  %v645_v60 = vcombine.high %v635_v56, %v635_v56 }
  0x2d   :  { %3396 = vmatprep.subr.bf16.mxu0 %v3776_v62  ;;  %3417 = vmatpush3.bf16.msra.mxu1 %v3775_v61  ;;  %v621_v61 = vrot.slane %v605_v48, %v4162_v41  ;;  %v3828_v62 = vld [vmem:[%s4926_s1 + $0x340] sm:$0xff]   ;;  %v3873_v48 = vld [vmem:[%s4926_s1 + $0x458] sm:$0xff]  }
  0x2e   :  { %3418 = vmatprep.subr.bf16.mxu1 %v3777_v63  ;;  %v3829_v63 = vld [vmem:[%s4926_s1 + $0x3c0] sm:$0xff]  }
  0x30   :  { %3397 = vmatpush3.bf16.msra.mxu0 %v3778_v0  ;;  %v642_v0 = vrot.slane %v614_v57, %v4162_v41  ;;  %v3882_v57 = vld [vmem:[%s4926_s1 + $0x4e8] sm:$0xff]  }
  0x31   :  { %3398 = vmatprep.subr.bf16.mxu0 %v3780_v2  ;;  %3419 = vmatpush3.bf16.msra.mxu1 %v3779_v1  ;;  %v3830_v1 = vld [vmem:[%s4926_s1 + $0x300] sm:$0xff]  }
  0x32   :  { %3420 = vmatprep.subr.bf16.mxu1 %v3781_v3  ;;  %v3831_v2 = vld [vmem:[%s4926_s1 + $0x380] sm:$0xff]   ;;  %v643_v3 = vcombine.high %v621_v61, %v621_v61 }
  0x34   :  { %3399 = vmatpush3.bf16.msra.mxu0 %v3782_v4  ;;  %v3832_v4 = vld [vmem:[%s4926_s1 + $0x348] sm:$0xff]  }
  0x35   :  { %3400 = vmatprep.subr.bf16.mxu0 %v3784_v6  ;;  %3421 = vmatpush3.bf16.msra.mxu1 %v3783_v5  ;;  %v3833_v5 = vld [vmem:[%s4926_s1 + $0x3c8] sm:$0xff]   ;;  %v646_v6 = vcombine.high %v642_v0, %v642_v0 }
  0x36   :  { %3422 = vmatprep.subr.bf16.mxu1 %v3785_v7  ;;  %v3834_v7 = vld [vmem:[%s4926_s1 + $0x308] sm:$0xff]  }
  0x38   :  { %3401 = vmatpush3.bf16.msra.mxu0 %v3786_v8  ;;  %v3835_v8 = vld [vmem:[%s4926_s1 + $0x388] sm:$0xff]  }
  0x39   :  { %3402 = vmatprep.subr.bf16.mxu0 %v3788_v10  ;;  %3423 = vmatpush3.bf16.msra.mxu1 %v3787_v9  ;;  %v3836_v9 = vld [vmem:[%s4926_s1 + $0x350] sm:$0xff]  }
  0x3a   :  { %3424 = vmatprep.subr.bf16.mxu1 %v3789_v11  ;;  %v3837_v10 = vld [vmem:[%s4926_s1 + $0x3d0] sm:$0xff]  }
  0x3b   :  { %v3838_v11 = vld [vmem:[%s4926_s1 + $0x310] sm:$0xff]  }
  0x3c   :  { %3403 = vmatpush3.bf16.msra.mxu0 %v3790_v12  ;;  %v3839_v12 = vld [vmem:[%s4926_s1 + $0x390] sm:$0xff]  }
  0x3d   :  { %3404 = vmatprep.subr.bf16.mxu0 %v3792_v14  ;;  %3425 = vmatpush3.bf16.msra.mxu1 %v3791_v13  ;;  %v3840_v13 = vld [vmem:[%s4926_s1 + $0x358] sm:$0xff]  }
  0x3e   :  { %3426 = vmatprep.subr.bf16.mxu1 %v3793_v15  ;;  %v3841_v14 = vld [vmem:[%s4926_s1 + $0x3d8] sm:$0xff]  }
  0x3f   :  { %v3842_v15 = vld [vmem:[%s4926_s1 + $0x318] sm:$0xff]  }
  0x40   :  { %3405 = vmatpush3.bf16.msra.mxu0 %v3794_v16  ;;  %v3843_v16 = vld [vmem:[%s4926_s1 + $0x398] sm:$0xff]  }
  0x41   :  { %3434 = vmatprep.subr.bf16.mxu0 %v3796_v19  ;;  %3427 = vmatpush3.bf16.msra.mxu1 %v3795_v17  ;;  %v3844_v17 = vld [vmem:[%s4926_s1 + $0x360] sm:$0xff]  }
  0x42   :  { %3456 = vmatprep.subr.bf16.mxu1 %v3797_v20  ;;  %v3846_v19 = vld [vmem:[%s4926_s1 + $0x320] sm:$0xff]  }
  0x43   :  { %2426 = vmatmul.mubr.bf16.vlgmr.msra.gmra.mrb[4].mxu0 %v579_v18  ;;  %v3845_v18 = vld [vmem:[%s4926_s1 + $0x3e0] sm:$0xff]  }
  0x44   :  { %3435 = vmatpush3.bf16.msra.mxu0 %v3798_v21  ;;  %2466 = vmatmul.mubr.bf16.vlgmr.msra.gmra.mrb[4].mxu1 %v595_v23  ;;  %v3847_v20 = vld [vmem:[%s4926_s1 + $0x3a0] sm:$0xff]   ;;  %v3848_v21 = vld [vmem:[%s4926_s1 + $0x368] sm:$0xff]  }
  0x45   :  { %3436 = vmatprep.subr.bf16.mxu0 %v3800_v24  ;;  %3457 = vmatpush3.bf16.msra.mxu1 %v3799_v22  ;;  %v3849_v22 = vld [vmem:[%s4926_s1 + $0x3e8] sm:$0xff]  }
  0x46   :  { %3458 = vmatprep.subr.bf16.mxu1 %v3801_v25  ;;  %2505 = vmatprep.mubr.bf16.mxu0 %v635_v56  ;;  %v3850_v23 = vld [vmem:[%s4926_s1 + $0x328] sm:$0xff]   ;;  %v3852_v25 = vld [vmem:[%s4926_s1 + $0x370] sm:$0xff]  }
  0x47   :  { %2545 = vmatprep.mubr.bf16.mxu1 %v645_v60  ;;  %v3851_v24 = vld [vmem:[%s4926_s1 + $0x3a8] sm:$0xff]   ;;  %v3885_v60 = vld [vmem:[%s4926_s1 + $0x470] sm:$0xff]  }
  0x48   :  { %3437 = vmatpush3.bf16.msra.mxu0 %v3802_v26  ;;  %v3853_v26 = vld [vmem:[%s4926_s1 + $0x3f0] sm:$0xff]   ;;  %v3881_v56 = vld [vmem:[%s4926_s1 + $0x468] sm:$0xff]  }
  0x49   :  { %3438 = vmatprep.subr.bf16.mxu0 %v3804_v28  ;;  %3459 = vmatpush3.bf16.msra.mxu1 %v3803_v27  ;;  %v3854_v27 = vld [vmem:[%s4926_s1 + $0x330] sm:$0xff]  }
  0x4a   :  { %3460 = vmatprep.subr.bf16.mxu1 %v3805_v29  ;;  %v3855_v28 = vld [vmem:[%s4926_s1 + $0x3b0] sm:$0xff]   ;;  %v3856_v29 = vld [vmem:[%s4926_s1 + $0x378] sm:$0xff]  }
  0x4c   :  { %3439 = vmatpush3.bf16.msra.mxu0 %v3806_v30  ;;  %v3857_v30 = vld [vmem:[%s4926_s1 + $0x3f8] sm:$0xff]  }
  0x4d   :  { %3440 = vmatprep.subr.bf16.mxu0 %v3808_v32  ;;  %3461 = vmatpush3.bf16.msra.mxu1 %v3807_v31  ;;  %v3858_v31 = vld [vmem:[%s4926_s1 + $0x338] sm:$0xff]  }
  0x4e   :  { %3462 = vmatprep.subr.bf16.mxu1 %v3809_v33  ;;  %v3859_v32 = vld [vmem:[%s4926_s1 + $0x3b8] sm:$0xff]   ;;  %v628_v33 = vrot.slane %v4354_v53, %v4162_v41  ;;  %v3878_v53 = vld [vmem:[%s4926_s1 + $0x4e0] sm:$0xff]  }
  0x50   :  { %3441 = vmatpush3.bf16.msra.mxu0 %v3810_v34  ;;  %v3861_v34 = vld [vmem:[%s4926_s1 + $0x440] sm:$0xff]  }
  0x51   :  { %3442 = vmatprep.subr.bf16.mxu0 %v3812_v36  ;;  %3463 = vmatpush3.bf16.msra.mxu1 %v3811_v35  ;;  %v3862_v35 = vld [vmem:[%s4926_s1 + $0x4c0] sm:$0xff]  }
  0x52   :  { %3464 = vmatprep.subr.bf16.mxu1 %v3813_v37  ;;  %v3863_v36 = vld [vmem:[%s4926_s1 + $0x400] sm:$0xff]  }
  0x53   :  { %v3864_v37 = vld [vmem:[%s4926_s1 + $0x480] sm:$0xff]  }
  0x54   :  { %3443 = vmatpush3.bf16.msra.mxu0 %v3814_v38  ;;  %v644_v38 = vcombine.high %v628_v33, %v628_v33 }
  0x55   :  { %3444 = vmatprep.subr.bf16.mxu0 %v3816_v40  ;;  %3465 = vmatpush3.bf16.msra.mxu1 %v3815_v39  ;;  %v3865_v39 = vld [vmem:[%s4926_s1 + $0x448] sm:$0xff]  }
  0x56   :  { %3466 = vmatprep.subr.bf16.mxu1 %v3817_v42  ;;  %v3866_v40 = vld [vmem:[%s4926_s1 + $0x4c8] sm:$0xff]  }
  0x57   :  { %v3867_v42 = vld [vmem:[%s4926_s1 + $0x408] sm:$0xff]  }
  0x58   :  { %3445 = vmatpush3.bf16.msra.mxu0 %v3818_v43  ;;  %v3868_v43 = vld [vmem:[%s4926_s1 + $0x488] sm:$0xff]  }
  0x59   :  { %3446 = vmatprep.subr.bf16.mxu0 %v3820_v45  ;;  %3467 = vmatpush3.bf16.msra.mxu1 %v3819_v44  ;;  %v3869_v44 = vld [vmem:[%s4926_s1 + $0x450] sm:$0xff]  }
  0x5a   :  { %3468 = vmatprep.subr.bf16.mxu1 %v3821_v47  ;;  %v3870_v45 = vld [vmem:[%s4926_s1 + $0x4d0] sm:$0xff]  }
  0x5b   :  { %v3872_v47 = vld [vmem:[%s4926_s1 + $0x490] sm:$0xff]  }
  0x5c   :  { %3447 = vmatpush3.bf16.msra.mxu0 %v3822_v50  ;;  %v3875_v50 = vld [vmem:[%s4926_s1 + $0x418] sm:$0xff]  }
  0x5d   :  { %3448 = vmatprep.subr.bf16.mxu0 %v3824_v54  ;;  %3469 = vmatpush3.bf16.msra.mxu1 %v3823_v51  ;;  %v3876_v51 = vld [vmem:[%s4926_s1 + $0x498] sm:$0xff]   ;;  %v3879_v54 = vld [vmem:[%s4926_s1 + $0x420] sm:$0xff]  }
  0x5e   :  { %3470 = vmatprep.subr.bf16.mxu1 %v3825_v55  ;;  %v3880_v55 = vld [vmem:[%s4926_s1 + $0x4a0] sm:$0xff]  }
  0x60   :  { %3449 = vmatpush3.bf16.msra.mxu0 %v3826_v58  ;;  %v3883_v58 = vld [vmem:[%s4926_s1 + $0x428] sm:$0xff]  }
  0x61   :  { %3478 = vmatprep.subr.bf16.mxu0 %v3828_v62  ;;  %3471 = vmatpush3.bf16.msra.mxu1 %v3827_v59  ;;  %v3884_v59 = vld [vmem:[%s4926_s1 + $0x4a8] sm:$0xff]   ;;  %v3886_v62 = vld [vmem:[%s4926_s1 + $0x4f0] sm:$0xff]  }
  0x62   :  { %3500 = vmatprep.subr.bf16.mxu1 %v3829_v63 }
  0x63   :  { %2506 = vmatmul.mubr.bf16.vlgmr.msra.gmra.mrb[8].mxu0 %v621_v61  ;;  %v24_v61 = vld [vmem:[%s4925_s0 + $0x10] sm:$0xff] }
  0x64   :  { %3479 = vmatpush3.bf16.msra.mxu0 %v3830_v1  ;;  %2585 = vmatprep.mubr.bf16.mxu0 %v642_v0  ;;  %v654_v63 = vrot.slane %v24_v61, %v4162_v41  ;;  %v647_v0 = vcombine.high %v24_v61, %v24_v61  ;;  %v3887_v1 = vld [vmem:[%s4926_s1 + $0x430] sm:$0xff]  }
  0x65   :  { %2546 = vmatmul.mubr.bf16.vlgmr.msra.gmra.mrb[8].mxu1 %v643_v3  ;;  %3480 = vmatprep.subr.bf16.mxu0 %v3832_v4  ;;  %v3936_v61 = vld [vmem:[%s4926_s1 + $0x610] sm:$0xff]  }
  0x66   :  { %3501 = vmatpush3.bf16.msra.mxu1 %v3831_v2  ;;  %2625 = vmatprep.mubr.bf16.mxu1 %v646_v6  ;;  %v3888_v2 = vld [vmem:[%s4926_s1 + $0x4b0] sm:$0xff]   ;;  %v662_v3 = vcombine.high %v654_v63, %v654_v63  ;;  %v4560_v4 = vrot.slane %v647_v0, %v4162_v41  ;;  %v3890_v6 = vld [vmem:[%s4926_s1 + $0x4f8] sm:$0xff]  }
  0x67   :  { %3502 = vmatprep.subr.bf16.mxu1 %v3833_v5  ;;  %v3889_v5 = vld [vmem:[%s4926_s1 + $0x478] sm:$0xff]  }
  0x68   :  { %3481 = vmatpush3.bf16.msra.mxu0 %v3834_v7  ;;  %v684_v7 = vrot.slane %v662_v3, %v4162_v41  ;;  %v3939_v0 = vld [vmem:[%s4926_s1 + $0x6d8] sm:$0xff]   ;;  %v3942_v3 = vld [vmem:[%s4926_s1 + $0x660] sm:$0xff]  }
  0x69   :  { %3482 = vmatprep.subr.bf16.mxu0 %v3836_v9  ;;  %v3891_v9 = vld [vmem:[%s4926_s1 + $0x438] sm:$0xff]  }
  0x6a   :  { %3503 = vmatpush3.bf16.msra.mxu1 %v3835_v8  ;;  %v663_v8 = vcombine.high %v4560_v4, %v4560_v4 }
  0x6b   :  { %3504 = vmatprep.subr.bf16.mxu1 %v3837_v10  ;;  %v3892_v10 = vld [vmem:[%s4926_s1 + $0x4b8] sm:$0xff]  }
  0x6c   :  { %3483 = vmatpush3.bf16.msra.mxu0 %v3838_v11  ;;  %v694_v11 = vcombine.high %v684_v7, %v684_v7 }
  0x6d   :  { %3484 = vmatprep.subr.bf16.mxu0 %v3840_v13  ;;  %v3893_v13 = vld [vmem:[%s4926_s1 + $0x540] sm:$0xff]  }
  0x6e   :  { %3505 = vmatpush3.bf16.msra.mxu1 %v3839_v12  ;;  %v670_v12 = vrot.slane %v654_v63, %v4162_v41  ;;  %v3938_v63 = vld [vmem:[%s4926_s1 + $0x658] sm:$0xff]  }
  0x6f   :  { %3506 = vmatprep.subr.bf16.mxu1 %v3841_v14  ;;  %v3894_v14 = vld [vmem:[%s4926_s1 + $0x5c0] sm:$0xff]  }
  0x70   :  { %3485 = vmatpush3.bf16.msra.mxu0 %v3842_v15  ;;  %v691_v15 = vrot.slane %v663_v8, %v4162_v41  ;;  %v3947_v8 = vld [vmem:[%s4926_s1 + $0x6e8] sm:$0xff]  }
  0x71   :  { %3486 = vmatprep.subr.bf16.mxu0 %v3844_v17  ;;  %v3896_v17 = vld [vmem:[%s4926_s1 + $0x580] sm:$0xff]  }
  0x72   :  { %3507 = vmatpush3.bf16.msra.mxu1 %v3843_v16  ;;  %v3895_v16 = vld [vmem:[%s4926_s1 + $0x500] sm:$0xff]  }
  0x73   :  { %3508 = vmatprep.subr.bf16.mxu1 %v3845_v18  ;;  %v692_v18 = vcombine.high %v670_v12, %v670_v12 }
  0x74   :  { %3487 = vmatpush3.bf16.msra.mxu0 %v3846_v19  ;;  %v3897_v19 = vld [vmem:[%s4926_s1 + $0x548] sm:$0xff]  }
  0x75   :  { %3488 = vmatprep.subr.bf16.mxu0 %v3848_v21  ;;  %v695_v21 = vcombine.high %v691_v15, %v691_v15 }
  0x76   :  { %3509 = vmatpush3.bf16.msra.mxu1 %v3847_v20  ;;  %v3898_v20 = vld [vmem:[%s4926_s1 + $0x5c8] sm:$0xff]  }
  0x77   :  { %3510 = vmatprep.subr.bf16.mxu1 %v3849_v22  ;;  %v3899_v22 = vld [vmem:[%s4926_s1 + $0x508] sm:$0xff]  }
  0x78   :  { %3489 = vmatpush3.bf16.msra.mxu0 %v3850_v23  ;;  %v3900_v23 = vld [vmem:[%s4926_s1 + $0x588] sm:$0xff]  }
  0x79   :  { %3490 = vmatprep.subr.bf16.mxu0 %v3852_v25  ;;  %v3902_v25 = vld [vmem:[%s4926_s1 + $0x5d0] sm:$0xff]  }
  0x7a   :  { %3511 = vmatpush3.bf16.msra.mxu1 %v3851_v24  ;;  %v3901_v24 = vld [vmem:[%s4926_s1 + $0x550] sm:$0xff]  }
  0x7b   :  { %3512 = vmatprep.subr.bf16.mxu1 %v3853_v26  ;;  %v3903_v26 = vld [vmem:[%s4926_s1 + $0x510] sm:$0xff]  }
  0x7c   :  { %3491 = vmatpush3.bf16.msra.mxu0 %v3854_v27  ;;  %v3904_v27 = vld [vmem:[%s4926_s1 + $0x590] sm:$0xff]  }
  0x7d   :  { %3492 = vmatprep.subr.bf16.mxu0 %v3856_v29  ;;  %v3906_v29 = vld [vmem:[%s4926_s1 + $0x5d8] sm:$0xff]  }
  0x7e   :  { %3513 = vmatpush3.bf16.msra.mxu1 %v3855_v28  ;;  %v3905_v28 = vld [vmem:[%s4926_s1 + $0x558] sm:$0xff]  }
  0x7f   :  { %3514 = vmatprep.subr.bf16.mxu1 %v3857_v30  ;;  %v3907_v30 = vld [vmem:[%s4926_s1 + $0x518] sm:$0xff]  }
  0x80   :  { %3493 = vmatpush3.bf16.msra.mxu0 %v3858_v31  ;;  %v3908_v31 = vld [vmem:[%s4926_s1 + $0x598] sm:$0xff]  }
  0x81   :  { %3522 = vmatprep.subr.bf16.mxu0 %v3861_v34  ;;  %v3911_v34 = vld [vmem:[%s4926_s1 + $0x520] sm:$0xff]  }
  0x82   :  { %3515 = vmatpush3.bf16.msra.mxu1 %v3859_v32  ;;  %v3909_v32 = vld [vmem:[%s4926_s1 + $0x560] sm:$0xff]  }
  0x83   :  { %2586 = vmatmul.mubr.bf16.vlgmr.msra.gmra.mrb[12].mxu0 %v628_v33  ;;  %3544 = vmatprep.subr.bf16.mxu1 %v3862_v35  ;;  %v3910_v33 = vld [vmem:[%s4926_s1 + $0x5e0] sm:$0xff]  }
  0x84   :  { %3523 = vmatpush3.bf16.msra.mxu0 %v3863_v36  ;;  %2665 = vmatprep.mubr.bf16.mxu0 %v684_v7  ;;  %v3912_v35 = vld [vmem:[%s4926_s1 + $0x5a0] sm:$0xff]   ;;  %v3913_v36 = vld [vmem:[%s4926_s1 + $0x568] sm:$0xff]  }
  0x85   :  { %2626 = vmatmul.mubr.bf16.vlgmr.msra.gmra.mrb[12].mxu1 %v644_v38  ;;  %3524 = vmatprep.subr.bf16.mxu0 %v3865_v39  ;;  %v3915_v38 = vld [vmem:[%s4926_s1 + $0x528] sm:$0xff]  }
  0x86   :  { %3545 = vmatpush3.bf16.msra.mxu1 %v3864_v37  ;;  %2705 = vmatprep.mubr.bf16.mxu1 %v694_v11  ;;  %v3914_v37 = vld [vmem:[%s4926_s1 + $0x5e8] sm:$0xff]   ;;  %v3950_v11 = vld [vmem:[%s4926_s1 + $0x670] sm:$0xff]  }
  0x87   :  { %3546 = vmatprep.subr.bf16.mxu1 %v3866_v40  ;;  %v3916_v39 = vld [vmem:[%s4926_s1 + $0x5a8] sm:$0xff]   ;;  %v3917_v40 = vld [vmem:[%s4926_s1 + $0x570] sm:$0xff]  }
  0x88   :  { %3525 = vmatpush3.bf16.msra.mxu0 %v3867_v42  ;;  %v3918_v42 = vld [vmem:[%s4926_s1 + $0x5f0] sm:$0xff]   ;;  %v3946_v7 = vld [vmem:[%s4926_s1 + $0x668] sm:$0xff]  }
  0x89   :  { %3526 = vmatprep.subr.bf16.mxu0 %v3869_v44  ;;  %v3920_v44 = vld [vmem:[%s4926_s1 + $0x5b0] sm:$0xff]  }
  0x8a   :  { %3547 = vmatpush3.bf16.msra.mxu1 %v3868_v43  ;;  %v3919_v43 = vld [vmem:[%s4926_s1 + $0x530] sm:$0xff]  }
  0x8b   :  { %3548 = vmatprep.subr.bf16.mxu1 %v3870_v45  ;;  %v3921_v45 = vld [vmem:[%s4926_s1 + $0x578] sm:$0xff]  }
  0x8c   :  { %3527 = vmatpush3.bf16.msra.mxu0 %v3871_v46  ;;  %v3922_v46 = vld [vmem:[%s4926_s1 + $0x5f8] sm:$0xff]  }
  0x8d   :  { %3528 = vmatprep.subr.bf16.mxu0 %v3873_v48  ;;  %v3924_v48 = vld [vmem:[%s4926_s1 + $0x5b8] sm:$0xff]  }
  0x8e   :  { %3549 = vmatpush3.bf16.msra.mxu1 %v3872_v47  ;;  %v3923_v47 = vld [vmem:[%s4926_s1 + $0x538] sm:$0xff]  }
  0x8f   :  { %3550 = vmatprep.subr.bf16.mxu1 %v3874_v49  ;;  %v677_v49 = vrot.slane %v4560_v4, %v4162_v41  ;;  %v3943_v4 = vld [vmem:[%s4926_s1 + $0x6e0] sm:$0xff]  }
  0x90   :  { %3529 = vmatpush3.bf16.msra.mxu0 %v3875_v50  ;;  %v3926_v50 = vld [vmem:[%s4926_s1 + $0x640] sm:$0xff]  }
  0x91   :  { %3530 = vmatprep.subr.bf16.mxu0 %v3877_v52  ;;  %v3928_v52 = vld [vmem:[%s4926_s1 + $0x600] sm:$0xff]  }
  0x92   :  { %3551 = vmatpush3.bf16.msra.mxu1 %v3876_v51  ;;  %v3927_v51 = vld [vmem:[%s4926_s1 + $0x6c0] sm:$0xff]  }
  0x93   :  { %3552 = vmatprep.subr.bf16.mxu1 %v3878_v53  ;;  %v3929_v53 = vld [vmem:[%s4926_s1 + $0x680] sm:$0xff]  }
  0x94   :  { %3531 = vmatpush3.bf16.msra.mxu0 %v3879_v54  ;;  %v693_v54 = vcombine.high %v677_v49, %v677_v49 }
  0x95   :  { %3532 = vmatprep.subr.bf16.mxu0 %v3881_v56  ;;  %v3931_v56 = vld [vmem:[%s4926_s1 + $0x6c8] sm:$0xff]  }
  0x96   :  { %3553 = vmatpush3.bf16.msra.mxu1 %v3880_v55  ;;  %v3930_v55 = vld [vmem:[%s4926_s1 + $0x648] sm:$0xff]  }
  0x97   :  { %3554 = vmatprep.subr.bf16.mxu1 %v3882_v57  ;;  %v3932_v57 = vld [vmem:[%s4926_s1 + $0x608] sm:$0xff]  }
  0x98   :  { %3533 = vmatpush3.bf16.msra.mxu0 %v3883_v58  ;;  %v3933_v58 = vld [vmem:[%s4926_s1 + $0x688] sm:$0xff]  }
  0x99   :  { %3534 = vmatprep.subr.bf16.mxu0 %v3885_v60  ;;  %v3935_v60 = vld [vmem:[%s4926_s1 + $0x6d0] sm:$0xff]  }
  0x9a   :  { %3555 = vmatpush3.bf16.msra.mxu1 %v3884_v59  ;;  %v3934_v59 = vld [vmem:[%s4926_s1 + $0x650] sm:$0xff]  }
  0x9b   :  { %3556 = vmatprep.subr.bf16.mxu1 %v3886_v62  ;;  %v3937_v62 = vld [vmem:[%s4926_s1 + $0x690] sm:$0xff]  }
  0x9c   :  { %3535 = vmatpush3.bf16.msra.mxu0 %v3887_v1  ;;  %v3940_v1 = vld [vmem:[%s4926_s1 + $0x618] sm:$0xff]  }
  0x9d   :  { %3536 = vmatprep.subr.bf16.mxu0 %v3889_v5  ;;  %v3944_v5 = vld [vmem:[%s4926_s1 + $0x620] sm:$0xff]  }
  0x9e   :  { %3557 = vmatpush3.bf16.msra.mxu1 %v3888_v2  ;;  %v3941_v2 = vld [vmem:[%s4926_s1 + $0x698] sm:$0xff]  }
  0x9f   :  { %3558 = vmatprep.subr.bf16.mxu1 %v3890_v6  ;;  %v3945_v6 = vld [vmem:[%s4926_s1 + $0x6a0] sm:$0xff]  }
  0xa0   :  { %3537 = vmatpush3.bf16.msra.mxu0 %v3891_v9  ;;  %v3948_v9 = vld [vmem:[%s4926_s1 + $0x628] sm:$0xff]  }
  0xa1   :  { %3566 = vmatprep.subr.bf16.mxu0 %v3893_v13  ;;  %v3951_v13 = vld [vmem:[%s4926_s1 + $0x6f0] sm:$0xff]  }
  0xa2   :  { %3559 = vmatpush3.bf16.msra.mxu1 %v3892_v10  ;;  %v3949_v10 = vld [vmem:[%s4926_s1 + $0x6a8] sm:$0xff]  }
  0xa3   :  { %2666 = vmatmul.mubr.bf16.vlgmr.msra.gmra.mrb[16].mxu0 %v670_v12  ;;  %3588 = vmatprep.subr.bf16.mxu1 %v3894_v14  ;;  %v25_v12 = vld [vmem:[%s4925_s0 + $0x18] sm:$0xff] }
  0xa4   :  { %3567 = vmatpush3.bf16.msra.mxu0 %v3895_v16  ;;  %2745 = vmatprep.mubr.bf16.mxu0 %v691_v15  ;;  %v703_v14 = vrot.slane %v25_v12, %v4162_v41  ;;  %v696_v15 = vcombine.high %v25_v12, %v25_v12  ;;  %v3952_v16 = vld [vmem:[%s4926_s1 + $0x630] sm:$0xff]  }
  0xa5   :  { %2706 = vmatmul.mubr.bf16.vlgmr.msra.gmra.mrb[16].mxu1 %v692_v18  ;;  %3568 = vmatprep.subr.bf16.mxu0 %v3897_v19 }
  0xa6   :  { %3589 = vmatpush3.bf16.msra.mxu1 %v3896_v17  ;;  %2785 = vmatprep.mubr.bf16.mxu1 %v695_v21  ;;  %v3954_v17 = vld [vmem:[%s4926_s1 + $0x678] sm:$0xff]   ;;  %v711_v18 = vcombine.high %v703_v14, %v703_v14  ;;  %v4766_v19 = vrot.slane %v696_v15, %v4162_v41 }
  0xa7   :  { %3590 = vmatprep.subr.bf16.mxu1 %v3898_v20  ;;  %v3953_v20 = vld [vmem:[%s4926_s1 + $0x6b0] sm:$0xff]   ;;  %v3955_v21 = vld [vmem:[%s4926_s1 + $0x6f8] sm:$0xff]  }
  0xa8   :  { %3569 = vmatpush3.bf16.msra.mxu0 %v3899_v22  ;;  %v733_v22 = vrot.slane %v711_v18, %v4162_v41  ;;  %v726_v12 = vrot.slane %v4766_v19, %v4162_v41 }
  0xa9   :  { %3570 = vmatprep.subr.bf16.mxu0 %v3901_v24  ;;  %v3956_v24 = vld [vmem:[%s4926_s1 + $0x638] sm:$0xff]  }
  0xaa   :  { %3591 = vmatpush3.bf16.msra.mxu1 %v3900_v23  ;;  %v712_v23 = vcombine.high %v4766_v19, %v4766_v19 }
  0xab   :  { %3592 = vmatprep.subr.bf16.mxu1 %v3902_v25  ;;  %v743_v25 = vcombine.high %v733_v22, %v733_v22 }
  0xac   :  { %3571 = vmatpush3.bf16.msra.mxu0 %v3903_v26  ;;  %v719_v26 = vrot.slane %v703_v14, %v4162_v41 }
  0xad   :  { %3572 = vmatprep.subr.bf16.mxu0 %v3905_v28  ;;  %v3957_v28 = vld [vmem:[%s4926_s1 + $0x6b8] sm:$0xff]  }
  0xae   :  { %3593 = vmatpush3.bf16.msra.mxu1 %v3904_v27  ;;  %v3958_v27 = vld [vmem:[%s4926_s1 + $0x740] sm:$0xff]  }
  0xaf   :  { %3594 = vmatprep.subr.bf16.mxu1 %v3906_v29  ;;  %v740_v29 = vrot.slane %v712_v23, %v4162_v41 }
  0xb0   :  { %3573 = vmatpush3.bf16.msra.mxu0 %v3907_v30  ;;  %v3959_v30 = vld [vmem:[%s4926_s1 + $0x7c0] sm:$0xff]  }
  0xb1   :  { %3574 = vmatprep.subr.bf16.mxu0 %v3909_v32  ;;  %v741_v32 = vcombine.high %v719_v26, %v719_v26 }
  0xb2   :  { %3595 = vmatpush3.bf16.msra.mxu1 %v3908_v31  ;;  %v3960_v31 = vld [vmem:[%s4926_s1 + $0x700] sm:$0xff]  }
  0xb3   :  { %3596 = vmatprep.subr.bf16.mxu1 %v3910_v33  ;;  %v3962_v33 = vld [vmem:[%s4926_s1 + $0x748] sm:$0xff]  }
  0xb4   :  { %3575 = vmatpush3.bf16.msra.mxu0 %v3911_v34  ;;  %v3961_v34 = vld [vmem:[%s4926_s1 + $0x780] sm:$0xff]  }
  0xb5   :  { %3576 = vmatprep.subr.bf16.mxu0 %v3913_v36  ;;  %v3963_v36 = vld [vmem:[%s4926_s1 + $0x7c8] sm:$0xff]  }
  0xb6   :  { %3597 = vmatpush3.bf16.msra.mxu1 %v3912_v35  ;;  %v744_v35 = vcombine.high %v740_v29, %v740_v29 }
  0xb7   :  { %3598 = vmatprep.subr.bf16.mxu1 %v3914_v37  ;;  %v3964_v37 = vld [vmem:[%s4926_s1 + $0x708] sm:$0xff]  }
  0xb8   :  { %3577 = vmatpush3.bf16.msra.mxu0 %v3915_v38  ;;  %v3966_v38 = vld [vmem:[%s4926_s1 + $0x750] sm:$0xff]  }
  0xb9   :  { %3578 = vmatprep.subr.bf16.mxu0 %v3917_v40  ;;  %v3967_v40 = vld [vmem:[%s4926_s1 + $0x7d0] sm:$0xff]  }
  0xba   :  { %3599 = vmatpush3.bf16.msra.mxu1 %v3916_v39  ;;  %v3965_v39 = vld [vmem:[%s4926_s1 + $0x788] sm:$0xff]  }
  0xbb   :  { %3600 = vmatprep.subr.bf16.mxu1 %v3918_v42  ;;  %v3968_v42 = vld [vmem:[%s4926_s1 + $0x710] sm:$0xff]  }
  0xbc   :  { %3579 = vmatpush3.bf16.msra.mxu0 %v3919_v43  ;;  %v3970_v43 = vld [vmem:[%s4926_s1 + $0x758] sm:$0xff]  }
  0xbd   :  { %3580 = vmatprep.subr.bf16.mxu0 %v3921_v45  ;;  %v3971_v45 = vld [vmem:[%s4926_s1 + $0x7d8] sm:$0xff]  }
  0xbe   :  { %3601 = vmatpush3.bf16.msra.mxu1 %v3920_v44  ;;  %v3969_v44 = vld [vmem:[%s4926_s1 + $0x790] sm:$0xff]  }
  0xbf   :  { %3602 = vmatprep.subr.bf16.mxu1 %v3922_v46  ;;  %v3972_v46 = vld [vmem:[%s4926_s1 + $0x718] sm:$0xff]  }
  0xc0   :  { %3581 = vmatpush3.bf16.msra.mxu0 %v3923_v47  ;;  %v3973_v47 = vld [vmem:[%s4926_s1 + $0x798] sm:$0xff]  }
  0xc1   :  { %3610 = vmatprep.subr.bf16.mxu0 %v3926_v50  ;;  %v3976_v50 = vld [vmem:[%s4926_s1 + $0x720] sm:$0xff]  }
  0xc2   :  { %3603 = vmatpush3.bf16.msra.mxu1 %v3924_v48  ;;  %v3974_v48 = vld [vmem:[%s4926_s1 + $0x760] sm:$0xff]  }
  0xc3   :  { %2746 = vmatmul.mubr.bf16.vlgmr.msra.gmra.mrb[20].mxu0 %v677_v49  ;;  %3632 = vmatprep.subr.bf16.mxu1 %v3927_v51  ;;  %v3975_v49 = vld [vmem:[%s4926_s1 + $0x7e0] sm:$0xff]  }
  0xc4   :  { %3611 = vmatpush3.bf16.msra.mxu0 %v3928_v52  ;;  %2825 = vmatprep.mubr.bf16.mxu0 %v733_v22  ;;  %v3977_v51 = vld [vmem:[%s4926_s1 + $0x7a0] sm:$0xff]   ;;  %v3978_v52 = vld [vmem:[%s4926_s1 + $0x768] sm:$0xff]  }
  0xc5   :  { %2786 = vmatmul.mubr.bf16.vlgmr.msra.gmra.mrb[20].mxu1 %v693_v54  ;;  %3612 = vmatprep.subr.bf16.mxu0 %v3930_v55  ;;  %v3980_v54 = vld [vmem:[%s4926_s1 + $0x728] sm:$0xff]  }
  0xc6   :  { %3633 = vmatpush3.bf16.msra.mxu1 %v3929_v53  ;;  %2865 = vmatprep.mubr.bf16.mxu1 %v743_v25  ;;  %v3979_v53 = vld [vmem:[%s4926_s1 + $0x7e8] sm:$0xff]  }
  0xc7   :  { %3634 = vmatprep.subr.bf16.mxu1 %v3931_v56  ;;  %v3981_v55 = vld [vmem:[%s4926_s1 + $0x7a8] sm:$0xff]   ;;  %v3982_v56 = vld [vmem:[%s4926_s1 + $0x770] sm:$0xff]  }
  0xc8   :  { %3613 = vmatpush3.bf16.msra.mxu0 %v3932_v57  ;;  %v3080_v57 = vld [vmem:[%s4927_s2] ss:$0 sm:$0xff] }
  0xc9   :  { %3614 = vmatprep.subr.bf16.mxu0 %v3934_v59 }
  0xca   :  { %3635 = vmatpush3.bf16.msra.mxu1 %v3933_v58  ;;  %v3983_v58 = vld [vmem:[%s4926_s1 + $0x7f0] sm:$0xff]  }
  0xcb   :  { %3636 = vmatprep.subr.bf16.mxu1 %v3935_v60  ;;  %v3984_v60 = vld [vmem:[%s4926_s1 + $0x730] sm:$0xff]  }
  0xcc   :  { %3615 = vmatpush3.bf16.msra.mxu0 %v3936_v61 }
  0xcd   :  { %3616 = vmatprep.subr.bf16.mxu0 %v3938_v63 }
  0xce   :  { %3637 = vmatpush3.bf16.msra.mxu1 %v3937_v62  ;;  %v3986_v62 = vld [vmem:[%s4926_s1 + $0x778] sm:$0xff]  }
  0xcf   :  { %3638 = vmatprep.subr.bf16.mxu1 %v3939_v0 }
  0xd0   :  { %3617 = vmatpush3.bf16.msra.mxu0 %v3940_v1 }
  0xd1   :  { %3618 = vmatprep.subr.bf16.mxu0 %v3942_v3 }
  0xd2   :  { %3639 = vmatpush3.bf16.msra.mxu1 %v3941_v2  ;;  %v3985_v2 = vld [vmem:[%s4926_s1 + $0x7b0] sm:$0xff]  }
  0xd3   :  { %3640 = vmatprep.subr.bf16.mxu1 %v3943_v4 }
  0xd4   :  { %3619 = vmatpush3.bf16.msra.mxu0 %v3944_v5 }
  0xd5   :  { %3620 = vmatprep.subr.bf16.mxu0 %v3946_v7 }
  0xd6   :  { %3641 = vmatpush3.bf16.msra.mxu1 %v3945_v6 }
  0xd7   :  { %3642 = vmatprep.subr.bf16.mxu1 %v3947_v8  ;;  %v3987_v8 = vld [vmem:[%s4926_s1 + $0x7f8] sm:$0xff]  }
  0xd8   :  { %3621 = vmatpush3.bf16.msra.mxu0 %v3948_v9 }
  0xd9   :  { %3622 = vmatprep.subr.bf16.mxu0 %v3950_v11 }
  0xda   :  { %3643 = vmatpush3.bf16.msra.mxu1 %v3949_v10  ;;  %v3988_v10 = vld [vmem:[%s4926_s1 + $0x738] sm:$0xff]  }
  0xdb   :  { %3644 = vmatprep.subr.bf16.mxu1 %v3951_v13 }
  0xdc   :  { %3623 = vmatpush3.bf16.msra.mxu0 %v3952_v16 }
  0xdd   :  { %3624 = vmatprep.subr.bf16.mxu0 %v3954_v17 }
  0xde   :  { %3645 = vmatpush3.bf16.msra.mxu1 %v3953_v20 }
  0xdf   :  { %3646 = vmatprep.subr.bf16.mxu1 %v3955_v21 }
  0xe0   :  { %3625 = vmatpush3.bf16.msra.mxu0 %v3956_v24 }
  0xe1   :  { %3654 = vmatprep.subr.bf16.mxu0 %v3958_v27 }
  0xe2   :  { %3647 = vmatpush3.bf16.msra.mxu1 %v3957_v28 }
  0xe3   :  { %2826 = vmatmul.mubr.bf16.vlgmr.msra.gmra.mrb[24].mxu0 %v719_v26  ;;  %3676 = vmatprep.subr.bf16.mxu1 %v3959_v30 }
  0xe4   :  { %3655 = vmatpush3.bf16.msra.mxu0 %v3960_v31  ;;  %2905 = vmatprep.mubr.bf16.mxu0 %v740_v29 }
  0xe5   :  { %2866 = vmatmul.mubr.bf16.vlgmr.msra.gmra.mrb[24].mxu1 %v741_v32  ;;  %3656 = vmatprep.subr.bf16.mxu0 %v3962_v33 }
  0xe6   :  { %3677 = vmatpush3.bf16.msra.mxu1 %v3961_v34  ;;  %2945 = vmatprep.mubr.bf16.mxu1 %v744_v35 }
  0xe7   :  { %3678 = vmatprep.subr.bf16.mxu1 %v3963_v36 }
  0xe8   :  { %3657 = vmatpush3.bf16.msra.mxu0 %v3964_v37 }
  0xe9   :  { %3658 = vmatprep.subr.bf16.mxu0 %v3966_v38 }
  0xea   :  { %3679 = vmatpush3.bf16.msra.mxu1 %v3965_v39 }
  0xeb   :  { %3680 = vmatprep.subr.bf16.mxu1 %v3967_v40 }
  0xec   :  { %3659 = vmatpush3.bf16.msra.mxu0 %v3968_v42 }
  0xed   :  { %3660 = vmatprep.subr.bf16.mxu0 %v3970_v43 }
  0xee   :  { %3681 = vmatpush3.bf16.msra.mxu1 %v3969_v44 }
  0xef   :  { %3682 = vmatprep.subr.bf16.mxu1 %v3971_v45 }
  0xf0   :  { %3661 = vmatpush3.bf16.msra.mxu0 %v3972_v46 }
  0xf1   :  { %3662 = vmatprep.subr.bf16.mxu0 %v3974_v48 }
  0xf2   :  { %3683 = vmatpush3.bf16.msra.mxu1 %v3973_v47 }
  0xf3   :  { %3684 = vmatprep.subr.bf16.mxu1 %v3975_v49 }
  0xf4   :  { %3663 = vmatpush3.bf16.msra.mxu0 %v3976_v50 }
  0xf5   :  { %3664 = vmatprep.subr.bf16.mxu0 %v3978_v52 }
  0xf6   :  { %3685 = vmatpush3.bf16.msra.mxu1 %v3977_v51  ;;  %v3362_v59 = vpop.f32.mrb[0].mxu0 }
  0xf7   :  { %v3363_v61 = vpop.f32.mrb[1].mxu0  ;;  %3686 = vmatprep.subr.bf16.mxu1 %v3979_v53  ;;  %v3384_v63 = vpop.f32.mrb[0].mxu1 }
  0xf8   :  { %v3364_v0 = vadd.f32 %v3363_v61, %v3362_v59  ;;  %v3365_v1 = vpop.f32.mrb[2].mxu0  ;;  %3665 = vmatpush3.bf16.msra.mxu0 %v3980_v54  ;;  %v3385_v3 = vpop.f32.mrb[1].mxu1 }
  0xf9   :  { %v3366_v4 = vpop.f32.mrb[3].mxu0  ;;  %3666 = vmatprep.subr.bf16.mxu0 %v3982_v56  ;;  %v3386_v6 = vadd.f32 %v3385_v3, %v3384_v63  ;;  %v3387_v7 = vpop.f32.mrb[2].mxu1 }
  0xfa   :  { %v2348_v5 = vadd.f32 %v3364_v0, %v3080_v57  ;;  %3687 = vmatpush3.bf16.msra.mxu1 %v3981_v55  ;;  %v3388_v9 = vpop.f32.mrb[3].mxu1 }
  0xfb   :  { %3688 = vmatprep.subr.bf16.mxu1 %v3983_v58 }
  0xfc   :  { %v2388_v11 = vadd.f32 %v3386_v6, %v2348_v5  ;;  %3667 = vmatpush3.bf16.msra.mxu0 %v3984_v60 }
  0xfd   :  { %3668 = vmatprep.subr.bf16.mxu0 %v3986_v62 }
  0xfe   :  { %10 = vsyncpa [#allocation3], 0  ;;  %3689 = vmatpush3.bf16.msra.mxu1 %v3985_v2  ;;  %v3989_v13 = vld [vmem:[%s4926_s1 + $0x7b8] sm:$0xff]   ;;  %v742_v14 = vcombine.high %v726_v12, %v726_v12  ;;  %v3991_v38 = vld [vmem:[%s4928_s3] sm:$0xff]   ;;  %v4024_v39 = vmov 0.0   ;;  %vm4025_vm0 = vmmov 0  }
  0xff   :  { %3690 = vmatprep.subr.bf16.mxu1 %v3987_v8  ;;  %v3992_v40 = vld [vmem:[%s4928_s3 + $0x8] sm:$0xff]   ;;  %v3993_v42 = vld [vmem:[%s4928_s3 + $0x10] sm:$0xff]   ;;  %v3994_v43 = vld [vmem:[%s4928_s3 + $0x18] sm:$0xff]   ;;  %s4026_s26 = smov [#allocation2]  }
 0x100   :  { %3669 = vmatpush3.bf16.msra.mxu0 %v3988_v10  ;;  %v3995_v44 = vld [vmem:[%s4928_s3 + $0x20] sm:$0xff]   ;;  %v3996_v45 = vld [vmem:[%s4928_s3 + $0x28] sm:$0xff]   ;;  %v3997_v53 = vld [vmem:[%s4928_s3 + $0x30] sm:$0xff]   ;;  %s3072_s27 = sshll.u32 %s4026_s26, 4  ;;  %s3073_s27 = int_to_ptr.vmem [resolvable:$true] %s3072_s27 }
 0x101   :  { %3707 = vmatprep.subr.bf16.mxu0 %v4024_v39  ;;  %v3998_v59 = vld [vmem:[%s4928_s3 + $0x38] sm:$0xff]   ;;  %s3999_s28 = scalar_lea.vmem %s3073_s27, 32  ;;  %p4004_p1 = scmp.lt.s32.totalorder %s3073_s27, %s3073_s27 }
 0x102   :  { %3691 = vmatpush3.bf16.msra.mxu1 %v3989_v13  ;;  %p4000_p0 = scmp.ne.s32.totalorder %s3073_s27, %s3999_s28  ;;  %p4005_p2 = scmp.lt.s32.totalorder %s3999_s28, %s3999_s28 }
 0x103   :  { %2906 = vmatmul.mubr.bf16.vlgmr.msra.gmra.mrb[28].mxu0 %v726_v12 }
 0x104   :  { %3708 = vmatpush3.bf16.msra.mxu0 %v3991_v38  ;;  %3723 = vmatprep.mubr.msk.bf16.mxu0 %vm4025_vm0, %v4024_v39  ;;  %p4006_p3 = por %p4005_p2, %p4004_p1 }
 0x105   :  { %2946 = vmatmul.mubr.bf16.vlgmr.msra.gmra.mrb[28].mxu1 %v742_v14  ;;  %3709 = vmatprep.subr.bf16.mxu0 %v4024_v39 }
 0x106   :  { %p4007_p4 = pnand %p4006_p3, %p4000_p0 }
 0x108   :  { %3710 = vmatpush3.bf16.msra.mxu0 %v3992_v40 }
 0x109   :  { %3711 = vmatprep.subr.bf16.mxu0 %v4024_v39 }
 0x10c   :  { %3712 = vmatpush3.bf16.msra.mxu0 %v3993_v42 }
 0x10d   :  { %3713 = vmatprep.subr.bf16.mxu0 %v4024_v39 }
 0x110   :  { %3714 = vmatpush3.bf16.msra.mxu0 %v3994_v43 }
 0x111   :  { %3715 = vmatprep.subr.bf16.mxu0 %v4024_v39 }
 0x114   :  { %3716 = vmatpush3.bf16.msra.mxu0 %v3995_v44 }
 0x115   :  { %3717 = vmatprep.subr.bf16.mxu0 %v4024_v39 }
 0x116   :  { %v3406_v15 = vpop.f32.mrb[4].mxu0 }
 0x117   :  { %v3407_v16 = vpop.f32.mrb[5].mxu0  ;;  %v3428_v17 = vpop.f32.mrb[4].mxu1 }
 0x118   :  { %v3408_v18 = vadd.f32 %v3407_v16, %v3406_v15  ;;  %v3409_v20 = vpop.f32.mrb[6].mxu0  ;;  %v3429_v21 = vpop.f32.mrb[5].mxu1  ;;  %3718 = vmatpush3.bf16.msra.mxu0 %v3996_v45  ;;  %v3337_v45 = vld [vmem:[%s4929_s4] ss:$0 sm:$0xff] }
 0x119   :  { %v3410_v22 = vpop.f32.mrb[7].mxu0  ;;  %v3430_v19 = vadd.f32 %v3429_v21, %v3428_v17  ;;  %v3431_v23 = vpop.f32.mrb[6].mxu1  ;;  %3719 = vmatprep.subr.bf16.mxu0 %v4024_v39 }
 0x11a   :  { %v2428_v41 = vadd.f32 %v3408_v18, %v2388_v11  ;;  %v3432_v24 = vpop.f32.mrb[7].mxu1 }
 0x11c   :  { %v2468_v25 = vadd.f32 %v3430_v19, %v2428_v41  ;;  %3720 = vmatpush3.bf16.msra.mxu0 %v3997_v53 }
 0x11d   :  { %3721 = vmatprep.subr.bf16.mxu0 %v4024_v39 }
 0x120   :  { %3722 = vmatpush3.bf16.msra.mxu0 %v3998_v59 }
 0x136   :  { %v3450_v26 = vpop.f32.mrb[8].mxu0 }
 0x137   :  { %v3451_v27 = vpop.f32.mrb[9].mxu0 }
 0x138   :  { %v3472_v28 = vpop.f32.mrb[8].mxu1  ;;  %v3452_v29 = vadd.f32 %v3451_v27, %v3450_v26  ;;  %v3453_v30 = vpop.f32.mrb[10].mxu0 }
 0x139   :  { %v3473_v31 = vpop.f32.mrb[9].mxu1  ;;  %v3454_v32 = vpop.f32.mrb[11].mxu0 }
 0x13a   :  { %v2508_v33 = vadd.f32 %v3452_v29, %v2468_v25  ;;  %v3474_v34 = vadd.f32 %v3473_v31, %v3472_v28  ;;  %v3475_v35 = vpop.f32.mrb[10].mxu1 }
 0x13b   :  { %v3476_v36 = vpop.f32.mrb[11].mxu1 }
 0x13c   :  { %v2548_v37 = vadd.f32 %v3474_v34, %v2508_v33 }
 0x156   :  { %v3494_v46 = vpop.f32.mrb[12].mxu0 }
 0x157   :  { %v3495_v47 = vpop.f32.mrb[13].mxu0 }
 0x158   :  { %v3516_v48 = vpop.f32.mrb[12].mxu1  ;;  %v3496_v49 = vadd.f32 %v3495_v47, %v3494_v46  ;;  %v3497_v50 = vpop.f32.mrb[14].mxu0 }
 0x159   :  { %v3517_v51 = vpop.f32.mrb[13].mxu1  ;;  %v3498_v52 = vpop.f32.mrb[15].mxu0 }
 0x15a   :  { %v2588_v54 = vadd.f32 %v3496_v49, %v2548_v37  ;;  %v3518_v55 = vadd.f32 %v3517_v51, %v3516_v48  ;;  %v3519_v56 = vpop.f32.mrb[14].mxu1 }
 0x15b   :  { %v3520_v57 = vpop.f32.mrb[15].mxu1 }
 0x15c   :  { %v2628_v58 = vadd.f32 %v3518_v55, %v2588_v54 }
 0x176   :  { %v3538_v60 = vpop.f32.mrb[16].mxu0 }
 0x177   :  { %v3539_v61 = vpop.f32.mrb[17].mxu0 }
 0x178   :  { %v3560_v62 = vpop.f32.mrb[16].mxu1  ;;  %v3540_v63 = vadd.f32 %v3539_v61, %v3538_v60  ;;  %v3541_v0 = vpop.f32.mrb[18].mxu0 }
 0x179   :  { %v3561_v1 = vpop.f32.mrb[17].mxu1  ;;  %v3542_v2 = vpop.f32.mrb[19].mxu0 }
 0x17a   :  { %v2668_v3 = vadd.f32 %v3540_v63, %v2628_v58  ;;  %v3562_v4 = vadd.f32 %v3561_v1, %v3560_v62  ;;  %v3563_v5 = vpop.f32.mrb[18].mxu1 }
 0x17b   :  { %v3564_v6 = vpop.f32.mrb[19].mxu1 }
 0x17c   :  { %v2708_v7 = vadd.f32 %v3562_v4, %v2668_v3 }
 0x196   :  { %v3582_v8 = vpop.f32.mrb[20].mxu0 }
 0x197   :  { %v3583_v9 = vpop.f32.mrb[21].mxu0 }
 0x198   :  { %v3604_v10 = vpop.f32.mrb[20].mxu1  ;;  %v3584_v11 = vadd.f32 %v3583_v9, %v3582_v8  ;;  %v3585_v12 = vpop.f32.mrb[22].mxu0 }
 0x199   :  { %v3605_v13 = vpop.f32.mrb[21].mxu1  ;;  %v3586_v14 = vpop.f32.mrb[23].mxu0 }
 0x19a   :  { %v2748_v15 = vadd.f32 %v3584_v11, %v2708_v7  ;;  %v3606_v16 = vadd.f32 %v3605_v13, %v3604_v10  ;;  %v3607_v17 = vpop.f32.mrb[22].mxu1 }
 0x19b   :  { %v3608_v18 = vpop.f32.mrb[23].mxu1 }
 0x19c   :  { %v2788_v20 = vadd.f32 %v3606_v16, %v2748_v15 }
 0x1b6   :  { %v3626_v21 = vpop.f32.mrb[24].mxu0 }
 0x1b7   :  { %v3627_v22 = vpop.f32.mrb[25].mxu0 }
 0x1b8   :  { %v3648_v41 = vpop.f32.mrb[24].mxu1  ;;  %v3628_v19 = vadd.f32 %v3627_v22, %v3626_v21  ;;  %v3629_v23 = vpop.f32.mrb[26].mxu0 }
 0x1b9   :  { %v3649_v24 = vpop.f32.mrb[25].mxu1  ;;  %v3630_v25 = vpop.f32.mrb[27].mxu0 }
 0x1ba   :  { %v2828_v26 = vadd.f32 %v3628_v19, %v2788_v20  ;;  %v3650_v27 = vadd.f32 %v3649_v24, %v3648_v41  ;;  %v3651_v28 = vpop.f32.mrb[26].mxu1 }
 0x1bb   :  { %v3652_v29 = vpop.f32.mrb[27].mxu1 }
 0x1bc   :  { %v2868_v30 = vadd.f32 %v3650_v27, %v2828_v26 }
 0x1d6   :  { %v3670_v31 = vpop.f32.mrb[28].mxu0 }
 0x1d7   :  { %v3671_v32 = vpop.f32.mrb[29].mxu0 }
 0x1d8   :  { %v3692_v33 = vpop.f32.mrb[28].mxu1  ;;  %v3672_v34 = vadd.f32 %v3671_v32, %v3670_v31  ;;  %v3673_v35 = vpop.f32.mrb[30].mxu0 }
 0x1d9   :  { %v3693_v36 = vpop.f32.mrb[29].mxu1  ;;  %v3674_v37 = vpop.f32.mrb[31].mxu0 }
 0x1da   :  { %v2908_v38 = vadd.f32 %v3672_v34, %v2868_v30  ;;  %v3694_v39 = vadd.f32 %v3693_v36, %v3692_v33  ;;  %v3695_v40 = vpop.f32.mrb[30].mxu1 }
 0x1db   :  { %v3696_v42 = vpop.f32.mrb[31].mxu1 }
 0x1dc   :  { %v2948_v43 = vadd.f32 %v3694_v39, %v2908_v38 }
 0x1de   :  { %v2953_v44 = vpack.c.bf16 %v2948_v43, %v2948_v43 }
 0x1e0   :  { %3724 = vmatmul.mubr.bf16.vlgmr.msra.gmra.mrb[32].mxu0 %v2953_v44 }
 0x2b3   :  { %v3059_v46 = vpop.f32.mrb[32].mxu0 }
 0x2b4   :  { %v3060_v47 = vadd.f32 %v3337_v45, %v3059_v46  ;;  %v3725_v48 = vpop.f32.mrb[33].mxu0 }
 0x2b5   :  { %v3062_v49 = vpop.f32.mrb[34].mxu0 }
 0x2b6   :  { %3065 = vst [vmem:[#allocation2] sm:$0x3] %v3060_v47  ;;  %v3726_v50 = vpop.f32.mrb[35].mxu0 }
 0x2b7   :  { %4010 = shalt.err (!%p4007_p4)
}
 0x2b8   :  { %s4011_s4 = scalar_lea.hbm %s4930_s5, 32 }
 0x2b9   :  { %p4012_p5 = scmp.ne.s32.totalorder %s4930_s5, %s4011_s4  ;;  %p4015_p6 = scmp.lt.u32.totalorder %s4011_s4, %s4930_s5 }
 0x2bb   :  { %p4017_p7 = pnand %p4015_p6, %p4012_p5 }
 0x2bd   :  { %4020 = shalt.err (!%p4017_p7)
}
 0x2be   :  { %3075 = dma.vmem_to_hbm [thread:$0]  %s3073_s27, 32, %s4930_s5, [#allocation3]  }
 0x2bf   :  { %4021 = dma.done.wait [#allocation3], 32  }
 0x2c0   :  { %4022 = vsyncadd [#allocation3], 4294967264 }
 0x2c1   :  { %3079 = vsyncpa [#allocation3], 1 }

</bundles_post_ra>
